<compile_context>
chip_gen: v7x
topology: tpu7x:2x2x1
jax: 0.10.0
libtpu: 0.0.40
codegen_flags: <defaults>
</compile_context>

<pallas_src>
import jax
import jax.numpy as jnp
from jax.experimental import pallas as pl
from jax.experimental.pallas import tpu as pltpu

N, C, H, W = 1, 784, 7, 7
HW = H * W
EPS = 1e-5
TILE_COUT = 392                    # 784 = 2 * 392 -> grid=(2,), no padded tile
NUM_TILES = C // TILE_COUT         # 2


def fused_kernel(a_ref, b_ref, w_ref, gb_ref, o_ref):
    # a_ref, b_ref : (Cin, HW) f32, full-resident (constant index_map -> DMA'd once).
    # w_ref        : (1, TILE_COUT, Cin) bf16 tile of the 1x1-conv weight.
    # gb_ref       : (TILE_COUT, 2) f32, packed [gamma | beta] for this tile.
    # o_ref        : (TILE_COUT, HW) f32 output tile.

    # add + relu.  Recomputed per tile (trivial VALU work) so the grid axis
    # carries no cross-tile state and stays "parallel" / megacore-splittable.
    y = jnp.maximum(a_ref[...] + b_ref[...], 0.0)                  # (Cin, HW) f32
    y_bf16 = y.astype(jnp.bfloat16)

    # 1x1 conv == matmul over Cin: (tile, Cin) @ (Cin, HW) -> (tile, HW),
    # bf16 operands, f32 accumulation (single MXU pass).
    z = jnp.dot(w_ref[0], y_bf16,
                preferred_element_type=jnp.float32)                # (tile, HW) f32

    # BatchNorm2d, training mode: biased batch statistics over (N, H, W),
    # i.e. the column (HW) axis here.  Two-pass variance for robustness, and
    # the normalization folded into a per-channel scale/shift.
    inv_hw = jnp.float32(1.0 / HW)
    mean = jnp.sum(z, axis=1, keepdims=True) * inv_hw              # (tile, 1)
    d = z - mean
    var = jnp.sum(d * d, axis=1, keepdims=True) * inv_hw           # biased
    gamma = gb_ref[:, 0:1]                                         # (tile, 1)
    beta = gb_ref[:, 1:2]                                          # (tile, 1)
    scale = jax.lax.rsqrt(var + EPS) * gamma                       # (tile, 1)
    o_ref[...] = d * scale + beta


def prepare_conv_weight(conv_weight):
    """(Cout, Cin, 1, 1) f32 -> (NUM_TILES, TILE_COUT, Cin) bf16.

    One-time preparation outside the hot path ("store the weight in bf16"):
    halves the dominant HBM traffic, and the 3-D tiled shape keeps each
    weight block's last two dims equal to the full array dims, so no bf16
    sublane/block-alignment constraints apply.
    """
    cout, cin = conv_weight.shape[0], conv_weight.shape[1]
    w2d = conv_weight.reshape(cout, cin).astype(jnp.bfloat16)
    return w2d.reshape(NUM_TILES, TILE_COUT, cin)


def fused_forward(x203, x217, w_tiles, gamma, beta):
    # x203, x217 : (N, C, H, W) float32, N == 1
    # w_tiles    : (NUM_TILES, TILE_COUT, Cin) bfloat16 (pre-tiled 1x1 weight)
    # gamma,beta : (C,) float32
    n, c, h, w = x203.shape
    assert n == 1, "kernel layout assumes N == 1"
    # TODO(synk): for N > 1 the contiguous (C, H*W) reshape and per-row batch
    # statistics are invalid; a (C, N*H*W) gather layout would be required.
    hw = h * w

    # Zero-cost contiguous reshapes (no HBM relayout traffic):
    a2d = x203.reshape(c, hw)                                      # (Cin, HW)
    b2d = x217.reshape(c, hw)                                      # (Cin, HW)
    gb = jnp.concatenate([gamma.reshape(c, 1), beta.reshape(c, 1)],
                         axis=1)                                   # (C, 2)

    out2d = pl.pallas_call(
        fused_kernel,
        out_shape=jax.ShapeDtypeStruct((c, hw), jnp.float32),
        grid=(NUM_TILES,),
        in_specs=[
            pl.BlockSpec((c, hw), lambda j: (0, 0)),               # a (resident)
            pl.BlockSpec((c, hw), lambda j: (0, 0)),               # b (resident)
            pl.BlockSpec((1, TILE_COUT, c), lambda j: (j, 0, 0)),  # bf16 weight tile
            pl.BlockSpec((TILE_COUT, 2), lambda j: (j, 0)),        # packed gamma/beta
        ],
        out_specs=pl.BlockSpec((TILE_COUT, hw), lambda j: (j, 0)),
        compiler_params=pltpu.CompilerParams(
            dimension_semantics=("parallel",)),
    )(a2d, b2d, w_tiles, gb)

    # (Cout, HW) -> NCHW, contiguous reshape for N == 1.
    return out2d.reshape(n, c, h, w)


def reference_forward(x203, x217, conv_weight, gamma, beta):
    """Pure-JAX f32 reference of the module's forward pass."""
    y = jnp.maximum(x203 + x217, 0.0)
    w2d = conv_weight[:, :, 0, 0]                                  # (Cout, Cin)
    z = jnp.einsum("oc,nchw->nohw", w2d, y,
                   precision=jax.lax.Precision.HIGHEST)
    mean = jnp.mean(z, axis=(0, 2, 3), keepdims=True)
    var = jnp.mean((z - mean) ** 2, axis=(0, 2, 3), keepdims=True)
    zn = (z - mean) * jax.lax.rsqrt(var + EPS)
    return zn * gamma.reshape(1, -1, 1, 1) + beta.reshape(1, -1, 1, 1)


# TODO(synk): BatchNorm2d training-mode running_mean/running_var buffer
# updates are a side effect not materialized here (the module only returns
# x221); expose mean / (unbiased) var as extra kernel outputs if needed.


if __name__ == "__main__":
    key = jax.random.PRNGKey(0)
    k1, k2, k3 = jax.random.split(key, 3)

    x203 = jax.random.normal(k1, (N, C, H, W), dtype=jnp.float32)
    x217 = jax.random.normal(k2, (N, C, H, W), dtype=jnp.float32)

    # Deterministic parameter init (shapes from the module's __init__):
    #   Conv2d(784, 784, 1, bias=False) -> weight (784, 784, 1, 1)
    #   BatchNorm2d(784, affine=True)   -> gamma=1, beta=0
    conv_weight = (jax.random.normal(k3, (C, C, 1, 1), dtype=jnp.float32)
                   * (1.0 / jnp.sqrt(jnp.float32(C))))
    gamma = jnp.ones((C,), dtype=jnp.float32)
    beta = jnp.zeros((C,), dtype=jnp.float32)

    # One-time weight prep (bf16 + tile layout), outside the hot forward path.
    w_tiles = jax.block_until_ready(prepare_conv_weight(conv_weight))

    out = jax.jit(fused_forward)(x203, x217, w_tiles, gamma, beta)
    out = jax.block_until_ready(out)
    assert out.shape == (N, C, H, W), out.shape

    ref = reference_forward(x203, x217, conv_weight, gamma, beta)
    max_err = float(jnp.max(jnp.abs(out - ref)))
    assert max_err < 5e-2, f"max abs error {max_err}"

    print("KERNEL_OK")
</pallas_src>

<mosaic_0001>
module attributes {stable_mosaic.version = 11 : i64} {
  func.func @fused_kernel(%arg0: i32, %arg1: memref<784x49xf32, #tpu.memory_space<vmem>>, %arg2: memref<784x49xf32, #tpu.memory_space<vmem>>, %arg3: memref<1x392x784xbf16, #tpu.memory_space<vmem>>, %arg4: memref<392x2xf32, #tpu.memory_space<vmem>>, %arg5: memref<392x49xf32, #tpu.memory_space<vmem>>) attributes {dimension_semantics = [#tpu.dimension_semantics<parallel>], iteration_bounds = array<i64: 2>, scalar_prefetch = 0 : i64, scratch_operands = 0 : i64, tpu.core_type = #tpu.core_type<tc>, window_params = [{pipeline_mode = #tpu.pipeline_mode<synchronous>, transform_indices = @transform_0, window_bounds = array<i64: 784, 49>}, {pipeline_mode = #tpu.pipeline_mode<synchronous>, transform_indices = @transform_1, window_bounds = array<i64: 784, 49>}, {transform_indices = @transform_2, window_bounds = array<i64: 1, 392, 784>}, {transform_indices = @transform_3, window_bounds = array<i64: 392, 2>}, {transform_indices = @transform_4, window_bounds = array<i64: 392, 49>}]} {
    %c0 = arith.constant 0 : index
    %c0_0 = arith.constant 0 : index
    %0 = vector.load %arg1[%c0, %c0_0] : memref<784x49xf32, #tpu.memory_space<vmem>>, vector<784x49xf32>
    %c0_1 = arith.constant 0 : index
    %c0_2 = arith.constant 0 : index
    %1 = vector.load %arg2[%c0_1, %c0_2] : memref<784x49xf32, #tpu.memory_space<vmem>>, vector<784x49xf32>
    %2 = arith.addf %0, %1 : vector<784x49xf32>
    %cst = arith.constant 0.000000e+00 : f32
    %3 = vector.broadcast %cst : f32 to vector<784x49xf32>
    %4 = arith.maximumf %2, %3 : vector<784x49xf32>
    %5 = arith.truncf %4 : vector<784x49xf32> to vector<784x49xbf16>
    %c0_3 = arith.constant 0 : index
    %c0_4 = arith.constant 0 : index
    %c0_5 = arith.constant 0 : index
    %6 = vector.load %arg3[%c0_3, %c0_4, %c0_5] : memref<1x392x784xbf16, #tpu.memory_space<vmem>>, vector<1x392x784xbf16>
    %7 = vector.shape_cast %6 : vector<1x392x784xbf16> to vector<392x784xbf16>
    %cst_6 = arith.constant dense<0.000000e+00> : vector<392x49xf32>
    %8 = tpu.matmul %7, %5, %cst_6 {dimension_numbers = #tpu.dot_dimension_numbers<[1], [0], [0], [1], [0, 0, 1, 1], [], []>} : vector<392x784xbf16>, vector<784x49xbf16>, vector<392x49xf32> -> vector<392x49xf32>
    %cst_7 = arith.constant dense<0.000000e+00> : vector<392xf32>
    %9 = vector.multi_reduction <add>, %8, %cst_7 [1] : vector<392x49xf32> to vector<392xf32>
    %10 = vector.shape_cast %9 : vector<392xf32> to vector<392x1xf32>
    %cst_8 = arith.constant 0.0204081628 : f32
    %11 = vector.broadcast %cst_8 : f32 to vector<392x1xf32>
    %12 = arith.mulf %10, %11 : vector<392x1xf32>
    %13 = vector.broadcast %12 : vector<392x1xf32> to vector<392x49xf32>
    %14 = arith.subf %8, %13 : vector<392x49xf32>
    %15 = arith.mulf %14, %14 : vector<392x49xf32>
    %cst_9 = arith.constant dense<0.000000e+00> : vector<392xf32>
    %16 = vector.multi_reduction <add>, %15, %cst_9 [1] : vector<392x49xf32> to vector<392xf32>
    %17 = vector.shape_cast %16 : vector<392xf32> to vector<392x1xf32>
    %cst_10 = arith.constant 0.0204081628 : f32
    %18 = vector.broadcast %cst_10 : f32 to vector<392x1xf32>
    %19 = arith.mulf %17, %18 : vector<392x1xf32>
    %c0_11 = arith.constant 0 : index
    %c0_12 = arith.constant 0 : index
    %20 = vector.load %arg4[%c0_11, %c0_12] : memref<392x2xf32, #tpu.memory_space<vmem>>, vector<392x1xf32>
    %c0_13 = arith.constant 0 : index
    %c1 = arith.constant 1 : index
    %21 = vector.load %arg4[%c0_13, %c1] : memref<392x2xf32, #tpu.memory_space<vmem>>, vector<392x1xf32>
    %cst_14 = arith.constant 9.99999974E-6 : f32
    %22 = vector.broadcast %cst_14 : f32 to vector<392x1xf32>
    %23 = arith.addf %19, %22 : vector<392x1xf32>
    %24 = math.rsqrt %23 : vector<392x1xf32>
    %25 = arith.mulf %24, %20 : vector<392x1xf32>
    %26 = vector.broadcast %25 : vector<392x1xf32> to vector<392x49xf32>
    %27 = arith.mulf %14, %26 : vector<392x49xf32>
    %28 = vector.broadcast %21 : vector<392x1xf32> to vector<392x49xf32>
    %29 = arith.addf %27, %28 : vector<392x49xf32>
    %c0_15 = arith.constant 0 : index
    %c0_16 = arith.constant 0 : index
    %30 = vector.load %arg5[%c0_15, %c0_16] : memref<392x49xf32, #tpu.memory_space<vmem>>, vector<392x49xf32>
    tpu.vector_store %arg5[%c0_15, %c0_16], %29 {strides = array<i32>} : memref<392x49xf32, #tpu.memory_space<vmem>>, vector<392x49xf32>,
    return
  }
  func.func @transform_0(%arg0: i32) -> (i32, i32) {
    %c0_i32 = arith.constant 0 : i32
    %c0_i32_0 = arith.constant 0 : i32
    %c0_i32_1 = arith.constant 0 : i32
    return %c0_i32, %c0_i32_0 : i32, i32
  }
  func.func @transform_1(%arg0: i32) -> (i32, i32) {
    %c0_i32 = arith.constant 0 : i32
    %c0_i32_0 = arith.constant 0 : i32
    %c0_i32_1 = arith.constant 0 : i32
    return %c0_i32, %c0_i32_0 : i32, i32
  }
  func.func @transform_2(%arg0: i32) -> (i32, i32, i32) {
    %c0_i32 = arith.constant 0 : i32
    %c0_i32_0 = arith.constant 0 : i32
    %c0_i32_1 = arith.constant 0 : i32
    return %arg0, %c0_i32, %c0_i32_0 : i32, i32, i32
  }
  func.func @transform_3(%arg0: i32) -> (i32, i32) {
    %c0_i32 = arith.constant 0 : i32
    %c0_i32_0 = arith.constant 0 : i32
    return %arg0, %c0_i32 : i32, i32
  }
  func.func @transform_4(%arg0: i32) -> (i32, i32) {
    %c0_i32 = arith.constant 0 : i32
    %c0_i32_0 = arith.constant 0 : i32
    return %arg0, %c0_i32 : i32, i32
  }
}

</mosaic_0001>

<bundles_post_ra>
// kernel: fused_forward.1
= control target key start
LH: loop header
LB: loop body
LE: loop exit
PB: predicated region body
PF: predicated region fallthrough
CT: control target
= control target key end

     0   :  { %s5154_s15 = smov 0   ;;  %s7039_s0 = inlined_call_operand.vmem [shape: f32[784,49], index: 0, kind: input, shape index: {}]   ;;  %s7040_s1 = inlined_call_operand.vmem [shape: f32[784,49], index: 1, kind: input, shape index: {}]   ;;  %s7041_s2 = inlined_call_operand.vmem [shape: bf16[2,392,784], index: 2, kind: input, shape index: {}]   ;;  %s7042_s3 = inlined_call_operand.vmem [shape: f32[784,2], index: 3, kind: input, shape index: {}]   ;;  %s7043_s4 = inlined_call_operand.vmem [shape: f32[784,49], index: 4, kind: output, shape index: {}]  }
   0x1 LB: > { %s5160_s16 = sadd.s32 4294967295, %s5123_s15   ;;  %p4123_p0 = scmp.ge.s32.totalorder %s5123_s15, 1  ;;  %s5123_s15 = sphi %s5154_s15, %s14_s15  }
   0x2   : > { %p173_p1 = scmp.lt.s32.totalorder %s5123_s15, 3 }
   0x4   : > { %p174_p2 = pnand %p4123_p0, %p173_p1 }
   0x6   : > { %177 = sbr.rel (%p174_p2) target bundleno = 1338 (0x53a), region = 36 }
   0xd   : > { %v222_v0 = vld [vmem:[%s7039_s0] sm:$0xff]  ;;  %v223_v1 = vld [vmem:[%s7039_s0 + $0x8] sm:$0xff]  ;;  %v5125_v3 = vmov 0   ;;  %v224_v11 = vld [vmem:[%s7039_s0 + $0x10] sm:$0xff]  ;;  %p204_p3 = scmp.lt.s32.totalorder %s5160_s16, 1  ;;  %vm5128_vm0 = vmmov 0  }
   0xe   : > { %v320_v2 = vld [vmem:[%s7040_s1] sm:$0xff]  ;;  %1799 = vmatprep.subr.bf16.mxu1 %v5125_v3  ;;  %2263 = vmatprep.subr.bf16.mxu0 %v5125_v3  ;;  %v321_v4 = vld [vmem:[%s7040_s1 + $0x8] sm:$0xff]  ;;  %v225_v15 = vld [vmem:[%s7039_s0 + $0x18] sm:$0xff]  ;;  %vm1723_vm1 = vcmask 130048   ;;  %vm2727_vm2 = vcmask 400384  }
   0xf   : > { %v418_v5 = vadd.f32 %v320_v2, %v222_v0  ;;  %v286_v6 = vld [vmem:[%s7039_s0 + $0x200] sm:$0xff]  ;;  %v287_v7 = vld [vmem:[%s7039_s0 + $0x208] sm:$0xff]  ;;  %v419_v8 = vadd.f32 %v321_v4, %v223_v1  ;;  %v322_v16 = vld [vmem:[%s7040_s1 + $0x10] sm:$0xff]  ;;  %s5422_s7 = scalar_select %p204_p3, %s5160_s16, 1 }
  0x10   : > { %v384_v9 = vld [vmem:[%s7040_s1 + $0x200] sm:$0xff]  ;;  %v385_v10 = vld [vmem:[%s7040_s1 + $0x208] sm:$0xff]  ;;  %v323_v17 = vld [vmem:[%s7040_s1 + $0x18] sm:$0xff]  ;;  %v420_v19 = vadd.f32 %v322_v16, %v224_v11 }
  0x11   : > { %v516_v12 = vmax.f32 %v418_v5, 0.0  ;;  %v482_v13 = vadd.f32 %v384_v9, %v286_v6  ;;  %v483_v14 = vadd.f32 %v385_v10, %v287_v7  ;;  %v517_v18 = vmax.f32 %v419_v8, 0.0  ;;  %v288_v21 = vld [vmem:[%s7039_s0 + $0x210] sm:$0xff]  ;;  %v289_v22 = vld [vmem:[%s7039_s0 + $0x218] sm:$0xff]  ;;  %v226_v28 = vld [vmem:[%s7039_s0 + $0x20] sm:$0xff]  ;;  %s4706_s11 = smul.u32 1372, %s5422_s7 }
  0x12   : > { %v421_v20 = vadd.f32 %v323_v17, %v225_v15  ;;  %v386_v23 = vld [vmem:[%s7040_s1 + $0x210] sm:$0xff]  ;;  %v387_v26 = vld [vmem:[%s7040_s1 + $0x218] sm:$0xff]  ;;  %v227_v29 = vld [vmem:[%s7039_s0 + $0x28] sm:$0xff]  ;;  %v518_v31 = vmax.f32 %v420_v19, 0.0 }
  0x13   : > { %v580_v24 = vmax.f32 %v482_v13, 0.0  ;;  %v581_v25 = vmax.f32 %v483_v14, 0.0  ;;  %v484_v27 = vadd.f32 %v386_v23, %v288_v21  ;;  %v614_v30 = vpack.c.bf16 %v517_v18, %v516_v12  ;;  %v324_v34 = vld [vmem:[%s7040_s1 + $0x20] sm:$0xff]  ;;  %v325_v35 = vld [vmem:[%s7040_s1 + $0x28] sm:$0xff]  ;;  %v228_v48 = vld [vmem:[%s7039_s0 + $0x30] sm:$0xff]  ;;  %s5495_s5 = scalar_lea.vmem %s7041_s2, %s4706_s11  ;;  %s209_s11 = smul.u32 49, %s5160_s16 }
  0x14   : > { %v519_v32 = vmax.f32 %v421_v20, 0.0  ;;  %v485_v33 = vadd.f32 %v387_v26, %v289_v22  ;;  %v290_v36 = vld [vmem:[%s7039_s0 + $0x220] sm:$0xff]  ;;  %v422_v39 = vadd.f32 %v324_v34, %v226_v28  ;;  %v423_v40 = vadd.f32 %v325_v35, %v227_v29  ;;  %v291_v41 = vld [vmem:[%s7039_s0 + $0x228] sm:$0xff]  ;;  %v229_v49 = vld [vmem:[%s7039_s0 + $0x38] sm:$0xff] }
  0x15   : > { %v646_v37 = vpack.c.bf16 %v581_v25, %v580_v24  ;;  %v582_v38 = vmax.f32 %v484_v27, 0.0  ;;  %v388_v42 = vld [vmem:[%s7040_s1 + $0x220] sm:$0xff]  ;;  %v389_v43 = vld [vmem:[%s7040_s1 + $0x228] sm:$0xff]  ;;  %1800 = vmatpush1.bf16.msra.mxu1 %v614_v30  ;;  %v326_v50 = vld [vmem:[%s7040_s1 + $0x30] sm:$0xff]  ;;  %p210_p4 = scmp.lt.s32.totalorder %s209_s11, 97 }
  0x16   : > { %v615_v44 = vpack.c.bf16 %v519_v32, %v518_v31  ;;  %v583_v45 = vmax.f32 %v485_v33, 0.0  ;;  %v486_v46 = vadd.f32 %v388_v42, %v290_v36  ;;  %v487_v47 = vadd.f32 %v389_v43, %v291_v41  ;;  %1801 = vmatprep.subr.bf16.mxu1 %v5125_v3  ;;  %v327_v53 = vld [vmem:[%s7040_s1 + $0x38] sm:$0xff]  ;;  %v292_v55 = vld [vmem:[%s7039_s0 + $0x230] sm:$0xff]  ;;  %v230_v63 = vld [vmem:[%s7039_s0 + $0x40] sm:$0xff] }
  0x17   : > { %2264 = vmatpush1.bf16.msra.mxu0 %v646_v37  ;;  %v520_v51 = vmax.f32 %v422_v39, 0.0  ;;  %v521_v52 = vmax.f32 %v423_v40, 0.0  ;;  %v424_v54 = vadd.f32 %v326_v50, %v228_v48  ;;  %v293_v56 = vld [vmem:[%s7039_s0 + $0x238] sm:$0xff]  ;;  %v425_v60 = vadd.f32 %v327_v53, %v229_v49  ;;  %v390_v61 = vld [vmem:[%s7040_s1 + $0x230] sm:$0xff]  ;;  %v231_v4 = vld [vmem:[%s7039_s0 + $0x48] sm:$0xff]  ;;  %s7201_s11 = smov (!%p210_p4, %s209_s11), 97 }
  0x18   : > { %2265 = vmatprep.subr.bf16.mxu0 %v5125_v3  ;;  %v647_v57 = vpack.c.bf16 %v583_v45, %v582_v38  ;;  %v584_v58 = vmax.f32 %v486_v46, 0.0  ;;  %v585_v59 = vmax.f32 %v487_v47, 0.0  ;;  %v391_v62 = vld [vmem:[%s7040_s1 + $0x238] sm:$0xff]  ;;  %v488_v1 = vadd.f32 %v390_v61, %v292_v55  ;;  %v328_v5 = vld [vmem:[%s7040_s1 + $0x40] sm:$0xff]  ;;  %v329_v6 = vld [vmem:[%s7040_s1 + $0x48] sm:$0xff]  ;;  %s4125_s14 = sshll.u32 %s7201_s11, 3 }
  0x19   : > { %v522_v0 = vmax.f32 %v424_v54, 0.0  ;;  %v489_v2 = vadd.f32 %v391_v62, %v293_v56  ;;  %1802 = vmatpush1.bf16.msra.mxu1 %v615_v44  ;;  %v616_v7 = vpack.c.bf16 %v521_v52, %v520_v51  ;;  %v523_v8 = vmax.f32 %v425_v60, 0.0  ;;  %v294_v11 = vld [vmem:[%s7039_s0 + $0x240] sm:$0xff]  ;;  %v295_v12 = vld [vmem:[%s7039_s0 + $0x248] sm:$0xff]  ;;  %v232_v19 = vld [vmem:[%s7039_s0 + $0x50] sm:$0xff]  ;;  %s5866_s18 = scalar_lea.vmem %s7042_s3, %s4125_s14  ;;  %s6772_s7 = scalar_lea.vmem %s7043_s4, %s4125_s14 }
  0x1a   : > { %v426_v9 = vadd.f32 %v328_v5, %v230_v63  ;;  %v427_v10 = vadd.f32 %v329_v6, %v231_v4  ;;  %v392_v13 = vld [vmem:[%s7040_s1 + $0x240] sm:$0xff]  ;;  %1803 = vmatprep.subr.bf16.mxu1 %v5125_v3  ;;  %v648_v14 = vpack.c.bf16 %v585_v59, %v584_v58  ;;  %v586_v15 = vmax.f32 %v488_v1, 0.0  ;;  %v393_v17 = vld [vmem:[%s7040_s1 + $0x248] sm:$0xff]  ;;  %v233_v20 = vld [vmem:[%s7039_s0 + $0x58] sm:$0xff] }
  0x1b   : > { %2266 = vmatpush1.bf16.msra.mxu0 %v647_v57  ;;  %v587_v16 = vmax.f32 %v489_v2, 0.0  ;;  %v490_v18 = vadd.f32 %v392_v13, %v294_v11  ;;  %v491_v21 = vadd.f32 %v393_v17, %v295_v12  ;;  %v330_v22 = vld [vmem:[%s7040_s1 + $0x50] sm:$0xff]  ;;  %v331_v23 = vld [vmem:[%s7040_s1 + $0x58] sm:$0xff]  ;;  %v617_v25 = vpack.c.bf16 %v523_v8, %v522_v0  ;;  %v234_v35 = vld [vmem:[%s7039_s0 + $0x60] sm:$0xff] }
  0x1c   : > { %2267 = vmatprep.subr.bf16.mxu0 %v5125_v3  ;;  %v296_v24 = vld [vmem:[%s7039_s0 + $0x250] sm:$0xff]  ;;  %v524_v26 = vmax.f32 %v426_v9, 0.0  ;;  %v428_v27 = vadd.f32 %v330_v22, %v232_v19  ;;  %v297_v28 = vld [vmem:[%s7039_s0 + $0x258] sm:$0xff]  ;;  %v525_v31 = vmax.f32 %v427_v10, 0.0  ;;  %v429_v32 = vadd.f32 %v331_v23, %v233_v20  ;;  %v235_v36 = vld [vmem:[%s7039_s0 + $0x68] sm:$0xff] }
  0x1d   : > { %v394_v29 = vld [vmem:[%s7040_s1 + $0x250] sm:$0xff]  ;;  %v395_v30 = vld [vmem:[%s7040_s1 + $0x258] sm:$0xff]  ;;  %1804 = vmatpush1.bf16.msra.mxu1 %v616_v7  ;;  %v332_v37 = vld [vmem:[%s7040_s1 + $0x60] sm:$0xff]  ;;  %v649_v38 = vpack.c.bf16 %v587_v16, %v586_v15  ;;  %v588_v39 = vmax.f32 %v490_v18, 0.0  ;;  %v589_v40 = vmax.f32 %v491_v21, 0.0 }
  0x1e   : > { %v492_v33 = vadd.f32 %v394_v29, %v296_v24  ;;  %v493_v34 = vadd.f32 %v395_v30, %v297_v28  ;;  %1805 = vmatprep.subr.bf16.mxu1 %v5125_v3  ;;  %v333_v41 = vld [vmem:[%s7040_s1 + $0x68] sm:$0xff]  ;;  %v298_v42 = vld [vmem:[%s7039_s0 + $0x260] sm:$0xff]  ;;  %v526_v46 = vmax.f32 %v428_v27, 0.0  ;;  %v430_v47 = vadd.f32 %v332_v37, %v234_v35  ;;  %v236_v49 = vld [vmem:[%s7039_s0 + $0x70] sm:$0xff] }
  0x1f   : > { %2268 = vmatpush1.bf16.msra.mxu0 %v648_v14  ;;  %v299_v43 = vld [vmem:[%s7039_s0 + $0x268] sm:$0xff]  ;;  %v396_v44 = vld [vmem:[%s7040_s1 + $0x260] sm:$0xff]  ;;  %v431_v48 = vadd.f32 %v333_v41, %v235_v36  ;;  %v618_v50 = vpack.c.bf16 %v525_v31, %v524_v26  ;;  %v527_v51 = vmax.f32 %v429_v32, 0.0  ;;  %v237_v54 = vld [vmem:[%s7039_s0 + $0x78] sm:$0xff]  ;;  %v650_v57 = vpack.c.bf16 %v589_v40, %v588_v39 }
  0x20   : > { %2269 = vmatprep.subr.bf16.mxu0 %v5125_v3  ;;  %v397_v45 = vld [vmem:[%s7040_s1 + $0x268] sm:$0xff]  ;;  %v590_v52 = vmax.f32 %v492_v33, 0.0  ;;  %v591_v53 = vmax.f32 %v493_v34, 0.0  ;;  %v334_v55 = vld [vmem:[%s7040_s1 + $0x70] sm:$0xff]  ;;  %v335_v56 = vld [vmem:[%s7040_s1 + $0x78] sm:$0xff]  ;;  %v494_v58 = vadd.f32 %v396_v44, %v298_v42  ;;  %v528_v0 = vmax.f32 %v430_v47, 0.0 }
  0x21   : > { %1806 = vmatpush1.bf16.msra.mxu1 %v617_v25  ;;  %v495_v59 = vadd.f32 %v397_v45, %v299_v43  ;;  %v300_v60 = vld [vmem:[%s7039_s0 + $0x270] sm:$0xff]  ;;  %v301_v61 = vld [vmem:[%s7039_s0 + $0x278] sm:$0xff]  ;;  %v529_v1 = vmax.f32 %v431_v48, 0.0  ;;  %v432_v2 = vadd.f32 %v334_v55, %v236_v49  ;;  %v433_v4 = vadd.f32 %v335_v56, %v237_v54  ;;  %v238_v5 = vld [vmem:[%s7039_s0 + $0x80] sm:$0xff] }
  0x22   : > { %1807 = vmatprep.subr.bf16.mxu1 %v5125_v3  ;;  %v398_v62 = vld [vmem:[%s7040_s1 + $0x270] sm:$0xff]  ;;  %v399_v63 = vld [vmem:[%s7040_s1 + $0x278] sm:$0xff]  ;;  %v239_v6 = vld [vmem:[%s7039_s0 + $0x88] sm:$0xff]  ;;  %v619_v7 = vpack.c.bf16 %v527_v51, %v526_v46  ;;  %v651_v8 = vpack.c.bf16 %v591_v53, %v590_v52  ;;  %v592_v12 = vmax.f32 %v494_v58, 0.0 }
  0x23   : > { %2270 = vmatpush1.bf16.msra.mxu0 %v649_v38  ;;  %v336_v9 = vld [vmem:[%s7040_s1 + $0x80] sm:$0xff]  ;;  %v337_v10 = vld [vmem:[%s7040_s1 + $0x88] sm:$0xff]  ;;  %v593_v13 = vmax.f32 %v495_v59, 0.0  ;;  %v496_v14 = vadd.f32 %v398_v62, %v300_v60  ;;  %v497_v15 = vadd.f32 %v399_v63, %v301_v61  ;;  %v620_v19 = vpack.c.bf16 %v529_v1, %v528_v0  ;;  %v240_v22 = vld [vmem:[%s7039_s0 + $0x90] sm:$0xff] }
  0x24   : > { %2271 = vmatprep.subr.bf16.mxu0 %v5125_v3  ;;  %v302_v11 = vld [vmem:[%s7039_s0 + $0x280] sm:$0xff]  ;;  %v303_v16 = vld [vmem:[%s7039_s0 + $0x288] sm:$0xff]  ;;  %v530_v20 = vmax.f32 %v432_v2, 0.0  ;;  %v531_v21 = vmax.f32 %v433_v4, 0.0  ;;  %v434_v23 = vadd.f32 %v336_v9, %v238_v5  ;;  %v435_v24 = vadd.f32 %v337_v10, %v239_v6  ;;  %v241_v27 = vld [vmem:[%s7039_s0 + $0x98] sm:$0xff] }
  0x25   : > { %1808 = vmatpush1.bf16.msra.mxu1 %v618_v50  ;;  %v400_v17 = vld [vmem:[%s7040_s1 + $0x280] sm:$0xff]  ;;  %v401_v18 = vld [vmem:[%s7040_s1 + $0x288] sm:$0xff]  ;;  %v338_v28 = vld [vmem:[%s7040_s1 + $0x90] sm:$0xff]  ;;  %v652_v30 = vpack.c.bf16 %v593_v13, %v592_v12  ;;  %v594_v31 = vmax.f32 %v496_v14, 0.0  ;;  %v595_v32 = vmax.f32 %v497_v15, 0.0 }
  0x26   : > { %1809 = vmatprep.subr.bf16.mxu1 %v5125_v3  ;;  %v498_v25 = vadd.f32 %v400_v17, %v302_v11  ;;  %v499_v26 = vadd.f32 %v401_v18, %v303_v16  ;;  %v339_v29 = vld [vmem:[%s7040_s1 + $0x98] sm:$0xff]  ;;  %v304_v33 = vld [vmem:[%s7039_s0 + $0x290] sm:$0xff]  ;;  %v621_v37 = vpack.c.bf16 %v531_v21, %v530_v20  ;;  %v436_v38 = vadd.f32 %v338_v28, %v240_v22  ;;  %v242_v44 = vld [vmem:[%s7039_s0 + $0xa0] sm:$0xff] }
  0x27   : > { %2272 = vmatpush1.bf16.msra.mxu0 %v650_v57  ;;  %v305_v34 = vld [vmem:[%s7039_s0 + $0x298] sm:$0xff]  ;;  %v402_v35 = vld [vmem:[%s7040_s1 + $0x290] sm:$0xff]  ;;  %v437_v39 = vadd.f32 %v339_v29, %v241_v27  ;;  %v532_v40 = vmax.f32 %v434_v23, 0.0  ;;  %v533_v41 = vmax.f32 %v435_v24, 0.0  ;;  %v340_v45 = vld [vmem:[%s7040_s1 + $0xa0] sm:$0xff]  ;;  %v653_v46 = vpack.c.bf16 %v595_v32, %v594_v31 }
  0x28   : > { %2273 = vmatprep.subr.bf16.mxu0 %v5125_v3  ;;  %v403_v36 = vld [vmem:[%s7040_s1 + $0x298] sm:$0xff]  ;;  %v596_v42 = vmax.f32 %v498_v25, 0.0  ;;  %v597_v43 = vmax.f32 %v499_v26, 0.0  ;;  %v500_v47 = vadd.f32 %v402_v35, %v304_v33  ;;  %v243_v49 = vld [vmem:[%s7039_s0 + $0xa8] sm:$0xff]  ;;  %v306_v51 = vld [vmem:[%s7039_s0 + $0x2a0] sm:$0xff]  ;;  %v534_v55 = vmax.f32 %v436_v38, 0.0 }
  0x29   : > { %1810 = vmatpush1.bf16.msra.mxu1 %v619_v7  ;;  %v501_v48 = vadd.f32 %v403_v36, %v305_v34  ;;  %v341_v50 = vld [vmem:[%s7040_s1 + $0xa8] sm:$0xff]  ;;  %v404_v53 = vld [vmem:[%s7040_s1 + $0x2a0] sm:$0xff]  ;;  %v535_v56 = vmax.f32 %v437_v39, 0.0  ;;  %v438_v57 = vadd.f32 %v340_v45, %v242_v44  ;;  %v244_v58 = vld [vmem:[%s7039_s0 + $0xb0] sm:$0xff]  ;;  %v622_v60 = vpack.c.bf16 %v533_v41, %v532_v40 }
  0x2a   : > { %1811 = vmatprep.subr.bf16.mxu1 %v5125_v3  ;;  %v307_v52 = vld [vmem:[%s7039_s0 + $0x2a8] sm:$0xff]  ;;  %v245_v59 = vld [vmem:[%s7039_s0 + $0xb8] sm:$0xff]  ;;  %v654_v61 = vpack.c.bf16 %v597_v43, %v596_v42  ;;  %v439_v62 = vadd.f32 %v341_v50, %v243_v49  ;;  %v342_v63 = vld [vmem:[%s7040_s1 + $0xb0] sm:$0xff]  ;;  %v598_v2 = vmax.f32 %v500_v47, 0.0  ;;  %v502_v5 = vadd.f32 %v404_v53, %v306_v51 }
  0x2b   : > { %2274 = vmatpush1.bf16.msra.mxu0 %v651_v8  ;;  %v405_v54 = vld [vmem:[%s7040_s1 + $0x2a8] sm:$0xff]  ;;  %v343_v0 = vld [vmem:[%s7040_s1 + $0xb8] sm:$0xff]  ;;  %v308_v1 = vld [vmem:[%s7039_s0 + $0x2b0] sm:$0xff]  ;;  %v599_v4 = vmax.f32 %v501_v48, 0.0  ;;  %v623_v10 = vpack.c.bf16 %v535_v56, %v534_v55  ;;  %v536_v11 = vmax.f32 %v438_v57, 0.0  ;;  %v440_v12 = vadd.f32 %v342_v63, %v244_v58 }
  0x2c   : > { %2275 = vmatprep.subr.bf16.mxu0 %v5125_v3  ;;  %v503_v6 = vadd.f32 %v405_v54, %v307_v52  ;;  %v309_v7 = vld [vmem:[%s7039_s0 + $0x2b8] sm:$0xff]  ;;  %v406_v8 = vld [vmem:[%s7040_s1 + $0x2b0] sm:$0xff]  ;;  %v246_v13 = vld [vmem:[%s7039_s0 + $0xc0] sm:$0xff]  ;;  %v537_v15 = vmax.f32 %v439_v62, 0.0  ;;  %v441_v16 = vadd.f32 %v343_v0, %v245_v59  ;;  %v600_v23 = vmax.f32 %v502_v5, 0.0 }
  0x2d   : > { %1812 = vmatpush1.bf16.msra.mxu1 %v620_v19  ;;  %v407_v9 = vld [vmem:[%s7040_s1 + $0x2b8] sm:$0xff]  ;;  %v247_v14 = vld [vmem:[%s7039_s0 + $0xc8] sm:$0xff]  ;;  %v504_v17 = vadd.f32 %v406_v8, %v308_v1  ;;  %v344_v19 = vld [vmem:[%s7040_s1 + $0xc0] sm:$0xff]  ;;  %v655_v22 = vpack.c.bf16 %v599_v4, %v598_v2 }
  0x2e   : > { %1813 = vmatprep.subr.bf16.mxu1 %v5125_v3  ;;  %v505_v18 = vadd.f32 %v407_v9, %v309_v7  ;;  %v345_v20 = vld [vmem:[%s7040_s1 + $0xc8] sm:$0xff]  ;;  %v310_v21 = vld [vmem:[%s7039_s0 + $0x2c0] sm:$0xff]  ;;  %v601_v24 = vmax.f32 %v503_v6, 0.0  ;;  %v248_v28 = vld [vmem:[%s7039_s0 + $0xd0] sm:$0xff]  ;;  %v442_v31 = vadd.f32 %v344_v19, %v246_v13  ;;  %v624_v36 = vpack.c.bf16 %v537_v15, %v536_v11 }
  0x2f   : > { %2276 = vmatpush1.bf16.msra.mxu0 %v652_v30  ;;  %v311_v25 = vld [vmem:[%s7039_s0 + $0x2c8] sm:$0xff]  ;;  %v408_v26 = vld [vmem:[%s7040_s1 + $0x2c0] sm:$0xff]  ;;  %v346_v29 = vld [vmem:[%s7040_s1 + $0xd0] sm:$0xff]  ;;  %v538_v30 = vmax.f32 %v440_v12, 0.0  ;;  %v443_v32 = vadd.f32 %v345_v20, %v247_v14  ;;  %v602_v38 = vmax.f32 %v504_v17, 0.0 }
  0x30   : > { %2277 = vmatprep.subr.bf16.mxu0 %v5125_v3  ;;  %v409_v27 = vld [vmem:[%s7040_s1 + $0x2c8] sm:$0xff]  ;;  %v249_v33 = vld [vmem:[%s7039_s0 + $0xd8] sm:$0xff]  ;;  %v4727_v35 = vld [vmem:[%s5495_s5 + $0x4] ss:$28 sps:$4 sm:$0xff]   ;;  %v603_v39 = vmax.f32 %v505_v18, 0.0  ;;  %v656_v41 = vpack.c.bf16 %v601_v24, %v600_v23  ;;  %v506_v42 = vadd.f32 %v408_v26, %v310_v21  ;;  %v540_v50 = vmax.f32 %v442_v31, 0.0 }
  0x31   : > { %1814 = vmatpush1.bf16.msra.mxu1 %v621_v37  ;;  %v347_v34 = vld [vmem:[%s7040_s1 + $0xd8] sm:$0xff]  ;;  %v539_v37 = vmax.f32 %v441_v16, 0.0  ;;  %v312_v40 = vld [vmem:[%s7039_s0 + $0x2d0] sm:$0xff]  ;;  %v507_v43 = vadd.f32 %v409_v27, %v311_v25  ;;  %v250_v48 = vld [vmem:[%s7039_s0 + $0xe0] sm:$0xff]  ;;  %1831 = vmatprep.mubr.bf16.mxu1 %v4727_v35  ;;  %v541_v51 = vmax.f32 %v443_v32, 0.0  ;;  %v444_v52 = vadd.f32 %v346_v29, %v248_v28 }
  0x32   : > { %1815 = vmatprep.subr.bf16.mxu1 %v5125_v3  ;;  %v313_v44 = vld [vmem:[%s7039_s0 + $0x2d8] sm:$0xff]  ;;  %v410_v45 = vld [vmem:[%s7040_s1 + $0x2d0] sm:$0xff]  ;;  %v348_v49 = vld [vmem:[%s7040_s1 + $0xe0] sm:$0xff]  ;;  %v657_v58 = vpack.c.bf16 %v603_v39, %v602_v38  ;;  %v445_v59 = vadd.f32 %v347_v34, %v249_v33 }
  0x33   : > { %2278 = vmatpush1.bf16.msra.mxu0 %v653_v46  ;;  %v4730_v46 = vld [vmem:[%s5495_s5 + $0x14] ss:$28 sps:$4 sm:$0xff]   ;;  %v411_v47 = vld [vmem:[%s7040_s1 + $0x2d8] sm:$0xff]  ;;  %v251_v53 = vld [vmem:[%s7039_s0 + $0xe8] sm:$0xff]  ;;  %v625_v57 = vpack.c.bf16 %v539_v37, %v538_v30  ;;  %v605_v62 = vmax.f32 %v507_v43, 0.0  ;;  %v508_v63 = vadd.f32 %v410_v45, %v312_v40  ;;  %v626_v4 = vpack.c.bf16 %v541_v51, %v540_v50 }
  0x34   : > { %2279 = vmatprep.subr.bf16.mxu0 %v5125_v3  ;;  %v349_v54 = vld [vmem:[%s7040_s1 + $0xe8] sm:$0xff]  ;;  %v314_v55 = vld [vmem:[%s7039_s0 + $0x2e0] sm:$0xff]  ;;  %2295 = vmatprep.mubr.bf16.mxu0 %v4730_v46  ;;  %v509_v0 = vadd.f32 %v411_v47, %v313_v44  ;;  %v252_v2 = vld [vmem:[%s7039_s0 + $0xf0] sm:$0xff]  ;;  %v542_v5 = vmax.f32 %v444_v52, 0.0  ;;  %v446_v6 = vadd.f32 %v348_v49, %v250_v48 }
  0x35   : > { %1816 = vmatpush1.bf16.msra.mxu1 %v622_v60  ;;  %v315_v56 = vld [vmem:[%s7039_s0 + $0x2e8] sm:$0xff]  ;;  %v412_v60 = vld [vmem:[%s7040_s1 + $0x2e0] sm:$0xff]  ;;  %v253_v7 = vld [vmem:[%s7039_s0 + $0xf8] sm:$0xff]  ;;  %v447_v11 = vadd.f32 %v349_v54, %v251_v53  ;;  %v606_v16 = vmax.f32 %v508_v63, 0.0 }
  0x36   : > { %1817 = vmatprep.subr.bf16.mxu1 %v5125_v3  ;;  %v413_v1 = vld [vmem:[%s7040_s1 + $0x2e8] sm:$0xff]  ;;  %v350_v8 = vld [vmem:[%s7040_s1 + $0xf0] sm:$0xff]  ;;  %v351_v9 = vld [vmem:[%s7040_s1 + $0xf8] sm:$0xff]  ;;  %v510_v12 = vadd.f32 %v412_v60, %v314_v55  ;;  %v607_v17 = vmax.f32 %v509_v0, 0.0  ;;  %v544_v21 = vmax.f32 %v446_v6, 0.0 }
  0x37   : > { %2280 = vmatpush1.bf16.msra.mxu0 %v654_v61  ;;  %v604_v61 = vmax.f32 %v506_v42, 0.0  ;;  %v511_v13 = vadd.f32 %v413_v1, %v315_v56  ;;  %v316_v14 = vld [vmem:[%s7039_s0 + $0x2f0] sm:$0xff]  ;;  %v317_v18 = vld [vmem:[%s7039_s0 + $0x2f8] sm:$0xff]  ;;  %v449_v23 = vadd.f32 %v351_v9, %v253_v7  ;;  %v254_v24 = vld [vmem:[%s7039_s0 + $0x100] sm:$0xff]  ;;  %v545_v26 = vmax.f32 %v447_v11, 0.0 }
  0x38   : > { %2281 = vmatprep.subr.bf16.mxu0 %v5125_v3  ;;  %v414_v19 = vld [vmem:[%s7040_s1 + $0x2f0] sm:$0xff]  ;;  %v415_v20 = vld [vmem:[%s7040_s1 + $0x2f8] sm:$0xff]  ;;  %v608_v27 = vmax.f32 %v510_v12, 0.0  ;;  %v255_v29 = vld [vmem:[%s7039_s0 + $0x108] sm:$0xff]  ;;  %v659_v30 = vpack.c.bf16 %v607_v17, %v606_v16 }
  0x39   : > { %1818 = vmatpush1.bf16.msra.mxu1 %v623_v10  ;;  %v543_v10 = vmax.f32 %v445_v59, 0.0  ;;  %v658_v15 = vpack.c.bf16 %v605_v62, %v604_v61  ;;  %v609_v28 = vmax.f32 %v511_v13, 0.0  ;;  %v512_v31 = vadd.f32 %v414_v19, %v316_v14  ;;  %v352_v33 = vld [vmem:[%s7040_s1 + $0x100] sm:$0xff]  ;;  %v353_v34 = vld [vmem:[%s7040_s1 + $0x108] sm:$0xff]  ;;  %v256_v45 = vld [vmem:[%s7039_s0 + $0x110] sm:$0xff] }
  0x3a   : > { %1819 = vmatprep.subr.bf16.mxu1 %v5125_v3  ;;  %v513_v32 = vadd.f32 %v415_v20, %v317_v18  ;;  %v318_v35 = vld [vmem:[%s7039_s0 + $0x300] sm:$0xff]  ;;  %v417_v38 = vld [vmem:[%s7040_s1 + $0x308] sm:$0xff]  ;;  %v547_v40 = vmax.f32 %v449_v23, 0.0  ;;  %v450_v43 = vadd.f32 %v352_v33, %v254_v24  ;;  %v451_v44 = vadd.f32 %v353_v34, %v255_v29  ;;  %v257_v50 = vld [vmem:[%s7039_s0 + $0x118] sm:$0xff] }
  0x3b   : > { %2282 = vmatpush1.bf16.msra.mxu0 %v655_v22  ;;  %v448_v22 = vadd.f32 %v350_v8, %v252_v2  ;;  %v627_v25 = vpack.c.bf16 %v543_v10, %v542_v5  ;;  %v416_v37 = vld [vmem:[%s7040_s1 + $0x300] sm:$0xff]  ;;  %v660_v42 = vpack.c.bf16 %v609_v28, %v608_v27  ;;  %v610_v46 = vmax.f32 %v512_v31, 0.0  ;;  %v354_v51 = vld [vmem:[%s7040_s1 + $0x110] sm:$0xff]  ;;  %v355_v52 = vld [vmem:[%s7040_s1 + $0x118] sm:$0xff] }
  0x3c   : > { %2283 = vmatprep.subr.bf16.mxu0 %v5125_v3  ;;  %v611_v47 = vmax.f32 %v513_v32, 0.0  ;;  %v514_v48 = vadd.f32 %v416_v37, %v318_v35  ;;  %v548_v54 = vmax.f32 %v450_v43, 0.0  ;;  %v549_v55 = vmax.f32 %v451_v44, 0.0  ;;  %v4725_v59 = vld [vmem:[%s5495_s5] ss:$28 sps:$4 sm:$0xff]   ;;  %v259_v63 = vld [vmem:[%s7039_s0 + $0x128] sm:$0xff] }
  0x3d   : > { %1820 = vmatpush1.bf16.msra.mxu1 %v624_v36  ;;  %v319_v36 = vld [vmem:[%s7039_s0 + $0x308] sm:$0xff]  ;;  %v546_v39 = vmax.f32 %v448_v22, 0.0  ;;  %v452_v56 = vadd.f32 %v354_v51, %v256_v45  ;;  %v258_v62 = vld [vmem:[%s7039_s0 + $0x120] sm:$0xff]  ;;  %v4731_v5 = vld [vmem:[%s5495_s5 + $0x3c] ss:$28 sps:$4 sm:$0xff]  }
  0x3e   : > { %1821 = vmatprep.subr.bf16.mxu1 %v5125_v3  ;;  %v515_v49 = vadd.f32 %v417_v38, %v319_v36  ;;  %v612_v60 = vmax.f32 %v514_v48, 0.0  ;;  %v356_v0 = vld [vmem:[%s7040_s1 + $0x120] sm:$0xff]  ;;  %v357_v1 = vld [vmem:[%s7040_s1 + $0x128] sm:$0xff]  ;;  %v260_v8 = vld [vmem:[%s7039_s0 + $0x130] sm:$0xff] }
  0x3f   : > { %2284 = vmatpush1.bf16.msra.mxu0 %v656_v41  ;;  %v628_v41 = vpack.c.bf16 %v545_v26, %v544_v21  ;;  %v629_v53 = vpack.c.bf16 %v547_v40, %v546_v39  ;;  %v4728_v2 = vld [vmem:[%s5495_s5 + $0x10] ss:$28 sps:$4 sm:$0xff]   ;;  %v550_v6 = vmax.f32 %v452_v56, 0.0  ;;  %v454_v10 = vadd.f32 %v356_v0, %v258_v62  ;;  %v261_v12 = vld [vmem:[%s7039_s0 + $0x138] sm:$0xff]  ;;  %v262_v20 = vld [vmem:[%s7039_s0 + $0x140] sm:$0xff] }
  0x40   : > { %2285 = vmatprep.subr.bf16.mxu0 %v5125_v3  ;;  %v613_v61 = vmax.f32 %v515_v49, 0.0  ;;  %v455_v11 = vadd.f32 %v357_v1, %v259_v63  ;;  %v358_v13 = vld [vmem:[%s7040_s1 + $0x130] sm:$0xff]  ;;  %v359_v14 = vld [vmem:[%s7040_s1 + $0x138] sm:$0xff]  ;;  %v4733_v16 = vld [vmem:[%s5495_s5 + $0x4c] ss:$28 sps:$4 sm:$0xff]  }
  0x41   : > { %1822 = vmatpush1.bf16.msra.mxu1 %v625_v57  ;;  %v453_v57 = vadd.f32 %v355_v52, %v257_v50  ;;  %v456_v18 = vadd.f32 %v358_v13, %v260_v8  ;;  %v457_v19 = vadd.f32 %v359_v14, %v261_v12  ;;  %v263_v21 = vld [vmem:[%s7039_s0 + $0x148] sm:$0xff]  ;;  %v552_v22 = vmax.f32 %v454_v10, 0.0  ;;  %v360_v24 = vld [vmem:[%s7040_s1 + $0x140] sm:$0xff]  ;;  %v4735_v26 = vld [vmem:[%s5495_s5 + $0x38] ss:$28 sps:$4 sm:$0xff]  }
  0x42   : > { %1823 = vmatprep.subr.bf16.mxu1 %v5125_v3  ;;  %v662_v9 = vpack.c.bf16 %v613_v61, %v612_v60  ;;  %v553_v23 = vmax.f32 %v455_v11, 0.0  ;;  %v4736_v27 = vld [vmem:[%s5495_s5 + $0x48] ss:$28 sps:$4 sm:$0xff]   ;;  %v4737_v28 = vld [vmem:[%s5495_s5 + $0x74] ss:$28 sps:$4 sm:$0xff]   ;;  %v265_v33 = vld [vmem:[%s7039_s0 + $0x158] sm:$0xff]  ;;  %v458_v35 = vadd.f32 %v360_v24, %v262_v20 }
  0x43   : > { %2286 = vmatpush1.bf16.msra.mxu0 %v657_v58  ;;  %v661_v58 = vpack.c.bf16 %v611_v47, %v610_v46  ;;  %v551_v7 = vmax.f32 %v453_v57, 0.0  ;;  %v4739_v29 = vld [vmem:[%s5495_s5 + $0x84] ss:$28 sps:$4 sm:$0xff]   ;;  %v555_v31 = vmax.f32 %v457_v19, 0.0  ;;  %v264_v32 = vld [vmem:[%s7039_s0 + $0x150] sm:$0xff]  ;;  %v363_v38 = vld [vmem:[%s7040_s1 + $0x158] sm:$0xff] }
  0x44   : > { %2287 = vmatprep.subr.bf16.mxu0 %v5125_v3  ;;  %v632_v34 = vpack.c.bf16 %v553_v23, %v552_v22  ;;  %v362_v37 = vld [vmem:[%s7040_s1 + $0x150] sm:$0xff]  ;;  %v266_v40 = vld [vmem:[%s7039_s0 + $0x160] sm:$0xff]  ;;  %v556_v43 = vmax.f32 %v458_v35, 0.0  ;;  %v461_v46 = vadd.f32 %v363_v38, %v265_v33  ;;  %v365_v47 = vld [vmem:[%s7040_s1 + $0x168] sm:$0xff] }
  0x45   : > { %1824 = vmatpush1.bf16.msra.mxu1 %v626_v4  ;;  %v630_v4 = vpack.c.bf16 %v549_v55, %v548_v54  ;;  %v631_v17 = vpack.c.bf16 %v551_v7, %v550_v6  ;;  %v460_v45 = vadd.f32 %v362_v37, %v264_v32  ;;  %v4741_v48 = vld [vmem:[%s5495_s5 + $0x70] ss:$28 sps:$4 sm:$0xff]   ;;  %v4742_v49 = vld [vmem:[%s5495_s5 + $0x80] ss:$28 sps:$4 sm:$0xff]  }
  0x46   : > { %1825 = vmatprep.subr.bf16.mxu1 %v5125_v3  ;;  %v4743_v50 = vld [vmem:[%s5495_s5 + $0xac] ss:$28 sps:$4 sm:$0xff]   ;;  %v559_v56 = vmax.f32 %v461_v46, 0.0  ;;  %v268_v57 = vld [vmem:[%s7039_s0 + $0x170] sm:$0xff]  ;;  %v367_v60 = vld [vmem:[%s7040_s1 + $0x178] sm:$0xff] }
  0x47   : > { %2288 = vmatpush1.bf16.msra.mxu0 %v658_v15  ;;  %v5126_v15 = vmov 0.0   ;;  %v558_v55 = vmax.f32 %v460_v45, 0.0  ;;  %v270_v6 = vld [vmem:[%s7039_s0 + $0x180] sm:$0xff]  ;;  %v271_v7 = vld [vmem:[%s7039_s0 + $0x188] sm:$0xff]  ;;  %v4751_v11 = vld [vmem:[%s5495_s5 + $0xf4] ss:$28 sps:$4 sm:$0xff]  }
  0x48   : > { %2289 = vmatprep.subr.bf16.mxu0 %v5125_v3  ;;  %v368_v8 = vld [vmem:[%s7040_s1 + $0x180] sm:$0xff]  ;;  %v369_v10 = vld [vmem:[%s7040_s1 + $0x188] sm:$0xff]  ;;  %v273_v22 = vld [vmem:[%s7039_s0 + $0x198] sm:$0xff] }
  0x49   : > { %1826 = vmatpush1.bf16.msra.mxu1 %v627_v25  ;;  %v361_v25 = vld [vmem:[%s7040_s1 + $0x148] sm:$0xff]  ;;  %v635_v63 = vpack.c.bf16 %v559_v56, %v558_v55  ;;  %v466_v14 = vadd.f32 %v368_v8, %v270_v6  ;;  %v370_v23 = vld [vmem:[%s7040_s1 + $0x190] sm:$0xff]  ;;  %v371_v24 = vld [vmem:[%s7040_s1 + $0x198] sm:$0xff] }
  0x4a   : > { %1827 = vmatprep.subr.bf16.mxu1 %v5125_v3  ;;  %v459_v36 = vadd.f32 %v361_v25, %v263_v21  ;;  %v272_v21 = vld [vmem:[%s7039_s0 + $0x190] sm:$0xff]  ;;  %v274_v33 = vld [vmem:[%s7039_s0 + $0x1a0] sm:$0xff] }
  0x4b   : > { %2290 = vmatpush1.bf16.msra.mxu0 %v659_v30  ;;  %v554_v30 = vmax.f32 %v456_v18, 0.0  ;;  %v564_v19 = vmax.f32 %v466_v14, 0.0  ;;  %v4754_v25 = vld [vmem:[%s5495_s5 + $0xf0] ss:$28 sps:$4 sm:$0xff]   ;;  %v372_v35 = vld [vmem:[%s7040_s1 + $0x1a0] sm:$0xff] }
  0x4c   : > { %2291 = vmatprep.subr.bf16.mxu0 %v5125_v3  ;;  %v557_v44 = vmax.f32 %v459_v36, 0.0  ;;  %v373_v36 = vld [vmem:[%s7040_s1 + $0x1a8] sm:$0xff]  ;;  %v470_v37 = vadd.f32 %v372_v35, %v274_v33  ;;  %v4763_v45 = vld [vmem:[%s5495_s5 + $0x164] ss:$28 sps:$4 sm:$0xff]   ;;  %v276_v46 = vld [vmem:[%s7039_s0 + $0x1b0] sm:$0xff] }
  0x4d   : > { %1828 = vmatpush1.bf16.msra.mxu1 %v628_v41  ;;  %v633_v39 = vpack.c.bf16 %v555_v31, %v554_v30  ;;  %v267_v41 = vld [vmem:[%s7039_s0 + $0x168] sm:$0xff]  ;;  %v378_v8 = vld [vmem:[%s7040_s1 + $0x1d0] sm:$0xff]  ;;  %v4779_v33 = vld [vmem:[%s5495_s5 + $0x1fc] ss:$28 sps:$4 sm:$0xff]  }
  0x4e   : > { %1829 = vmatprep.subr.bf16.mxu1 %v5125_v3  ;;  %v463_v52 = vadd.f32 %v365_v47, %v267_v41  ;;  %v634_v54 = vpack.c.bf16 %v557_v44, %v556_v43  ;;  %v4759_v41 = vld [vmem:[%s5495_s5 + $0x118] ss:$28 sps:$4 sm:$0xff]   ;;  %v4760_v43 = vld [vmem:[%s5495_s5 + $0x128] ss:$28 sps:$4 sm:$0xff]   ;;  %v4765_v55 = vld [vmem:[%s5495_s5 + $0x150] ss:$28 sps:$4 sm:$0xff]  }
  0x4f   : > { %2292 = vmatpush1.bf16.msra.mxu0 %v660_v42  ;;  %v364_v42 = vld [vmem:[%s7040_s1 + $0x160] sm:$0xff]  ;;  %v4761_v44 = vld [vmem:[%s5495_s5 + $0x154] ss:$28 sps:$4 sm:$0xff]  }
  0x50   : > { %2293 = vmatprep.subr.bf16.mxu0 %v5125_v3  ;;  %v462_v51 = vadd.f32 %v364_v42, %v266_v40  ;;  %v561_v62 = vmax.f32 %v463_v52, 0.0  ;;  %v568_v40 = vmax.f32 %v470_v37, 0.0 }
  0x51   : > { %1830 = vmatpush1.bf16.msra.mxu1 %v629_v53  ;;  %v4745_v53 = vld [vmem:[%s5495_s5 + $0xbc] ss:$28 sps:$4 sm:$0xff]  }
  0x52   : > { %2031 = vmatprep.subr.bf16.mxu1 %v5125_v3  ;;  %v560_v61 = vmax.f32 %v462_v51, 0.0 }
  0x53   : > { %2294 = vmatpush1.bf16.msra.mxu0 %v661_v58  ;;  %v269_v58 = vld [vmem:[%s7039_s0 + $0x178] sm:$0xff] }
  0x54   : > { %4355 = vmatprep.subr.bf16.mxu0 %v5126_v15  ;;  %1832 = vmatmul.mubr.bf16.vlgmr.msra.gmra.mrb[0].mxu1 %v4725_v59  ;;  %v366_v59 = vld [vmem:[%s7040_s1 + $0x170] sm:$0xff]  ;;  %v465_v1 = vadd.f32 %v367_v60, %v269_v58  ;;  %v279_v58 = vld [vmem:[%s7039_s0 + $0x1c8] sm:$0xff] }
  0x55   : > { %2032 = vmatpush1.bf16.msra.mxu1 %v630_v4  ;;  %1839 = vmatprep.mubr.bf16.mxu1 %v4731_v5  ;;  %v464_v0 = vadd.f32 %v366_v59, %v268_v57  ;;  %v4748_v4 = vld [vmem:[%s5495_s5 + $0xb8] ss:$28 sps:$4 sm:$0xff]   ;;  %v4749_v5 = vld [vmem:[%s5495_s5 + $0xe4] ss:$28 sps:$4 sm:$0xff]   ;;  %v377_v60 = vld [vmem:[%s7040_s1 + $0x1c8] sm:$0xff] }
  0x56   : > { %2296 = vmatmul.mubr.bf16.vlgmr.msra.gmra.mrb[0].mxu0 %v4728_v2  ;;  %2033 = vmatprep.subr.bf16.mxu1 %v5125_v3  ;;  %v4747_v2 = vld [vmem:[%s5495_s5 + $0xa8] ss:$28 sps:$4 sm:$0xff]   ;;  %v563_v13 = vmax.f32 %v465_v1, 0.0  ;;  %v4769_v1 = vld [vmem:[%s5495_s5 + $0x19c] ss:$28 sps:$4 sm:$0xff]  }
  0x57   : > { %4356 = vmatpush3.bf16.msra.mxu0 %v662_v9  ;;  %2303 = vmatprep.mubr.bf16.mxu0 %v4733_v16  ;;  %v636_v9 = vpack.c.bf16 %v561_v62, %v560_v61  ;;  %v562_v12 = vmax.f32 %v464_v0, 0.0  ;;  %v467_v16 = vadd.f32 %v369_v10, %v271_v7  ;;  %v278_v57 = vld [vmem:[%s7039_s0 + $0x1c0] sm:$0xff]  ;;  %v475_v0 = vadd.f32 %v377_v60, %v279_v58  ;;  %v281_v7 = vld [vmem:[%s7039_s0 + $0x1d8] sm:$0xff]  ;;  %v4799_v60 = vld [vmem:[%s5495_s5 + $0x2b4] ss:$28 sps:$4 sm:$0xff]  }
  0x58   : > { %v376_v59 = vld [vmem:[%s7040_s1 + $0x1c0] sm:$0xff] }
  0x59   : > { %2034 = vmatpush1.bf16.msra.mxu1 %v631_v17  ;;  %v4753_v17 = vld [vmem:[%s5495_s5 + $0xe0] ss:$28 sps:$4 sm:$0xff]   ;;  %v637_v18 = vpack.c.bf16 %v563_v13, %v562_v12  ;;  %v565_v20 = vmax.f32 %v467_v16, 0.0  ;;  %v474_v61 = vadd.f32 %v376_v59, %v278_v57  ;;  %v4771_v12 = vld [vmem:[%s5495_s5 + $0x188] ss:$28 sps:$4 sm:$0xff]   ;;  %v3224_v59 = vld [vmem:[%s5866_s18 + $0x30] sm:$0xff] }
  0x5a   : > { %2035 = vmatprep.subr.bf16.mxu1 %v5125_v3  ;;  %v4766_v62 = vld [vmem:[%s5495_s5 + $0x160] ss:$28 sps:$4 sm:$0xff]   ;;  %v4772_v13 = vld [vmem:[%s5495_s5 + $0x198] ss:$28 sps:$4 sm:$0xff]  }
  0x5b   : > { %v638_v30 = vpack.c.bf16 %v565_v20, %v564_v19  ;;  %v282_v20 = vld [vmem:[%s7039_s0 + $0x1e0] sm:$0xff]  ;;  %v4796_v57 = vld [vmem:[%s5495_s5 + $0x278] ss:$28 sps:$4 sm:$0xff]  }
  0x5c   : > { %1840 = vmatmul.mubr.bf16.gmra.mrb[4].mxu1 %v4735_v26  ;;  %v468_v26 = vadd.f32 %v370_v23, %v272_v21  ;;  %v283_v21 = vld [vmem:[%s7039_s0 + $0x1e8] sm:$0xff]  ;;  %v4797_v58 = vld [vmem:[%s5495_s5 + $0x2a4] ss:$28 sps:$4 sm:$0xff]  }
  0x5d   : > { %1847 = vmatprep.mubr.bf16.mxu1 %v4737_v28  ;;  %2036 = vmatpush1.bf16.msra.mxu1 %v632_v34  ;;  %v4755_v28 = vld [vmem:[%s5495_s5 + $0x11c] ss:$28 sps:$4 sm:$0xff]   ;;  %v275_v34 = vld [vmem:[%s7039_s0 + $0x1a8] sm:$0xff] }
  0x5e   : > { %2304 = vmatmul.mubr.bf16.gmra.mrb[4].mxu0 %v4736_v27  ;;  %2037 = vmatprep.subr.bf16.mxu1 %v5125_v3  ;;  %v469_v27 = vadd.f32 %v371_v24, %v273_v22  ;;  %v566_v31 = vmax.f32 %v468_v26, 0.0  ;;  %v471_v38 = vadd.f32 %v373_v36, %v275_v34  ;;  %v380_v22 = vld [vmem:[%s7040_s1 + $0x1e0] sm:$0xff]  ;;  %v381_v23 = vld [vmem:[%s7040_s1 + $0x1e8] sm:$0xff]  ;;  %v383_v36 = vld [vmem:[%s7040_s1 + $0x1f8] sm:$0xff] }
  0x5f   : > { %2311 = vmatprep.mubr.bf16.mxu0 %v4739_v29  ;;  %v4757_v29 = vld [vmem:[%s5495_s5 + $0x12c] ss:$28 sps:$4 sm:$0xff]   ;;  %v478_v24 = vadd.f32 %v380_v22, %v282_v20  ;;  %v4777_v26 = vld [vmem:[%s5495_s5 + $0x1c0] ss:$28 sps:$4 sm:$0xff]  }
  0x60   : > { %v567_v32 = vmax.f32 %v469_v27, 0.0  ;;  %v569_v42 = vmax.f32 %v471_v38, 0.0  ;;  %v4778_v27 = vld [vmem:[%s5495_s5 + $0x1d0] ss:$28 sps:$4 sm:$0xff]   ;;  %v4817_v22 = vld [vmem:[%s5495_s5 + $0x35c] ss:$28 sps:$4 sm:$0xff]  }
  0x61   : > { %2038 = vmatpush1.bf16.msra.mxu1 %v633_v39  ;;  %v4781_v34 = vld [vmem:[%s5495_s5 + $0x20c] ss:$28 sps:$4 sm:$0xff]  }
  0x62   : > { %2039 = vmatprep.subr.bf16.mxu1 %v5125_v3  ;;  %v639_v39 = vpack.c.bf16 %v567_v32, %v566_v31  ;;  %v640_v47 = vpack.c.bf16 %v569_v42, %v568_v40  ;;  %v285_v31 = vld [vmem:[%s7039_s0 + $0x1f8] sm:$0xff]  ;;  %v382_v32 = vld [vmem:[%s7040_s1 + $0x1f0] sm:$0xff]  ;;  %v4815_v20 = vld [vmem:[%s5495_s5 + $0x34c] ss:$28 sps:$4 sm:$0xff]  }
  0x63   : > { %v481_v38 = vadd.f32 %v383_v36, %v285_v31  ;;  %v3239_v31 = vld [vmem:[%s5866_s18 + $0xa8] sm:$0xff]  ;;  %v4827_v36 = vld [vmem:[%s5495_s5 + $0x3bc] ss:$28 sps:$4 sm:$0xff]  }
  0x64   : > { %1848 = vmatmul.mubr.bf16.gmra.mrb[8].mxu1 %v4741_v48  ;;  %v277_v48 = vld [vmem:[%s7039_s0 + $0x1b8] sm:$0xff] }
  0x65   : > { %1855 = vmatprep.mubr.bf16.mxu1 %v4743_v50  ;;  %2040 = vmatpush1.bf16.msra.mxu1 %v634_v54  ;;  %v375_v50 = vld [vmem:[%s7040_s1 + $0x1b8] sm:$0xff]  ;;  %v579_v40 = vmax.f32 %v481_v38, 0.0  ;;  %v4829_v38 = vld [vmem:[%s5495_s5 + $0x3cc] ss:$28 sps:$4 sm:$0xff]  }
  0x66   : > { %2312 = vmatmul.mubr.bf16.gmra.mrb[8].mxu0 %v4742_v49  ;;  %2041 = vmatprep.subr.bf16.mxu1 %v5125_v3  ;;  %v374_v49 = vld [vmem:[%s7040_s1 + $0x1b0] sm:$0xff]  ;;  %v473_v52 = vadd.f32 %v375_v50, %v277_v48  ;;  %v4790_v48 = vld [vmem:[%s5495_s5 + $0x240] ss:$28 sps:$4 sm:$0xff]   ;;  %v3219_v50 = vld [vmem:[%s5866_s18 + $0x8] sm:$0xff] }
  0x67   : > { %2319 = vmatprep.mubr.bf16.mxu0 %v4745_v53  ;;  %v472_v51 = vadd.f32 %v374_v49, %v276_v46  ;;  %v4789_v46 = vld [vmem:[%s5495_s5 + $0x230] ss:$28 sps:$4 sm:$0xff]  }
  0x68   : > { %v571_v54 = vmax.f32 %v473_v52, 0.0  ;;  %v4791_v49 = vld [vmem:[%s5495_s5 + $0x26c] ss:$28 sps:$4 sm:$0xff]   ;;  %v4793_v52 = vld [vmem:[%s5495_s5 + $0x27c] ss:$28 sps:$4 sm:$0xff]  }
  0x69   : > { %2042 = vmatpush1.bf16.msra.mxu1 %v635_v63  ;;  %v570_v53 = vmax.f32 %v472_v51, 0.0  ;;  %v4767_v63 = vld [vmem:[%s5495_s5 + $0x18c] ss:$28 sps:$4 sm:$0xff]   ;;  %v3220_v51 = vld [vmem:[%s5866_s18 + $0x10] sm:$0xff] }
  0x6a   : > { %2043 = vmatprep.subr.bf16.mxu1 %v5125_v3 }
  0x6b   : > { %v641_v56 = vpack.c.bf16 %v571_v54, %v570_v53  ;;  %v3218_v53 = vld [vmem:[%s5866_s18] sm:$0xff] }
  0x6c   : > { %1856 = vmatmul.mubr.bf16.gmra.mrb[12].mxu1 %v4747_v2  ;;  %v572_v2 = vmax.f32 %v474_v61, 0.0  ;;  %v3222_v54 = vld [vmem:[%s5866_s18 + $0x20] sm:$0xff]  ;;  %v3223_v61 = vld [vmem:[%s5866_s18 + $0x28] sm:$0xff] }
  0x6d   : > { %1863 = vmatprep.mubr.bf16.mxu1 %v4749_v5  ;;  %2044 = vmatpush1.bf16.msra.mxu1 %v636_v9  ;;  %v280_v5 = vld [vmem:[%s7039_s0 + $0x1d0] sm:$0xff]  ;;  %v379_v9 = vld [vmem:[%s7040_s1 + $0x1d8] sm:$0xff] }
  0x6e   : > { %2320 = vmatmul.mubr.bf16.gmra.mrb[12].mxu0 %v4748_v4  ;;  %2045 = vmatprep.subr.bf16.mxu1 %v5125_v3  ;;  %v573_v4 = vmax.f32 %v475_v0, 0.0  ;;  %v476_v10 = vadd.f32 %v378_v8, %v280_v5  ;;  %v3225_v0 = vld [vmem:[%s5866_s18 + $0x38] sm:$0xff]  ;;  %v4805_v5 = vld [vmem:[%s5495_s5 + $0x2ec] ss:$28 sps:$4 sm:$0xff]  }
  0x6f   : > { %2327 = vmatprep.mubr.bf16.mxu0 %v4751_v11  ;;  %v477_v11 = vadd.f32 %v379_v9, %v281_v7  ;;  %v3230_v7 = vld [vmem:[%s5866_s18 + $0x60] sm:$0xff]  ;;  %v4807_v8 = vld [vmem:[%s5495_s5 + $0x2d8] ss:$28 sps:$4 sm:$0xff]  }
  0x70   : > { %v642_v6 = vpack.c.bf16 %v573_v4, %v572_v2  ;;  %v574_v14 = vmax.f32 %v476_v10, 0.0  ;;  %v4803_v2 = vld [vmem:[%s5495_s5 + $0x2dc] ss:$28 sps:$4 sm:$0xff]   ;;  %v3228_v4 = vld [vmem:[%s5866_s18 + $0x50] sm:$0xff]  ;;  %v4808_v10 = vld [vmem:[%s5495_s5 + $0x2e8] ss:$28 sps:$4 sm:$0xff]  }
  0x71   : > { %2046 = vmatpush1.bf16.msra.mxu1 %v637_v18  ;;  %v575_v16 = vmax.f32 %v477_v11, 0.0  ;;  %v4775_v18 = vld [vmem:[%s5495_s5 + $0x1d4] ss:$28 sps:$4 sm:$0xff]   ;;  %v3229_v9 = vld [vmem:[%s5866_s18 + $0x58] sm:$0xff] }
  0x72   : > { %2047 = vmatprep.subr.bf16.mxu1 %v5125_v3  ;;  %v4809_v11 = vld [vmem:[%s5495_s5 + $0x314] ss:$28 sps:$4 sm:$0xff]  }
  0x73   : > { %v643_v19 = vpack.c.bf16 %v575_v16, %v574_v14  ;;  %v3231_v14 = vld [vmem:[%s5866_s18 + $0x68] sm:$0xff]  ;;  %v3234_v16 = vld [vmem:[%s5866_s18 + $0x80] sm:$0xff] }
  0x74   : > { %1864 = vmatmul.mubr.bf16.gmra.mrb[16].mxu1 %v4753_v17  ;;  %v4773_v17 = vld [vmem:[%s5495_s5 + $0x1c4] ss:$28 sps:$4 sm:$0xff]  }
  0x75   : > { %1871 = vmatprep.mubr.bf16.mxu1 %v4755_v28  ;;  %2048 = vmatpush1.bf16.msra.mxu1 %v638_v30  ;;  %v576_v28 = vmax.f32 %v478_v24, 0.0  ;;  %v284_v30 = vld [vmem:[%s7039_s0 + $0x1f0] sm:$0xff]  ;;  %v3238_v24 = vld [vmem:[%s5866_s18 + $0xa0] sm:$0xff] }
  0x76   : > { %2328 = vmatmul.mubr.bf16.gmra.mrb[16].mxu0 %v4754_v25  ;;  %2049 = vmatprep.subr.bf16.mxu1 %v5125_v3  ;;  %v479_v25 = vadd.f32 %v381_v23, %v283_v21  ;;  %v480_v37 = vadd.f32 %v382_v32, %v284_v30  ;;  %v3236_v21 = vld [vmem:[%s5866_s18 + $0x90] sm:$0xff]  ;;  %v3235_v23 = vld [vmem:[%s5866_s18 + $0x88] sm:$0xff]  ;;  %v3242_v32 = vld [vmem:[%s5866_s18 + $0xc0] sm:$0xff] }
  0x77   : > { %2335 = vmatprep.mubr.bf16.mxu0 %v4757_v29  ;;  %v4823_v30 = vld [vmem:[%s5495_s5 + $0x394] ss:$28 sps:$4 sm:$0xff]  }
  0x78   : > { %v577_v29 = vmax.f32 %v479_v25, 0.0  ;;  %v3237_v25 = vld [vmem:[%s5866_s18 + $0x98] sm:$0xff] }
  0x79   : > { %2050 = vmatpush1.bf16.msra.mxu1 %v639_v39  ;;  %v578_v39 = vmax.f32 %v480_v37, 0.0  ;;  %v3244_v37 = vld [vmem:[%s5866_s18 + $0xd0] sm:$0xff] }
  0x7a   : > { %2051 = vmatprep.subr.bf16.mxu1 %v5125_v3  ;;  %v644_v35 = vpack.c.bf16 %v577_v29, %v576_v28  ;;  %v4821_v28 = vld [vmem:[%s5495_s5 + $0x384] ss:$28 sps:$4 sm:$0xff]   ;;  %v3240_v29 = vld [vmem:[%s5866_s18 + $0xb0] sm:$0xff] }
  0x7b   : > { %v645_v42 = vpack.c.bf16 %v579_v40, %v578_v39  ;;  %v3243_v39 = vld [vmem:[%s5866_s18 + $0xc8] sm:$0xff]  ;;  %v3246_v40 = vld [vmem:[%s5866_s18 + $0xe0] sm:$0xff] }
  0x7c   : > { %1872 = vmatmul.mubr.bf16.gmra.mrb[20].mxu1 %v4759_v41  ;;  %v4783_v41 = vld [vmem:[%s5495_s5 + $0x1f8] ss:$28 sps:$4 sm:$0xff]  }
  0x7d   : > { %1879 = vmatprep.mubr.bf16.mxu1 %v4761_v44  ;;  %2052 = vmatpush1.bf16.msra.mxu1 %v640_v47  ;;  %v4785_v44 = vld [vmem:[%s5495_s5 + $0x234] ss:$28 sps:$4 sm:$0xff]   ;;  %v7044_v47 = vmov 1  }
  0x7e   : > { %2336 = vmatmul.mubr.bf16.gmra.mrb[20].mxu0 %v4760_v43  ;;  %2053 = vmatprep.subr.bf16.mxu1 %v5125_v3  ;;  %v4784_v43 = vld [vmem:[%s5495_s5 + $0x208] ss:$28 sps:$4 sm:$0xff]  }
  0x7f   : > { %2343 = vmatprep.mubr.bf16.mxu0 %v4763_v45  ;;  %v4787_v45 = vld [vmem:[%s5495_s5 + $0x244] ss:$28 sps:$4 sm:$0xff]   ;;  %4720 = vset.pattern.permute.xlu1 %v7044_v47 }
  0x80   : > { %4719 = vset.pattern.permute.xlu0 %v7044_v47  ;;  %3715 = vperm.xlu1 %4720, %v3219_v50   ;;  %v3249_v50 = vld [vmem:[%s5866_s18 + $0xf8] sm:$0xff] }
  0x81   : > { %2054 = vmatpush1.bf16.msra.mxu1 %v641_v56  ;;  %3710 = vperm.xlu0 %4719, %v3218_v53   ;;  %v3221_v56 = vld [vmem:[%s5866_s18 + $0x18] sm:$0xff]  ;;  %v4839_v53 = vld [vmem:[%s5495_s5 + $0x42c] ss:$28 sps:$4 sm:$0xff]  }
  0x82   : > { %2055 = vmatprep.subr.bf16.mxu1 %v5125_v3 }
  0x84   : > { %1880 = vmatmul.mubr.bf16.gmra.mrb[24].mxu1 %v4765_v55  ;;  %3720 = vperm.xlu1 %4720, %v3220_v51   ;;  %v4795_v55 = vld [vmem:[%s5495_s5 + $0x268] ss:$28 sps:$4 sm:$0xff]   ;;  %v4837_v51 = vld [vmem:[%s5495_s5 + $0x3f0] ss:$28 sps:$4 sm:$0xff]  }
  0x85   : > { %1887 = vmatprep.mubr.bf16.mxu1 %v4767_v63  ;;  %2056 = vmatpush1.bf16.msra.mxu1 %v642_v6  ;;  %v4801_v63 = vld [vmem:[%s5495_s5 + $0x2a0] ss:$28 sps:$4 sm:$0xff]   ;;  %v3227_v6 = vld [vmem:[%s5866_s18 + $0x48] sm:$0xff] }
  0x86   : > { %2344 = vmatmul.mubr.bf16.gmra.mrb[24].mxu0 %v4766_v62  ;;  %2057 = vmatprep.subr.bf16.mxu1 %v5125_v3  ;;  %v3226_v62 = vld [vmem:[%s5866_s18 + $0x40] sm:$0xff] }
  0x87   : > { %2351 = vmatprep.mubr.bf16.mxu0 %v4769_v1  ;;  %3725 = vperm.xlu0 %4719, %v3221_v56   ;;  %v4802_v1 = vld [vmem:[%s5495_s5 + $0x2b0] ss:$28 sps:$4 sm:$0xff]  }
  0x88   : > { %3730 = vperm.xlu1 %4720, %v3222_v54   ;;  %v3252_v54 = vld [vmem:[%s5866_s18 + $0x110] sm:$0xff]  ;;  %v3251_v56 = vld [vmem:[%s5866_s18 + $0x108] sm:$0xff] }
  0x89   : > { %2058 = vmatpush1.bf16.msra.mxu1 %v643_v19  ;;  %v4814_v19 = vld [vmem:[%s5495_s5 + $0x320] ss:$28 sps:$4 sm:$0xff]  }
  0x8a   : > { %2059 = vmatprep.subr.bf16.mxu1 %v5125_v3 }
  0x8b   : > { %3735 = vperm.xlu0 %4719, %v3223_v61   ;;  %v4845_v61 = vld [vmem:[%s5495_s5 + $0x464] ss:$28 sps:$4 sm:$0xff]  }
  0x8c   : > { %1888 = vmatmul.mubr.bf16.gmra.mrb[28].mxu1 %v4771_v12  ;;  %3740 = vperm.xlu1 %4720, %v3224_v59   ;;  %v3232_v12 = vld [vmem:[%s5866_s18 + $0x70] sm:$0xff]  ;;  %v4843_v59 = vld [vmem:[%s5495_s5 + $0x428] ss:$28 sps:$4 sm:$0xff]  }
  0x8d   : > { %1895 = vmatprep.mubr.bf16.mxu1 %v4773_v17  ;;  %2060 = vmatpush1.bf16.msra.mxu1 %v644_v35  ;;  %v3233_v17 = vld [vmem:[%s5866_s18 + $0x78] sm:$0xff]  ;;  %v4826_v35 = vld [vmem:[%s5495_s5 + $0x390] ss:$28 sps:$4 sm:$0xff]  }
  0x8e   : > { %2352 = vmatmul.mubr.bf16.gmra.mrb[28].mxu0 %v4772_v13  ;;  %2061 = vmatprep.subr.bf16.mxu1 %v5125_v3  ;;  %v4811_v13 = vld [vmem:[%s5495_s5 + $0x324] ss:$28 sps:$4 sm:$0xff]  }
  0x8f   : > { %2359 = vmatprep.mubr.bf16.mxu0 %v4775_v18  ;;  %3745 = vperm.xlu0 %4719, %v3225_v0   ;;  %v4813_v18 = vld [vmem:[%s5495_s5 + $0x310] ss:$28 sps:$4 sm:$0xff]  }
  0x90   : > { %3750 = vperm.xlu1 %4720, %v3226_v62   ;;  %v3256_v62 = vld [vmem:[%s5866_s18 + $0x130] sm:$0xff]  ;;  %v3255_v0 = vld [vmem:[%s5866_s18 + $0x128] sm:$0xff] }
  0x91   : > { %2062 = vmatpush1.bf16.msra.mxu1 %v645_v42  ;;  %v4831_v42 = vld [vmem:[%s5495_s5 + $0x3b8] ss:$28 sps:$4 sm:$0xff]  }
  0x93   : > { %3755 = vperm.xlu0 %4719, %v3227_v6   ;;  %v4851_v6 = vld [vmem:[%s5495_s5 + $0x49c] ss:$28 sps:$4 sm:$0xff]  }
  0x94   : > { %1896 = vmatmul.mubr.bf16.gmra.mrb[32].mxu1 %v4777_v26  ;;  %3760 = vperm.xlu1 %4720, %v3228_v4   ;;  %v4819_v26 = vld [vmem:[%s5495_s5 + $0x348] ss:$28 sps:$4 sm:$0xff]   ;;  %v4849_v4 = vld [vmem:[%s5495_s5 + $0x460] ss:$28 sps:$4 sm:$0xff]  }
  0x95   : > { %1903 = vmatprep.mubr.bf16.mxu1 %v4779_v33  ;;  %v3241_v33 = vld [vmem:[%s5866_s18 + $0xb8] sm:$0xff] }
  0x96   : > { %2360 = vmatmul.mubr.bf16.gmra.mrb[32].mxu0 %v4778_v27  ;;  %v4820_v27 = vld [vmem:[%s5495_s5 + $0x358] ss:$28 sps:$4 sm:$0xff]  }
  0x97   : > { %2367 = vmatprep.mubr.bf16.mxu0 %v4781_v34  ;;  %3765 = vperm.xlu0 %4719, %v3229_v9   ;;  %v4825_v34 = vld [vmem:[%s5495_s5 + $0x380] ss:$28 sps:$4 sm:$0xff]   ;;  %v3259_v9 = vld [vmem:[%s5866_s18 + $0x148] sm:$0xff] }
  0x98   : > { %3770 = vperm.xlu1 %4720, %v3230_v7   ;;  %v3260_v7 = vld [vmem:[%s5866_s18 + $0x150] sm:$0xff] }
  0x9b   : > { %3775 = vperm.xlu0 %4719, %v3231_v14   ;;  %v4857_v14 = vld [vmem:[%s5495_s5 + $0x4d4] ss:$28 sps:$4 sm:$0xff]  }
  0x9c   : > { %1904 = vmatmul.mubr.bf16.gmra.mrb[36].mxu1 %v4783_v41  ;;  %3780 = vperm.xlu1 %4720, %v3232_v12   ;;  %v3245_v41 = vld [vmem:[%s5866_s18 + $0xd8] sm:$0xff] }
  0x9d   : > { %1911 = vmatprep.mubr.bf16.mxu1 %v4785_v44  ;;  %v4833_v44 = vld [vmem:[%s5495_s5 + $0x3f4] ss:$28 sps:$4 sm:$0xff]  }
  0x9e   : > { %2368 = vmatmul.mubr.bf16.gmra.mrb[36].mxu0 %v4784_v43  ;;  %v4832_v43 = vld [vmem:[%s5495_s5 + $0x3c8] ss:$28 sps:$4 sm:$0xff]   ;;  %v4855_v12 = vld [vmem:[%s5495_s5 + $0x498] ss:$28 sps:$4 sm:$0xff]  }
  0x9f   : > { %2375 = vmatprep.mubr.bf16.mxu0 %v4787_v45  ;;  %3785 = vperm.xlu0 %4719, %v3233_v17   ;;  %v3248_v45 = vld [vmem:[%s5866_s18 + $0xf0] sm:$0xff]  ;;  %v4859_v17 = vld [vmem:[%s5495_s5 + $0x4e4] ss:$28 sps:$4 sm:$0xff]  }
  0xa0   : > { %3790 = vperm.xlu1 %4720, %v3234_v16   ;;  %v3264_v16 = vld [vmem:[%s5866_s18 + $0x170] sm:$0xff] }
  0xa3   : > { %3795 = vperm.xlu0 %4719, %v3235_v23   ;;  %v855_v23 = vld [vmem:[%s5495_s5 + $0x540] sm:$0xff] }
  0xa4   : > { %1912 = vmatmul.mubr.bf16.gmra.mrb[40].mxu1 %v4789_v46  ;;  %3800 = vperm.xlu1 %4720, %v3236_v21   ;;  %v4835_v46 = vld [vmem:[%s5495_s5 + $0x404] ss:$28 sps:$4 sm:$0xff]   ;;  %v4863_v21 = vld [vmem:[%s5495_s5 + $0x50c] ss:$28 sps:$4 sm:$0xff]  }
  0xa5   : > { %1919 = vmatprep.mubr.bf16.mxu1 %v4791_v49  ;;  %v3250_v49 = vld [vmem:[%s5866_s18 + $0x100] sm:$0xff] }
  0xa6   : > { %2376 = vmatmul.mubr.bf16.gmra.mrb[40].mxu0 %v4790_v48  ;;  %v3247_v48 = vld [vmem:[%s5866_s18 + $0xe8] sm:$0xff] }
  0xa7   : > { %2383 = vmatprep.mubr.bf16.mxu0 %v4793_v52  ;;  %3805 = vperm.xlu0 %4719, %v3237_v25   ;;  %v4838_v52 = vld [vmem:[%s5495_s5 + $0x400] ss:$28 sps:$4 sm:$0xff]   ;;  %v4867_v25 = vld [vmem:[%s5495_s5 + $0x508] ss:$28 sps:$4 sm:$0xff]  }
  0xa8   : > { %3810 = vperm.xlu1 %4720, %v3238_v24   ;;  %v857_v24 = vld [vmem:[%s5495_s5 + $0x550] sm:$0xff] }
  0xab   : > { %3815 = vperm.xlu0 %4719, %v3239_v31   ;;  %v4873_v31 = vld [vmem:[%s5495_s5 + $0x8] ss:$28 sps:$4 sm:$0xff]  }
  0xac   : > { %1920 = vmatmul.mubr.bf16.gmra.mrb[44].mxu1 %v4795_v55  ;;  %3820 = vperm.xlu1 %4720, %v3240_v29   ;;  %v4841_v55 = vld [vmem:[%s5495_s5 + $0x43c] ss:$28 sps:$4 sm:$0xff]   ;;  %v4295_v29 = vcombine.low %v855_v23, %v855_v23 }
  0xad   : > { %1927 = vmatprep.mubr.bf16.mxu1 %v4797_v58  ;;  %v3253_v58 = vld [vmem:[%s5866_s18 + $0x118] sm:$0xff] }
  0xae   : > { %2384 = vmatmul.mubr.bf16.gmra.mrb[44].mxu0 %v4796_v57  ;;  %v3254_v57 = vld [vmem:[%s5866_s18 + $0x120] sm:$0xff] }
  0xaf   : > { %2391 = vmatprep.mubr.bf16.mxu0 %v4799_v60  ;;  %3825 = vperm.xlu0 %4719, %v3241_v33   ;;  %v4844_v60 = vld [vmem:[%s5495_s5 + $0x438] ss:$28 sps:$4 sm:$0xff]   ;;  %v4877_v33 = vld [vmem:[%s5495_s5 + $0x44] ss:$28 sps:$4 sm:$0xff]  }
  0xb0   : > { %3830 = vperm.xlu1 %4720, %v3242_v32   ;;  %v4876_v32 = vld [vmem:[%s5495_s5 + $0x18] ss:$28 sps:$4 sm:$0xff]  }
  0xb3   : > { %3835 = vperm.xlu0 %4719, %v3243_v39   ;;  %v4885_v39 = vld [vmem:[%s5495_s5 + $0xb4] ss:$28 sps:$4 sm:$0xff]  }
  0xb4   : > { %1928 = vmatmul.mubr.bf16.gmra.mrb[48].mxu1 %v4801_v63  ;;  %3840 = vperm.xlu1 %4720, %v3244_v37   ;;  %v4847_v63 = vld [vmem:[%s5495_s5 + $0x474] ss:$28 sps:$4 sm:$0xff]  }
  0xb5   : > { %1935 = vmatprep.mubr.bf16.mxu1 %v4803_v2  ;;  %v3257_v2 = vld [vmem:[%s5866_s18 + $0x138] sm:$0xff] }
  0xb6   : > { %2392 = vmatmul.mubr.bf16.gmra.mrb[48].mxu0 %v4802_v1  ;;  %v3258_v1 = vld [vmem:[%s5866_s18 + $0x140] sm:$0xff]  ;;  %v4883_v37 = vld [vmem:[%s5495_s5 + $0x78] ss:$28 sps:$4 sm:$0xff]  }
  0xb7   : > { %2399 = vmatprep.mubr.bf16.mxu0 %v4805_v5  ;;  %3845 = vperm.xlu0 %4719, %v3245_v41   ;;  %v4850_v5 = vld [vmem:[%s5495_s5 + $0x470] ss:$28 sps:$4 sm:$0xff]   ;;  %v4888_v41 = vld [vmem:[%s5495_s5 + $0xc0] ss:$28 sps:$4 sm:$0xff]  }
  0xb8   : > { %3850 = vperm.xlu1 %4720, %v3246_v40   ;;  %v4887_v40 = vld [vmem:[%s5495_s5 + $0xb0] ss:$28 sps:$4 sm:$0xff]  }
  0xbb   : > { %3855 = vperm.xlu0 %4719, %v3247_v48   ;;  %v4896_v48 = vld [vmem:[%s5495_s5 + $0x130] ss:$28 sps:$4 sm:$0xff]  }
  0xbc   : > { %1936 = vmatmul.mubr.bf16.gmra.mrb[52].mxu1 %v4807_v8  ;;  %3860 = vperm.xlu1 %4720, %v3248_v45   ;;  %v4853_v8 = vld [vmem:[%s5495_s5 + $0x4ac] ss:$28 sps:$4 sm:$0xff]   ;;  %v4893_v45 = vld [vmem:[%s5495_s5 + $0x124] ss:$28 sps:$4 sm:$0xff]  }
  0xbd   : > { %1943 = vmatprep.mubr.bf16.mxu1 %v4809_v11  ;;  %v3261_v11 = vld [vmem:[%s5866_s18 + $0x158] sm:$0xff] }
  0xbe   : > { %2400 = vmatmul.mubr.bf16.gmra.mrb[52].mxu0 %v4808_v10  ;;  %v3262_v10 = vld [vmem:[%s5866_s18 + $0x160] sm:$0xff] }
  0xbf   : > { %2407 = vmatprep.mubr.bf16.mxu0 %v4811_v13  ;;  %3865 = vperm.xlu0 %4719, %v3249_v50   ;;  %v4856_v13 = vld [vmem:[%s5495_s5 + $0x4a8] ss:$28 sps:$4 sm:$0xff]   ;;  %v4899_v50 = vld [vmem:[%s5495_s5 + $0x158] ss:$28 sps:$4 sm:$0xff]  }
  0xc0   : > { %3870 = vperm.xlu1 %4720, %v3250_v49   ;;  %v4897_v49 = vld [vmem:[%s5495_s5 + $0x15c] ss:$28 sps:$4 sm:$0xff]  }
  0xc3   : > { %3875 = vperm.xlu0 %4719, %v3251_v56   ;;  %v4907_v56 = vld [vmem:[%s5495_s5 + $0x1c8] ss:$28 sps:$4 sm:$0xff]  }
  0xc4   : > { %1944 = vmatmul.mubr.bf16.gmra.mrb[56].mxu1 %v4813_v18  ;;  %3880 = vperm.xlu1 %4720, %v3252_v54   ;;  %v3263_v18 = vld [vmem:[%s5866_s18 + $0x168] sm:$0xff]  ;;  %v4904_v54 = vld [vmem:[%s5495_s5 + $0x1a0] ss:$28 sps:$4 sm:$0xff]  }
  0xc5   : > { %1951 = vmatprep.mubr.bf16.mxu1 %v4815_v20  ;;  %v4862_v20 = vld [vmem:[%s5495_s5 + $0x4e0] ss:$28 sps:$4 sm:$0xff]  }
  0xc6   : > { %2408 = vmatmul.mubr.bf16.gmra.mrb[56].mxu0 %v4814_v19  ;;  %v4861_v19 = vld [vmem:[%s5495_s5 + $0x4d0] ss:$28 sps:$4 sm:$0xff]  }
  0xc7   : > { %2415 = vmatprep.mubr.bf16.mxu0 %v4817_v22  ;;  %3885 = vperm.xlu0 %4719, %v3253_v58   ;;  %v4865_v22 = vld [vmem:[%s5495_s5 + $0x51c] ss:$28 sps:$4 sm:$0xff]   ;;  %v4909_v58 = vld [vmem:[%s5495_s5 + $0x204] ss:$28 sps:$4 sm:$0xff]  }
  0xc8   : > { %3890 = vperm.xlu1 %4720, %v3254_v57   ;;  %v4908_v57 = vld [vmem:[%s5495_s5 + $0x1d8] ss:$28 sps:$4 sm:$0xff]  }
  0xcb   : > { %3895 = vperm.xlu0 %4719, %v3255_v0   ;;  %v4917_v0 = vld [vmem:[%s5495_s5 + $0x274] ss:$28 sps:$4 sm:$0xff]  }
  0xcc   : > { %1952 = vmatmul.mubr.bf16.gmra.mrb[60].mxu1 %v4819_v26  ;;  %3900 = vperm.xlu1 %4720, %v3256_v62   ;;  %v4868_v26 = vld [vmem:[%s5495_s5 + $0x518] ss:$28 sps:$4 sm:$0xff]  }
  0xcd   : > { %1959 = vmatprep.mubr.bf16.mxu1 %v4821_v28  ;;  %v4300_v28 = vcombine.high %v857_v24, %v857_v24  ;;  %v4915_v62 = vld [vmem:[%s5495_s5 + $0x238] ss:$28 sps:$4 sm:$0xff]  }
  0xce   : > { %2416 = vmatmul.mubr.bf16.gmra.mrb[60].mxu0 %v4820_v27  ;;  %v4296_v27 = vcombine.high %v855_v23, %v855_v23  ;;  %v4945_v23 = vld [vmem:[%s5495_s5 + $0x3fc] ss:$28 sps:$4 sm:$0xff]  }
  0xcf   : > { %2423 = vmatprep.mubr.bf16.mxu0 %v4823_v30  ;;  %3905 = vperm.xlu0 %4719, %v3257_v2   ;;  %v4875_v30 = vld [vmem:[%s5495_s5 + $0xc] ss:$28 sps:$4 sm:$0xff]   ;;  %v4920_v2 = vld [vmem:[%s5495_s5 + $0x280] ss:$28 sps:$4 sm:$0xff]  }
  0xd0   : > { %3910 = vperm.xlu1 %4720, %v3258_v1   ;;  %v4919_v1 = vld [vmem:[%s5495_s5 + $0x270] ss:$28 sps:$4 sm:$0xff]  }
  0xd3   : > { %3915 = vperm.xlu0 %4719, %v3259_v9   ;;  %v4928_v9 = vld [vmem:[%s5495_s5 + $0x2f0] ss:$28 sps:$4 sm:$0xff]  }
  0xd4   : > { %1960 = vmatmul.mubr.bf16.gmra.mrb[64].mxu1 %v4825_v34  ;;  %3920 = vperm.xlu1 %4720, %v3260_v7   ;;  %v4879_v34 = vld [vmem:[%s5495_s5 + $0x40] ss:$28 sps:$4 sm:$0xff]  }
  0xd5   : > { %1967 = vmatprep.mubr.bf16.mxu1 %v4827_v36  ;;  %v4881_v36 = vld [vmem:[%s5495_s5 + $0x7c] ss:$28 sps:$4 sm:$0xff]   ;;  %v4925_v7 = vld [vmem:[%s5495_s5 + $0x2e4] ss:$28 sps:$4 sm:$0xff]  }
  0xd6   : > { %2424 = vmatmul.mubr.bf16.gmra.mrb[64].mxu0 %v4826_v35  ;;  %v4880_v35 = vld [vmem:[%s5495_s5 + $0x50] ss:$28 sps:$4 sm:$0xff]  }
  0xd7   : > { %2431 = vmatprep.mubr.bf16.mxu0 %v4829_v38  ;;  %3925 = vperm.xlu0 %4719, %v3261_v11   ;;  %v4884_v38 = vld [vmem:[%s5495_s5 + $0x88] ss:$28 sps:$4 sm:$0xff]   ;;  %v4931_v11 = vld [vmem:[%s5495_s5 + $0x318] ss:$28 sps:$4 sm:$0xff]  }
  0xd8   : > { %3930 = vperm.xlu1 %4720, %v3262_v10   ;;  %v4929_v10 = vld [vmem:[%s5495_s5 + $0x31c] ss:$28 sps:$4 sm:$0xff]  }
  0xdb   : > { %3935 = vperm.xlu0 %4719, %v3263_v18   ;;  %v4939_v18 = vld [vmem:[%s5495_s5 + $0x388] ss:$28 sps:$4 sm:$0xff]  }
  0xdc   : > { %1968 = vmatmul.mubr.bf16.gmra.mrb[68].mxu1 %v4831_v42  ;;  %3940 = vperm.xlu1 %4720, %v3264_v16   ;;  %v4889_v42 = vld [vmem:[%s5495_s5 + $0xec] ss:$28 sps:$4 sm:$0xff]   ;;  %v4936_v16 = vld [vmem:[%s5495_s5 + $0x360] ss:$28 sps:$4 sm:$0xff]  }
  0xdd   : > { %1975 = vmatprep.mubr.bf16.mxu1 %v4833_v44  ;;  %v4892_v44 = vld [vmem:[%s5495_s5 + $0xf8] ss:$28 sps:$4 sm:$0xff]  }
  0xde   : > { %2432 = vmatmul.mubr.bf16.gmra.mrb[68].mxu0 %v4832_v43  ;;  %v4891_v43 = vld [vmem:[%s5495_s5 + $0xe8] ss:$28 sps:$4 sm:$0xff]  }
  0xdf   : > { %2439 = vmatprep.mubr.bf16.mxu0 %v4835_v46  ;;  %4721 = vset.pattern.permute.xlu0 %v5125_v3  ;;  %v4895_v46 = vld [vmem:[%s5495_s5 + $0x120] ss:$28 sps:$4 sm:$0xff]  }
  0xe0   : > { %4722 = vset.pattern.permute.xlu1 %v5125_v3  ;;  %v4299_v3 = vcombine.low %v857_v24, %v857_v24  ;;  %v4947_v24 = vld [vmem:[%s5495_s5 + $0x3f8] ss:$28 sps:$4 sm:$0xff]  }
  0xe4   : > { %1976 = vmatmul.mubr.bf16.gmra.mrb[72].mxu1 %v4837_v51  ;;  %v4900_v51 = vld [vmem:[%s5495_s5 + $0x168] ss:$28 sps:$4 sm:$0xff]  }
  0xe5   : > { %1983 = vmatprep.mubr.bf16.mxu1 %v4839_v53  ;;  %v4903_v53 = vld [vmem:[%s5495_s5 + $0x190] ss:$28 sps:$4 sm:$0xff]  }
  0xe6   : > { %2440 = vmatmul.mubr.bf16.gmra.mrb[72].mxu0 %v4838_v52  ;;  %v4901_v52 = vld [vmem:[%s5495_s5 + $0x194] ss:$28 sps:$4 sm:$0xff]  }
  0xe7   : > { %2447 = vmatprep.mubr.bf16.mxu0 %v4841_v55  ;;  %v4905_v55 = vld [vmem:[%s5495_s5 + $0x1cc] ss:$28 sps:$4 sm:$0xff]  }
  0xec   : > { %1984 = vmatmul.mubr.bf16.gmra.mrb[76].mxu1 %v4843_v59  ;;  %v4911_v59 = vld [vmem:[%s5495_s5 + $0x200] ss:$28 sps:$4 sm:$0xff]  }
  0xed   : > { %1991 = vmatprep.mubr.bf16.mxu1 %v4845_v61  ;;  %v4913_v61 = vld [vmem:[%s5495_s5 + $0x23c] ss:$28 sps:$4 sm:$0xff]  }
  0xee   : > { %2448 = vmatmul.mubr.bf16.gmra.mrb[76].mxu0 %v4844_v60  ;;  %v4912_v60 = vld [vmem:[%s5495_s5 + $0x210] ss:$28 sps:$4 sm:$0xff]  }
  0xef   : > { %2455 = vmatprep.mubr.bf16.mxu0 %v4847_v63  ;;  %v4916_v63 = vld [vmem:[%s5495_s5 + $0x248] ss:$28 sps:$4 sm:$0xff]  }
  0xf4   : > { %1992 = vmatmul.mubr.bf16.gmra.mrb[80].mxu1 %v4849_v4  ;;  %v4921_v4 = vld [vmem:[%s5495_s5 + $0x2ac] ss:$28 sps:$4 sm:$0xff]  }
  0xf5   : > { %1999 = vmatprep.mubr.bf16.mxu1 %v4851_v6  ;;  %v4924_v6 = vld [vmem:[%s5495_s5 + $0x2b8] ss:$28 sps:$4 sm:$0xff]  }
  0xf6   : > { %2456 = vmatmul.mubr.bf16.gmra.mrb[80].mxu0 %v4850_v5  ;;  %v4923_v5 = vld [vmem:[%s5495_s5 + $0x2a8] ss:$28 sps:$4 sm:$0xff]  }
  0xf7   : > { %2463 = vmatprep.mubr.bf16.mxu0 %v4853_v8  ;;  %v4927_v8 = vld [vmem:[%s5495_s5 + $0x2e0] ss:$28 sps:$4 sm:$0xff]  }
  0xfc   : > { %2000 = vmatmul.mubr.bf16.gmra.mrb[84].mxu1 %v4855_v12  ;;  %v4932_v12 = vld [vmem:[%s5495_s5 + $0x328] ss:$28 sps:$4 sm:$0xff]  }
  0xfd   : > { %2007 = vmatprep.mubr.bf16.mxu1 %v4857_v14  ;;  %v4935_v14 = vld [vmem:[%s5495_s5 + $0x350] ss:$28 sps:$4 sm:$0xff]  }
  0xfe   : > { %2464 = vmatmul.mubr.bf16.gmra.mrb[84].mxu0 %v4856_v13  ;;  %v4933_v13 = vld [vmem:[%s5495_s5 + $0x354] ss:$28 sps:$4 sm:$0xff]  }
  0xff   : > { %2471 = vmatprep.mubr.bf16.mxu0 %v4859_v17  ;;  %v4937_v17 = vld [vmem:[%s5495_s5 + $0x38c] ss:$28 sps:$4 sm:$0xff]  }
 0x104   : > { %2008 = vmatmul.mubr.bf16.gmra.mrb[88].mxu1 %v4861_v19  ;;  %v4940_v19 = vld [vmem:[%s5495_s5 + $0x398] ss:$28 sps:$4 sm:$0xff]  }
 0x105   : > { %2015 = vmatprep.mubr.bf16.mxu1 %v4863_v21  ;;  %v4943_v21 = vld [vmem:[%s5495_s5 + $0x3c0] ss:$28 sps:$4 sm:$0xff]  }
 0x106   : > { %2472 = vmatmul.mubr.bf16.gmra.mrb[88].mxu0 %v4862_v20  ;;  %v4941_v20 = vld [vmem:[%s5495_s5 + $0x3c4] ss:$28 sps:$4 sm:$0xff]  }
 0x107   : > { %2479 = vmatprep.mubr.bf16.mxu0 %v4865_v22  ;;  %v4944_v22 = vld [vmem:[%s5495_s5 + $0x3d0] ss:$28 sps:$4 sm:$0xff]  }
 0x10c   : > { %2016 = vmatmul.mubr.bf16.gmra.mrb[92].mxu1 %v4867_v25  ;;  %v4948_v25 = vld [vmem:[%s5495_s5 + $0x408] ss:$28 sps:$4 sm:$0xff]  }
 0x10d   : > { %2023 = vmatprep.mubr.bf16.mxu1 %v4296_v27  ;;  %v4951_v27 = vld [vmem:[%s5495_s5 + $0x430] ss:$28 sps:$4 sm:$0xff]  }
 0x10e   : > { %2480 = vmatmul.mubr.bf16.gmra.mrb[92].mxu0 %v4868_v26  ;;  %v4949_v26 = vld [vmem:[%s5495_s5 + $0x434] ss:$28 sps:$4 sm:$0xff]  }
 0x10f   : > { %2487 = vmatprep.mubr.bf16.mxu0 %v4300_v28  ;;  %v4952_v28 = vld [vmem:[%s5495_s5 + $0x440] ss:$28 sps:$4 sm:$0xff]  }
 0x114   : > { %2024 = vmatmul.mubr.bf16.gmra.mrb[96].mxu1 %v4295_v29  ;;  %v4953_v29 = vld [vmem:[%s5495_s5 + $0x46c] ss:$28 sps:$4 sm:$0xff]  }
 0x115   : > { %2063 = vmatprep.mubr.bf16.mxu1 %v4875_v30  ;;  %v4956_v30 = vld [vmem:[%s5495_s5 + $0x478] ss:$28 sps:$4 sm:$0xff]  }
 0x116   : > { %2488 = vmatmul.mubr.bf16.gmra.mrb[96].mxu0 %v4299_v3  ;;  %v4955_v3 = vld [vmem:[%s5495_s5 + $0x468] ss:$28 sps:$4 sm:$0xff]  }
 0x117   : > { %4357 = vmatprep.mubr.msk.bf16.mxu0 %vm5128_vm0, %v5126_v15 }
 0x11c   : > { %2064 = vmatmul.mubr.bf16.vlgmr.msra.gmra.mrb[0].mxu1 %v4873_v31  ;;  %v4957_v31 = vld [vmem:[%s5495_s5 + $0x4a4] ss:$28 sps:$4 sm:$0xff]  }
 0x11d   : > { %2071 = vmatprep.mubr.bf16.mxu1 %v4877_v33  ;;  %v4960_v33 = vld [vmem:[%s5495_s5 + $0x4b0] ss:$28 sps:$4 sm:$0xff]  }
 0x11e   : > { %4358 = vmatmul.mubr.msk.bf16.vlgmr.msra.gmra.mrb[0].mxu0 %vm1723_vm1, %v4876_v32  ;;  %v4959_v32 = vld [vmem:[%s5495_s5 + $0x4a0] ss:$28 sps:$4 sm:$0xff]  }
 0x11f   : > { %4361 = vmatprep.mubr.msk.bf16.mxu0 %vm5128_vm0, %v5126_v15 }
 0x124   : > { %2072 = vmatmul.mubr.bf16.gmra.mrb[4].mxu1 %v4879_v34  ;;  %v4961_v34 = vld [vmem:[%s5495_s5 + $0x4dc] ss:$28 sps:$4 sm:$0xff]  }
 0x125   : > { %2079 = vmatprep.mubr.bf16.mxu1 %v4881_v36  ;;  %v4964_v36 = vld [vmem:[%s5495_s5 + $0x4e8] ss:$28 sps:$4 sm:$0xff]  }
 0x126   : > { %4362 = vmatmul.mubr.msk.bf16.gmra.mrb[4].mxu0 %vm1723_vm1, %v4880_v35  ;;  %v4963_v35 = vld [vmem:[%s5495_s5 + $0x4d8] ss:$28 sps:$4 sm:$0xff]  }
 0x127   : > { %4365 = vmatprep.mubr.msk.bf16.mxu0 %vm5128_vm0, %v5126_v15 }
 0x12c   : > { %2080 = vmatmul.mubr.bf16.gmra.mrb[8].mxu1 %v4883_v37  ;;  %v4965_v37 = vld [vmem:[%s5495_s5 + $0x514] ss:$28 sps:$4 sm:$0xff]  }
 0x12d   : > { %2087 = vmatprep.mubr.bf16.mxu1 %v4885_v39  ;;  %v4967_v39 = vld [vmem:[%s5495_s5 + $0x510] ss:$28 sps:$4 sm:$0xff]  }
 0x12e   : > { %4366 = vmatmul.mubr.msk.bf16.gmra.mrb[8].mxu0 %vm1723_vm1, %v4884_v38  ;;  %v856_v38 = vld [vmem:[%s5495_s5 + $0x548] sm:$0xff] }
 0x12f   : > { %4369 = vmatprep.mubr.msk.bf16.mxu0 %vm5128_vm0, %v5126_v15 }
 0x134   : > { %2088 = vmatmul.mubr.bf16.gmra.mrb[12].mxu1 %v4887_v40  ;;  %v4968_v40 = vld [vmem:[%s5495_s5 + $0x520] ss:$28 sps:$4 sm:$0xff]  }
 0x135   : > { %2095 = vmatprep.mubr.bf16.mxu1 %v4889_v42  ;;  %v6118_v42 = vpop.permute.xlu1 %3715 }
 0x136   : > { %4370 = vmatmul.mubr.msk.bf16.gmra.mrb[12].mxu0 %vm1723_vm1, %v4888_v41  ;;  %v4298_v41 = vcombine.high %v856_v38, %v856_v38 }
 0x137   : > { %4373 = vmatprep.mubr.msk.bf16.mxu0 %vm5128_vm0, %v5126_v15 }
 0x13c   : > { %2096 = vmatmul.mubr.bf16.gmra.mrb[16].mxu1 %v4891_v43  ;;  %v6122_v43 = vpop.permute.xlu0 %3710 }
 0x13d   : > { %2103 = vmatprep.mubr.bf16.mxu1 %v4893_v45  ;;  %v4971_v45 = vld [vmem:[%s5495_s5 + $0x558] ss:$0 sps:$4 sm:$0xff]  }
 0x13e   : > { %4374 = vmatmul.mubr.msk.bf16.gmra.mrb[16].mxu0 %vm1723_vm1, %v4892_v44  ;;  %v4297_v44 = vcombine.low %v856_v38, %v856_v38 }
 0x13f   : > { %4377 = vmatprep.mubr.msk.bf16.mxu0 %vm5128_vm0, %v5126_v15 }
 0x144   : > { %2104 = vmatmul.mubr.bf16.gmra.mrb[20].mxu1 %v4895_v46  ;;  %v6125_v46 = vpop.permute.xlu1 %3720 }
 0x145   : > { %2111 = vmatprep.mubr.bf16.mxu1 %v4897_v49 }
 0x146   : > { %4378 = vmatmul.mubr.msk.bf16.gmra.mrb[20].mxu0 %vm1723_vm1, %v4896_v48  ;;  %v6127_v48 = vpop.permute.xlu0 %3725 }
 0x147   : > { %4381 = vmatprep.mubr.msk.bf16.mxu0 %vm5128_vm0, %v5126_v15 }
 0x148   : > { %v6130_v49 = vpop.permute.xlu1 %3730 }
 0x149   : > { %7069 = vst [vmem:[#allocation2_spill] sm:$0xff] %v6130_v49 }
 0x14c   : > { %2112 = vmatmul.mubr.bf16.gmra.mrb[24].mxu1 %v4899_v50  ;;  %v6132_v50 = vpop.permute.xlu0 %3735 }
 0x14d   : > { %2119 = vmatprep.mubr.bf16.mxu1 %v4901_v52  ;;  %7070 = vst [vmem:[#allocation3_spill] sm:$0xff] %v6132_v50 }
 0x14e   : > { %4382 = vmatmul.mubr.msk.bf16.gmra.mrb[24].mxu0 %vm1723_vm1, %v4900_v51  ;;  %v6134_v51 = vpop.permute.xlu1 %3740 }
 0x14f   : > { %4385 = vmatprep.mubr.msk.bf16.mxu0 %vm5128_vm0, %v5126_v15  ;;  %7071 = vst [vmem:[#allocation4_spill] sm:$0xff] %v6134_v51 }
 0x150   : > { %v6136_v52 = vpop.permute.xlu0 %3745 }
 0x151   : > { %7072 = vst [vmem:[#allocation5_spill] sm:$0xff] %v6136_v52 }
 0x154   : > { %2120 = vmatmul.mubr.bf16.gmra.mrb[28].mxu1 %v4903_v53  ;;  %v6140_v53 = vpop.permute.xlu0 %3755 }
 0x155   : > { %2127 = vmatprep.mubr.bf16.mxu1 %v4905_v55 }
 0x156   : > { %4386 = vmatmul.mubr.msk.bf16.gmra.mrb[28].mxu0 %vm1723_vm1, %v4904_v54 }
 0x157   : > { %4389 = vmatprep.mubr.msk.bf16.mxu0 %vm5128_vm0, %v5126_v15 }
 0x15c   : > { %2128 = vmatmul.mubr.bf16.gmra.mrb[32].mxu1 %v4907_v56 }
 0x15d   : > { %2135 = vmatprep.mubr.bf16.mxu1 %v4909_v58 }
 0x15e   : > { %4390 = vmatmul.mubr.msk.bf16.gmra.mrb[32].mxu0 %vm1723_vm1, %v4908_v57 }
 0x15f   : > { %4393 = vmatprep.mubr.msk.bf16.mxu0 %vm5128_vm0, %v5126_v15 }
 0x164   : > { %2136 = vmatmul.mubr.bf16.gmra.mrb[36].mxu1 %v4911_v59 }
 0x165   : > { %2143 = vmatprep.mubr.bf16.mxu1 %v4913_v61 }
 0x166   : > { %4394 = vmatmul.mubr.msk.bf16.gmra.mrb[36].mxu0 %vm1723_vm1, %v4912_v60 }
 0x167   : > { %4397 = vmatprep.mubr.msk.bf16.mxu0 %vm5128_vm0, %v5126_v15 }
 0x16c   : > { %2144 = vmatmul.mubr.bf16.gmra.mrb[40].mxu1 %v4915_v62 }
 0x16d   : > { %2151 = vmatprep.mubr.bf16.mxu1 %v4917_v0 }
 0x16e   : > { %4398 = vmatmul.mubr.msk.bf16.gmra.mrb[40].mxu0 %vm1723_vm1, %v4916_v63 }
 0x16f   : > { %4401 = vmatprep.mubr.msk.bf16.mxu0 %vm5128_vm0, %v5126_v15 }
 0x174   : > { %2152 = vmatmul.mubr.bf16.gmra.mrb[44].mxu1 %v4919_v1 }
 0x175   : > { %2159 = vmatprep.mubr.bf16.mxu1 %v4921_v4 }
 0x176   : > { %4402 = vmatmul.mubr.msk.bf16.gmra.mrb[44].mxu0 %vm1723_vm1, %v4920_v2  ;;  %v6150_v2 = vpop.permute.xlu0 %3765 }
 0x177   : > { %4405 = vmatprep.mubr.msk.bf16.mxu0 %vm5128_vm0, %v5126_v15  ;;  %7075 = vst [vmem:[#allocation8_spill] sm:$0xff] %v6150_v2 }
 0x17c   : > { %2160 = vmatmul.mubr.bf16.gmra.mrb[48].mxu1 %v4923_v5 }
 0x17d   : > { %2167 = vmatprep.mubr.bf16.mxu1 %v4925_v7 }
 0x17e   : > { %4406 = vmatmul.mubr.msk.bf16.gmra.mrb[48].mxu0 %vm1723_vm1, %v4924_v6 }
 0x17f   : > { %4409 = vmatprep.mubr.msk.bf16.mxu0 %vm5128_vm0, %v5126_v15 }
 0x184   : > { %2168 = vmatmul.mubr.bf16.gmra.mrb[52].mxu1 %v4927_v8 }
 0x185   : > { %2175 = vmatprep.mubr.bf16.mxu1 %v4929_v10 }
 0x186   : > { %4410 = vmatmul.mubr.msk.bf16.gmra.mrb[52].mxu0 %vm1723_vm1, %v4928_v9 }
 0x187   : > { %4413 = vmatprep.mubr.msk.bf16.mxu0 %vm5128_vm0, %v5126_v15 }
 0x18c   : > { %2176 = vmatmul.mubr.bf16.gmra.mrb[56].mxu1 %v4931_v11 }
 0x18d   : > { %2183 = vmatprep.mubr.bf16.mxu1 %v4933_v13 }
 0x18e   : > { %4414 = vmatmul.mubr.msk.bf16.gmra.mrb[56].mxu0 %vm1723_vm1, %v4932_v12 }
 0x18f   : > { %4417 = vmatprep.mubr.msk.bf16.mxu0 %vm5128_vm0, %v5126_v15 }
 0x194   : > { %2184 = vmatmul.mubr.bf16.gmra.mrb[60].mxu1 %v4935_v14 }
 0x195   : > { %2191 = vmatprep.mubr.bf16.mxu1 %v4937_v17 }
 0x196   : > { %4418 = vmatmul.mubr.msk.bf16.gmra.mrb[60].mxu0 %vm1723_vm1, %v4936_v16 }
 0x197   : > { %4421 = vmatprep.mubr.msk.bf16.mxu0 %vm5128_vm0, %v5126_v15 }
 0x19c   : > { %2192 = vmatmul.mubr.bf16.gmra.mrb[64].mxu1 %v4939_v18  ;;  %v6162_v18 = vpop.permute.xlu0 %3775 }
 0x19d   : > { %2199 = vmatprep.mubr.bf16.mxu1 %v4941_v20  ;;  %7077 = vst [vmem:[#allocation10_spill] sm:$0xff] %v6162_v18 }
 0x19e   : > { %4422 = vmatmul.mubr.msk.bf16.gmra.mrb[64].mxu0 %vm1723_vm1, %v4940_v19 }
 0x19f   : > { %4425 = vmatprep.mubr.msk.bf16.mxu0 %vm5128_vm0, %v5126_v15 }
 0x1a4   : > { %2200 = vmatmul.mubr.bf16.gmra.mrb[68].mxu1 %v4943_v21 }
 0x1a5   : > { %2207 = vmatprep.mubr.bf16.mxu1 %v4945_v23 }
 0x1a6   : > { %4426 = vmatmul.mubr.msk.bf16.gmra.mrb[68].mxu0 %vm1723_vm1, %v4944_v22 }
 0x1a7   : > { %4429 = vmatprep.mubr.msk.bf16.mxu0 %vm5128_vm0, %v5126_v15 }
 0x1ac   : > { %2208 = vmatmul.mubr.bf16.gmra.mrb[72].mxu1 %v4947_v24 }
 0x1ad   : > { %2215 = vmatprep.mubr.bf16.mxu1 %v4949_v26 }
 0x1ae   : > { %4430 = vmatmul.mubr.msk.bf16.gmra.mrb[72].mxu0 %vm1723_vm1, %v4948_v25 }
 0x1af   : > { %4433 = vmatprep.mubr.msk.bf16.mxu0 %vm5128_vm0, %v5126_v15 }
 0x1b4   : > { %2216 = vmatmul.mubr.bf16.gmra.mrb[76].mxu1 %v4951_v27 }
 0x1b5   : > { %2223 = vmatprep.mubr.bf16.mxu1 %v4953_v29 }
 0x1b6   : > { %4434 = vmatmul.mubr.msk.bf16.gmra.mrb[76].mxu0 %vm1723_vm1, %v4952_v28 }
 0x1b7   : > { %4437 = vmatprep.mubr.msk.bf16.mxu0 %vm5128_vm0, %v5126_v15 }
 0x1bc   : > { %2224 = vmatmul.mubr.bf16.gmra.mrb[80].mxu1 %v4955_v3 }
 0x1bd   : > { %2231 = vmatprep.mubr.bf16.mxu1 %v4957_v31 }
 0x1be   : > { %4438 = vmatmul.mubr.msk.bf16.gmra.mrb[80].mxu0 %vm1723_vm1, %v4956_v30 }
 0x1bf   : > { %4441 = vmatprep.mubr.msk.bf16.mxu0 %vm5128_vm0, %v5126_v15 }
 0x1c4   : > { %2232 = vmatmul.mubr.bf16.gmra.mrb[84].mxu1 %v4959_v32  ;;  %v6176_v32 = vpop.permute.xlu0 %3785 }
 0x1c5   : > { %2239 = vmatprep.mubr.bf16.mxu1 %v4961_v34  ;;  %7079 = vst [vmem:[#allocation12_spill] sm:$0xff] %v6176_v32 }
 0x1c6   : > { %4442 = vmatmul.mubr.msk.bf16.gmra.mrb[84].mxu0 %vm1723_vm1, %v4960_v33 }
 0x1c7   : > { %4445 = vmatprep.mubr.msk.bf16.mxu0 %vm5128_vm0, %v5126_v15 }
 0x1cc   : > { %2240 = vmatmul.mubr.bf16.gmra.mrb[88].mxu1 %v4963_v35 }
 0x1cd   : > { %2247 = vmatprep.mubr.bf16.mxu1 %v4965_v37 }
 0x1ce   : > { %4446 = vmatmul.mubr.msk.bf16.gmra.mrb[88].mxu0 %vm1723_vm1, %v4964_v36 }
 0x1cf   : > { %4449 = vmatprep.mubr.msk.bf16.mxu0 %vm5128_vm0, %v5126_v15 }
 0x1d4   : > { %2248 = vmatmul.mubr.bf16.gmra.mrb[92].mxu1 %v4967_v39 }
 0x1d5   : > { %2255 = vmatprep.mubr.bf16.mxu1 %v4298_v41 }
 0x1d6   : > { %4450 = vmatmul.mubr.msk.bf16.gmra.mrb[92].mxu0 %vm1723_vm1, %v4968_v40 }
 0x1d7   : > { %4453 = vmatprep.mubr.msk.bf16.mxu0 %vm5128_vm0, %v5126_v15  ;;  %v6138_v15 = vpop.permute.xlu1 %3750 }
 0x1d8   : > { %7073 = vst [vmem:[#allocation6_spill] sm:$0xff] %v6138_v15 }
 0x1db   : > { %v6148_v1 = vpop.permute.xlu1 %3760 }
 0x1dc   : > { %2256 = vmatmul.mubr.bf16.gmra.mrb[96].mxu1 %v4297_v44  ;;  %7074 = vst [vmem:[#allocation7_spill] sm:$0xff] %v6148_v1 }
 0x1de   : > { %4454 = vmatmul.mubr.msk.bf16.gmra.mrb[96].mxu0 %vm1723_vm1, %v4971_v45 }
 0x1df   : > { %v6160_v17 = vpop.permute.xlu1 %3770 }
 0x1e0   : > { %7076 = vst [vmem:[#allocation9_spill] sm:$0xff] %v6160_v17 }
 0x1e3   : > { %v6174_v31 = vpop.permute.xlu1 %3780 }
 0x1e4   : > { %7078 = vst [vmem:[#allocation11_spill] sm:$0xff] %v6174_v31 }
 0x1ef   : > { %v2065_v54 = vpop.f32.mrb[0].mxu1 }
 0x1f0   : > { %v2067_v56 = vpop.f32.mrb[1].mxu1 }
 0x1f1   : > { %v2529_v55 = vpop.f32.mrb[0].mxu0  ;;  %v2068_v59 = vpop.f32.mrb[2].mxu1 }
 0x1f2   : > { %v6142_v57 = vadd.f32 %v2529_v55, %v2065_v54  ;;  %v4359_v58 = vpop.f32.mrb[1].mxu0  ;;  %v2070_v61 = vpop.f32.mrb[3].mxu1 }
 0x1f3   : > { %v2532_v60 = vpop.f32.mrb[2].mxu0  ;;  %v6186_v55 = vpop.permute.xlu1 %3790 }
 0x1f4   : > { %v6144_v62 = vadd.f32 %v2532_v60, %v2068_v59  ;;  %v4360_v63 = vpop.f32.mrb[3].mxu0  ;;  %v2728_v0 = vsel %vm2727_vm2, %v6142_v57, 0.0  ;;  %7080 = vst [vmem:[#allocation13_spill] sm:$0xff] %v6186_v55  ;;  %v6188_v56 = vpop.permute.xlu0 %3795 }
 0x1f5   : > { %2729 = vadd.xlane.f32.xlu0 %v2728_v0  ;;  %7081 = vst [vmem:[#allocation14_spill] sm:$0xff] %v6188_v56 }
 0x1f6   : > { %v2731_v4 = vsel %vm2727_vm2, %v6144_v62, 0.0 }
 0x1f7   : > { %v2073_v5 = vpop.f32.mrb[4].mxu1 }
 0x1f8   : > { %v2075_v7 = vpop.f32.mrb[5].mxu1 }
 0x1f9   : > { %v2537_v6 = vpop.f32.mrb[4].mxu0  ;;  %2732 = vadd.xlane.f32.xlu0 %v2731_v4  ;;  %v2076_v10 = vpop.f32.mrb[6].mxu1 }
 0x1fa   : > { %v6154_v8 = vadd.f32 %v2537_v6, %v2073_v5  ;;  %v4363_v9 = vpop.f32.mrb[5].mxu0  ;;  %v2078_v12 = vpop.f32.mrb[7].mxu1 }
 0x1fb   : > { %v2540_v11 = vpop.f32.mrb[6].mxu0  ;;  %v6200_v12 = vpop.permute.xlu0 %3805 }
 0x1fc   : > { %v6156_v13 = vadd.f32 %v2540_v11, %v2076_v10  ;;  %v4364_v14 = vpop.f32.mrb[7].mxu0  ;;  %v2734_v16 = vsel %vm2727_vm2, %v6154_v8, 0.0  ;;  %v6198_v11 = vpop.permute.xlu1 %3800  ;;  %7083 = vst [vmem:[#allocation16_spill] sm:$0xff] %v6200_v12 }
 0x1fd   : > { %2735 = vadd.xlane.f32.xlu1 %v2734_v16  ;;  %7082 = vst [vmem:[#allocation15_spill] sm:$0xff] %v6198_v11 }
 0x1fe   : > { %v2737_v19 = vsel %vm2727_vm2, %v6156_v13, 0.0 }
 0x1ff   : > { %v2081_v20 = vpop.f32.mrb[8].mxu1 }
 0x200   : > { %v2083_v22 = vpop.f32.mrb[9].mxu1 }
 0x201   : > { %v2545_v21 = vpop.f32.mrb[8].mxu0  ;;  %2738 = vadd.xlane.f32.xlu1 %v2737_v19  ;;  %v2084_v25 = vpop.f32.mrb[10].mxu1 }
 0x202   : > { %v6166_v23 = vadd.f32 %v2545_v21, %v2081_v20  ;;  %v4367_v24 = vpop.f32.mrb[9].mxu0  ;;  %v2086_v27 = vpop.f32.mrb[11].mxu1 }
 0x203   : > { %v2548_v26 = vpop.f32.mrb[10].mxu0 }
 0x204   : > { %v6168_v28 = vadd.f32 %v2548_v26, %v2084_v25  ;;  %v4368_v29 = vpop.f32.mrb[11].mxu0  ;;  %v2740_v3 = vsel %vm2727_vm2, %v6166_v23, 0.0 }
 0x205   : > { %2741 = vadd.xlane.f32.xlu0 %v2740_v3 }
 0x206   : > { %v2743_v30 = vsel %vm2727_vm2, %v6168_v28, 0.0 }
 0x207   : > { %2744 = vadd.xlane.f32.xlu1 %v2743_v30  ;;  %v2089_v33 = vpop.f32.mrb[12].mxu1  ;;  %v6210_v30 = vpop.permute.xlu1 %3810 }
 0x208   : > { %v2091_v35 = vpop.f32.mrb[13].mxu1  ;;  %7084 = vst [vmem:[#allocation17_spill] sm:$0xff] %v6210_v30 }
 0x209   : > { %v2553_v34 = vpop.f32.mrb[12].mxu0  ;;  %v2092_v38 = vpop.f32.mrb[14].mxu1 }
 0x20a   : > { %v6178_v36 = vadd.f32 %v2553_v34, %v2089_v33  ;;  %v4371_v37 = vpop.f32.mrb[13].mxu0  ;;  %v2094_v40 = vpop.f32.mrb[15].mxu1 }
 0x20b   : > { %v2556_v39 = vpop.f32.mrb[14].mxu0  ;;  %v6212_v33 = vpop.permute.xlu0 %3815 }
 0x20c   : > { %v6180_v41 = vadd.f32 %v2556_v39, %v2092_v38  ;;  %v4372_v44 = vpop.f32.mrb[15].mxu0  ;;  %v2746_v45 = vsel %vm2727_vm2, %v6178_v36, 0.0  ;;  %7085 = vst [vmem:[#allocation18_spill] sm:$0xff] %v6212_v33 }
 0x20d   : > { %2747 = vadd.xlane.f32.xlu0 %v2746_v45 }
 0x20e   : > { %v2749_v54 = vsel %vm2727_vm2, %v6180_v41, 0.0 }
 0x20f   : > { %2750 = vadd.xlane.f32.xlu1 %v2749_v54  ;;  %v2097_v58 = vpop.f32.mrb[16].mxu1 }
 0x210   : > { %v2099_v60 = vpop.f32.mrb[17].mxu1 }
 0x211   : > { %v2561_v59 = vpop.f32.mrb[16].mxu0  ;;  %v2100_v0 = vpop.f32.mrb[18].mxu1 }
 0x212   : > { %v6190_v61 = vadd.f32 %v2561_v59, %v2097_v58  ;;  %v4375_v63 = vpop.f32.mrb[17].mxu0  ;;  %v2102_v5 = vpop.f32.mrb[19].mxu1 }
 0x213   : > { %v2564_v4 = vpop.f32.mrb[18].mxu0  ;;  %v6222_v63 = vpop.permute.xlu1 %3820 }
 0x214   : > { %v6192_v6 = vadd.f32 %v2564_v4, %v2100_v0  ;;  %v4376_v7 = vpop.f32.mrb[19].mxu0  ;;  %v2752_v9 = vsel %vm2727_vm2, %v6190_v61, 0.0  ;;  %7086 = vst [vmem:[#allocation19_spill] sm:$0xff] %v6222_v63  ;;  %v6224_v0 = vpop.permute.xlu0 %3825 }
 0x215   : > { %2753 = vadd.xlane.f32.xlu0 %v2752_v9  ;;  %7087 = vst [vmem:[#allocation20_spill] sm:$0xff] %v6224_v0 }
 0x216   : > { %v2755_v10 = vsel %vm2727_vm2, %v6192_v6, 0.0 }
 0x217   : > { %2756 = vadd.xlane.f32.xlu1 %v2755_v10  ;;  %v2105_v14 = vpop.f32.mrb[20].mxu1 }
 0x218   : > { %v2107_v19 = vpop.f32.mrb[21].mxu1 }
 0x219   : > { %v2569_v16 = vpop.f32.mrb[20].mxu0  ;;  %v2108_v22 = vpop.f32.mrb[22].mxu1 }
 0x21a   : > { %v6202_v20 = vadd.f32 %v2569_v16, %v2105_v14  ;;  %v4379_v21 = vpop.f32.mrb[21].mxu0  ;;  %v2110_v25 = vpop.f32.mrb[23].mxu1 }
 0x21b   : > { %v2572_v24 = vpop.f32.mrb[22].mxu0 }
 0x21c   : > { %v6204_v26 = vadd.f32 %v2572_v24, %v2108_v22  ;;  %v4380_v27 = vpop.f32.mrb[23].mxu0  ;;  %v2758_v29 = vsel %vm2727_vm2, %v6202_v20, 0.0 }
 0x21d   : > { %2759 = vadd.xlane.f32.xlu0 %v2758_v29  ;;  %v6234_v27 = vpop.permute.xlu1 %3830  ;;  %v6236_v29 = vpop.permute.xlu0 %3835 }
 0x21e   : > { %v2761_v3 = vsel %vm2727_vm2, %v6204_v26, 0.0  ;;  %7088 = vst [vmem:[#allocation21_spill] sm:$0xff] %v6234_v27  ;;  %7089 = vst [vmem:[#allocation22_spill] sm:$0xff] %v6236_v29 }
 0x21f   : > { %2762 = vadd.xlane.f32.xlu1 %v2761_v3  ;;  %v2113_v34 = vpop.f32.mrb[24].mxu1 }
 0x220   : > { %v2115_v37 = vpop.f32.mrb[25].mxu1 }
 0x221   : > { %v2577_v35 = vpop.f32.mrb[24].mxu0  ;;  %v2116_v40 = vpop.f32.mrb[26].mxu1 }
 0x222   : > { %v6214_v38 = vadd.f32 %v2577_v35, %v2113_v34  ;;  %v4383_v39 = vpop.f32.mrb[25].mxu0  ;;  %v2118_v45 = vpop.f32.mrb[27].mxu1 }
 0x223   : > { %v2580_v44 = vpop.f32.mrb[26].mxu0 }
 0x224   : > { %v6216_v54 = vadd.f32 %v2580_v44, %v2116_v40  ;;  %v4384_v58 = vpop.f32.mrb[27].mxu0  ;;  %v2764_v59 = vsel %vm2727_vm2, %v6214_v38, 0.0 }
 0x225   : > { %2765 = vadd.xlane.f32.xlu0 %v2764_v59 }
 0x226   : > { %v2767_v60 = vsel %vm2727_vm2, %v6216_v54, 0.0 }
 0x227   : > { %2768 = vadd.xlane.f32.xlu1 %v2767_v60  ;;  %v2121_v4 = vpop.f32.mrb[28].mxu1 }
 0x228   : > { %v2123_v7 = vpop.f32.mrb[29].mxu1 }
 0x229   : > { %v2585_v5 = vpop.f32.mrb[28].mxu0  ;;  %v2124_v14 = vpop.f32.mrb[30].mxu1 }
 0x22a   : > { %v6226_v9 = vadd.f32 %v2585_v5, %v2121_v4  ;;  %v4387_v10 = vpop.f32.mrb[29].mxu0  ;;  %v2126_v19 = vpop.f32.mrb[31].mxu1 }
 0x22b   : > { %v2588_v16 = vpop.f32.mrb[30].mxu0  ;;  %v6246_v5 = vpop.permute.xlu1 %3840 }
 0x22c   : > { %v6228_v21 = vadd.f32 %v2588_v16, %v2124_v14  ;;  %v4388_v22 = vpop.f32.mrb[31].mxu0  ;;  %v2770_v24 = vsel %vm2727_vm2, %v6226_v9, 0.0  ;;  %7090 = vst [vmem:[#allocation23_spill] sm:$0xff] %v6246_v5  ;;  %v6248_v7 = vpop.permute.xlu0 %3845 }
 0x22d   : > { %2771 = vadd.xlane.f32.xlu0 %v2770_v24  ;;  %7091 = vst [vmem:[#allocation24_spill] sm:$0xff] %v6248_v7 }
 0x22e   : > { %v2773_v25 = vsel %vm2727_vm2, %v6228_v21, 0.0 }
 0x22f   : > { %2774 = vadd.xlane.f32.xlu1 %v2773_v25  ;;  %v2129_v3 = vpop.f32.mrb[32].mxu1 }
 0x230   : > { %v2131_v35 = vpop.f32.mrb[33].mxu1 }
 0x231   : > { %v2593_v34 = vpop.f32.mrb[32].mxu0  ;;  %v2132_v40 = vpop.f32.mrb[34].mxu1 }
 0x232   : > { %v6238_v37 = vadd.f32 %v2593_v34, %v2129_v3  ;;  %v4391_v39 = vpop.f32.mrb[33].mxu0  ;;  %v2134_v45 = vpop.f32.mrb[35].mxu1 }
 0x233   : > { %v2596_v44 = vpop.f32.mrb[34].mxu0  ;;  %v6260_v45 = vpop.permute.xlu0 %3855 }
 0x234   : > { %v6240_v58 = vadd.f32 %v2596_v44, %v2132_v40  ;;  %v4392_v59 = vpop.f32.mrb[35].mxu0  ;;  %v2776_v60 = vsel %vm2727_vm2, %v6238_v37, 0.0  ;;  %v6258_v44 = vpop.permute.xlu1 %3850  ;;  %7093 = vst [vmem:[#allocation26_spill] sm:$0xff] %v6260_v45 }
 0x235   : > { %2777 = vadd.xlane.f32.xlu0 %v2776_v60  ;;  %7092 = vst [vmem:[#allocation25_spill] sm:$0xff] %v6258_v44 }
 0x236   : > { %v2779_v4 = vsel %vm2727_vm2, %v6240_v58, 0.0 }
 0x237   : > { %2780 = vadd.xlane.f32.xlu1 %v2779_v4  ;;  %v2137_v10 = vpop.f32.mrb[36].mxu1 }
 0x238   : > { %v2139_v16 = vpop.f32.mrb[37].mxu1 }
 0x239   : > { %v2601_v14 = vpop.f32.mrb[36].mxu0  ;;  %v2140_v24 = vpop.f32.mrb[38].mxu1 }
 0x23a   : > { %v6250_v19 = vadd.f32 %v2601_v14, %v2137_v10  ;;  %v4395_v22 = vpop.f32.mrb[37].mxu0  ;;  %v2142_v3 = vpop.f32.mrb[39].mxu1 }
 0x23b   : > { %v2604_v25 = vpop.f32.mrb[38].mxu0 }
 0x23c   : > { %v6252_v34 = vadd.f32 %v2604_v25, %v2140_v24  ;;  %v4396_v35 = vpop.f32.mrb[39].mxu0  ;;  %v2782_v39 = vsel %vm2727_vm2, %v6250_v19, 0.0 }
 0x23d   : > { %2783 = vadd.xlane.f32.xlu0 %v2782_v39 }
 0x23e   : > { %v2785_v40 = vsel %vm2727_vm2, %v6252_v34, 0.0 }
 0x23f   : > { %2786 = vadd.xlane.f32.xlu1 %v2785_v40  ;;  %v2145_v59 = vpop.f32.mrb[40].mxu1  ;;  %v6270_v40 = vpop.permute.xlu1 %3860 }
 0x240   : > { %v2147_v4 = vpop.f32.mrb[41].mxu1  ;;  %7094 = vst [vmem:[#allocation27_spill] sm:$0xff] %v6270_v40 }
 0x241   : > { %v2609_v60 = vpop.f32.mrb[40].mxu0  ;;  %v2148_v16 = vpop.f32.mrb[42].mxu1 }
 0x242   : > { %v6262_v10 = vadd.f32 %v2609_v60, %v2145_v59  ;;  %v4399_v14 = vpop.f32.mrb[41].mxu0  ;;  %v2150_v24 = vpop.f32.mrb[43].mxu1 }
 0x243   : > { %v2612_v22 = vpop.f32.mrb[42].mxu0  ;;  %v6272_v4 = vpop.permute.xlu0 %3865 }
 0x244   : > { %v6264_v25 = vadd.f32 %v2612_v22, %v2148_v16  ;;  %v4400_v3 = vpop.f32.mrb[43].mxu0  ;;  %v2788_v35 = vsel %vm2727_vm2, %v6262_v10, 0.0  ;;  %7095 = vst [vmem:[#allocation28_spill] sm:$0xff] %v6272_v4  ;;  %v6282_v40 = vpop.permute.xlu1 %3870 }
 0x245   : > { %2789 = vadd.xlane.f32.xlu0 %v2788_v35  ;;  %7096 = vst [vmem:[#allocation29_spill] sm:$0xff] %v6282_v40 }
 0x246   : > { %v2791_v39 = vsel %vm2727_vm2, %v6264_v25, 0.0 }
 0x247   : > { %2792 = vadd.xlane.f32.xlu1 %v2791_v39  ;;  %v2153_v59 = vpop.f32.mrb[44].mxu1 }
 0x248   : > { %v2155_v14 = vpop.f32.mrb[45].mxu1  ;;  %v6294_v40 = vpop.permute.xlu1 %3880 }
 0x249   : > { %v2617_v60 = vpop.f32.mrb[44].mxu0  ;;  %v2156_v22 = vpop.f32.mrb[46].mxu1  ;;  %7098 = vst [vmem:[#allocation31_spill] sm:$0xff] %v6294_v40 }
 0x24a   : > { %v6274_v47 = vadd.f32 %v2617_v60, %v2153_v59  ;;  %v4403_v16 = vpop.f32.mrb[45].mxu0  ;;  %v2158_v3 = vpop.f32.mrb[47].mxu1 }
 0x24b   : > { %v2620_v24 = vpop.f32.mrb[46].mxu0  ;;  %v6284_v14 = vpop.permute.xlu0 %3875 }
 0x24c   : > { %v6276_v44 = vadd.f32 %v2620_v24, %v2156_v22  ;;  %v4404_v35 = vpop.f32.mrb[47].mxu0  ;;  %v2794_v5 = vsel %vm2727_vm2, %v6274_v47, 0.0  ;;  %7097 = vst [vmem:[#allocation30_spill] sm:$0xff] %v6284_v14  ;;  %v6306_v40 = vpop.permute.xlu1 %3890 }
 0x24d   : > { %2795 = vadd.xlane.f32.xlu0 %v2794_v5  ;;  %7100 = vst [vmem:[#allocation33_spill] sm:$0xff] %v6306_v40 }
 0x24e   : > { %v2797_v39 = vsel %vm2727_vm2, %v6276_v44, 0.0 }
 0x24f   : > { %2798 = vadd.xlane.f32.xlu1 %v2797_v39  ;;  %v2161_v59 = vpop.f32.mrb[48].mxu1 }
 0x250   : > { %v2163_v16 = vpop.f32.mrb[49].mxu1  ;;  %v6318_v40 = vpop.permute.xlu1 %3900 }
 0x251   : > { %v2625_v60 = vpop.f32.mrb[48].mxu0  ;;  %v2164_v24 = vpop.f32.mrb[50].mxu1  ;;  %7102 = vst [vmem:[#allocation35_spill] sm:$0xff] %v6318_v40 }
 0x252   : > { %v6286_v27 = vadd.f32 %v2625_v60, %v2161_v59  ;;  %v4407_v22 = vpop.f32.mrb[49].mxu0  ;;  %v2166_v35 = vpop.f32.mrb[51].mxu1 }
 0x253   : > { %v2628_v3 = vpop.f32.mrb[50].mxu0  ;;  %v6296_v16 = vpop.permute.xlu0 %3885 }
 0x254   : > { %v6288_v63 = vadd.f32 %v2628_v3, %v2164_v24  ;;  %v4408_v5 = vpop.f32.mrb[51].mxu0  ;;  %v2800_v30 = vsel %vm2727_vm2, %v6286_v27, 0.0  ;;  %7099 = vst [vmem:[#allocation32_spill] sm:$0xff] %v6296_v16  ;;  %v6330_v40 = vpop.permute.xlu1 %3910 }
 0x255   : > { %2801 = vadd.xlane.f32.xlu0 %v2800_v30  ;;  %7104 = vst [vmem:[#allocation37_spill] sm:$0xff] %v6330_v40 }
 0x256   : > { %v2803_v39 = vsel %vm2727_vm2, %v6288_v63, 0.0 }
 0x257   : > { %2804 = vadd.xlane.f32.xlu1 %v2803_v39  ;;  %v2169_v59 = vpop.f32.mrb[52].mxu1 }
 0x258   : > { %v2171_v22 = vpop.f32.mrb[53].mxu1  ;;  %v6342_v40 = vpop.permute.xlu1 %3920 }
 0x259   : > { %v2633_v60 = vpop.f32.mrb[52].mxu0  ;;  %v2172_v3 = vpop.f32.mrb[54].mxu1  ;;  %7106 = vst [vmem:[#allocation39_spill] sm:$0xff] %v6342_v40 }
 0x25a   : > { %v6298_v11 = vadd.f32 %v2633_v60, %v2169_v59  ;;  %v4411_v24 = vpop.f32.mrb[53].mxu0  ;;  %v2174_v5 = vpop.f32.mrb[55].mxu1 }
 0x25b   : > { %v2636_v35 = vpop.f32.mrb[54].mxu0  ;;  %v6308_v22 = vpop.permute.xlu0 %3895 }
 0x25c   : > { %v6300_v55 = vadd.f32 %v2636_v35, %v2172_v3  ;;  %v4412_v30 = vpop.f32.mrb[55].mxu0  ;;  %v2806_v31 = vsel %vm2727_vm2, %v6298_v11, 0.0  ;;  %7101 = vst [vmem:[#allocation34_spill] sm:$0xff] %v6308_v22 }
 0x25d   : > { %2807 = vadd.xlane.f32.xlu0 %v2806_v31 }
 0x25e   : > { %v2809_v39 = vsel %vm2727_vm2, %v6300_v55, 0.0 }
 0x25f   : > { %2810 = vadd.xlane.f32.xlu1 %v2809_v39  ;;  %v2177_v59 = vpop.f32.mrb[56].mxu1 }
 0x260   : > { %v2179_v24 = vpop.f32.mrb[57].mxu1 }
 0x261   : > { %v2641_v60 = vpop.f32.mrb[56].mxu0  ;;  %v2180_v35 = vpop.f32.mrb[58].mxu1 }
 0x262   : > { %v6310_v17 = vadd.f32 %v2641_v60, %v2177_v59  ;;  %v4415_v3 = vpop.f32.mrb[57].mxu0  ;;  %v2182_v30 = vpop.f32.mrb[59].mxu1 }
 0x263   : > { %v2644_v5 = vpop.f32.mrb[58].mxu0  ;;  %v6320_v24 = vpop.permute.xlu0 %3905 }
 0x264   : > { %v6312_v1 = vadd.f32 %v2644_v5, %v2180_v35  ;;  %v4416_v31 = vpop.f32.mrb[59].mxu0  ;;  %v2812_v15 = vsel %vm2727_vm2, %v6310_v17, 0.0  ;;  %7103 = vst [vmem:[#allocation36_spill] sm:$0xff] %v6320_v24 }
 0x265   : > { %2813 = vadd.xlane.f32.xlu0 %v2812_v15 }
 0x266   : > { %v2815_v39 = vsel %vm2727_vm2, %v6312_v1, 0.0 }
 0x267   : > { %2816 = vadd.xlane.f32.xlu1 %v2815_v39  ;;  %v2185_v59 = vpop.f32.mrb[60].mxu1 }
 0x268   : > { %v2187_v3 = vpop.f32.mrb[61].mxu1 }
 0x269   : > { %v2649_v60 = vpop.f32.mrb[60].mxu0  ;;  %v2188_v5 = vpop.f32.mrb[62].mxu1 }
 0x26a   : > { %v6322_v52 = vadd.f32 %v2649_v60, %v2185_v59  ;;  %v4419_v35 = vpop.f32.mrb[61].mxu0  ;;  %v2190_v31 = vpop.f32.mrb[63].mxu1 }
 0x26b   : > { %v2652_v30 = vpop.f32.mrb[62].mxu0  ;;  %v6332_v3 = vpop.permute.xlu0 %3915 }
 0x26c   : > { %v6324_v22 = vadd.f32 %v2652_v30, %v2188_v5  ;;  %v4420_v15 = vpop.f32.mrb[63].mxu0  ;;  %v2818_v51 = vsel %vm2727_vm2, %v6322_v52, 0.0  ;;  %7105 = vst [vmem:[#allocation38_spill] sm:$0xff] %v6332_v3 }
 0x26d   : > { %2819 = vadd.xlane.f32.xlu0 %v2818_v51 }
 0x26e   : > { %v2821_v39 = vsel %vm2727_vm2, %v6324_v22, 0.0 }
 0x26f   : > { %2822 = vadd.xlane.f32.xlu1 %v2821_v39  ;;  %v2193_v59 = vpop.f32.mrb[64].mxu1 }
 0x270   : > { %v2195_v35 = vpop.f32.mrb[65].mxu1 }
 0x271   : > { %v2657_v60 = vpop.f32.mrb[64].mxu0  ;;  %v2196_v30 = vpop.f32.mrb[66].mxu1 }
 0x272   : > { %v6334_v24 = vadd.f32 %v2657_v60, %v2193_v59  ;;  %v4423_v5 = vpop.f32.mrb[65].mxu0  ;;  %v2198_v15 = vpop.f32.mrb[67].mxu1 }
 0x273   : > { %v2660_v31 = vpop.f32.mrb[66].mxu0  ;;  %v6344_v35 = vpop.permute.xlu0 %3925 }
 0x274   : > { %v6336_v16 = vadd.f32 %v2660_v31, %v2196_v30  ;;  %v4424_v51 = vpop.f32.mrb[67].mxu0  ;;  %v2824_v50 = vsel %vm2727_vm2, %v6334_v24, 0.0  ;;  %7107 = vst [vmem:[#allocation40_spill] sm:$0xff] %v6344_v35 }
 0x275   : > { %2825 = vadd.xlane.f32.xlu0 %v2824_v50 }
 0x276   : > { %v2827_v39 = vsel %vm2727_vm2, %v6336_v16, 0.0 }
 0x277   : > { %2828 = vadd.xlane.f32.xlu1 %v2827_v39  ;;  %v2201_v59 = vpop.f32.mrb[68].mxu1  ;;  %v6352_v40 = vpop.permute.xlu0 %3935 }
 0x278   : > { %v2203_v5 = vpop.f32.mrb[69].mxu1  ;;  %7108 = vst [vmem:[#allocation41_spill] sm:$0xff] %v6352_v40 }
 0x279   : > { %v2665_v60 = vpop.f32.mrb[68].mxu0  ;;  %v2204_v31 = vpop.f32.mrb[70].mxu1 }
 0x27a   : > { %v6346_v3 = vadd.f32 %v2665_v60, %v2201_v59  ;;  %v4427_v30 = vpop.f32.mrb[69].mxu0  ;;  %v2206_v51 = vpop.f32.mrb[71].mxu1 }
 0x27b   : > { %v2668_v15 = vpop.f32.mrb[70].mxu0  ;;  %v6356_v5 = vpop.permute.xlu1 %3930 }
 0x27c   : > { %v6348_v14 = vadd.f32 %v2668_v15, %v2204_v31  ;;  %v4428_v50 = vpop.f32.mrb[71].mxu0  ;;  %v2830_v4 = vsel %vm2727_vm2, %v6346_v3, 0.0  ;;  %7109 = vst [vmem:[#allocation42_spill] sm:$0xff] %v6356_v5 }
 0x27d   : > { %2831 = vadd.xlane.f32.xlu0 %v2830_v4 }
 0x27e   : > { %v2833_v39 = vsel %vm2727_vm2, %v6348_v14, 0.0 }
 0x27f   : > { %2834 = vadd.xlane.f32.xlu1 %v2833_v39  ;;  %v2209_v59 = vpop.f32.mrb[72].mxu1  ;;  %v6367_v5 = vpop.permute.xlu1 %3940 }
 0x280   : > { %v2211_v30 = vpop.f32.mrb[73].mxu1  ;;  %7110 = vst [vmem:[#allocation43_spill] sm:$0xff] %v6367_v5 }
 0x281   : > { %v2673_v60 = vpop.f32.mrb[72].mxu0  ;;  %v2212_v50 = vpop.f32.mrb[74].mxu1 }
 0x282   : > { %v6358_v35 = vadd.f32 %v2673_v60, %v2209_v59  ;;  %v4431_v31 = vpop.f32.mrb[73].mxu0  ;;  %v2730_v15 = vpop.xlane.xlu0 %2729 }
 0x283   : > { %v2875_v51 = vmul.f32 0.020408163, %v2730_v15  ;;  %v2676_v45 = vpop.f32.mrb[74].mxu0  ;;  %v2214_v4 = vpop.f32.mrb[75].mxu1 }
 0x284   : > { %v6360_v7 = vadd.f32 %v2676_v45, %v2212_v50  ;;  %v4432_v40 = vpop.f32.mrb[75].mxu0  ;;  %v2836_v29 = vsel %vm2727_vm2, %v6358_v35, 0.0 }
 0x285   : > { %v6365_v39 = vsub.f32 %v6142_v57, %v2875_v51  ;;  %2837 = vadd.xlane.f32.xlu0 %v2836_v29 }
 0x286   : > { %v2733_v59 = vpop.xlane.xlu0 %2732  ;;  %v2839_v60 = vsel %vm2727_vm2, %v6360_v7, 0.0 }
 0x287   : > { %v2876_v30 = vmul.f32 0.020408163, %v2733_v59  ;;  %2840 = vadd.xlane.f32.xlu1 %v2839_v60  ;;  %v2973_v45 = vmul.f32 %v6365_v39, %v6365_v39  ;;  %v2217_v31 = vpop.f32.mrb[76].mxu1 }
 0x288   : > { %v2219_v50 = vpop.f32.mrb[77].mxu1 }
 0x289   : > { %v6374_v40 = vsub.f32 %v6144_v62, %v2876_v30  ;;  %v2681_v15 = vpop.f32.mrb[76].mxu0  ;;  %v3022_v57 = vsel %vm2727_vm2, %v2973_v45, 0.0  ;;  %v2220_v59 = vpop.f32.mrb[78].mxu1 }
 0x28a   : > { %v6377_v29 = vadd.f32 %v2681_v15, %v2217_v31  ;;  %v4435_v51 = vpop.f32.mrb[77].mxu0  ;;  %v2736_v4 = vpop.xlane.xlu1 %2735 }
 0x28b   : > { %v2877_v5 = vmul.f32 0.020408163, %v2736_v4  ;;  %v2684_v0 = vpop.f32.mrb[78].mxu0  ;;  %3023 = vadd.xlane.f32.xlu1 %v3022_v57  ;;  %v2974_v60 = vmul.f32 %v6374_v40, %v6374_v40  ;;  %v2222_v12 = vpop.f32.mrb[79].mxu1 }
 0x28c   : > { %v6381_v33 = vadd.f32 %v2684_v0, %v2220_v59  ;;  %v4436_v62 = vpop.f32.mrb[79].mxu0 }
 0x28d   : > { %v6384_v30 = vsub.f32 %v6154_v8, %v2877_v5  ;;  %v3025_v45 = vsel %vm2727_vm2, %v2974_v60, 0.0  ;;  %v2842_v8 = vsel %vm2727_vm2, %v6377_v29, 0.0 }
 0x28e   : > { %v2739_v31 = vpop.xlane.xlu1 %2738  ;;  %3026 = vadd.xlane.f32.xlu0 %v3025_v45  ;;  %v2845_v15 = vsel %vm2727_vm2, %v6381_v33, 0.0 }
 0x28f   : > { %v2878_v50 = vmul.f32 0.020408163, %v2739_v31  ;;  %2846 = vadd.xlane.f32.xlu1 %v2845_v15  ;;  %v2975_v57 = vmul.f32 %v6384_v30, %v6384_v30  ;;  %v2225_v51 = vpop.f32.mrb[80].mxu1 }
 0x290   : > { %v2227_v5 = vpop.f32.mrb[81].mxu1 }
 0x291   : > { %v6392_v0 = vsub.f32 %v6156_v13, %v2878_v50  ;;  %v2689_v12 = vpop.f32.mrb[80].mxu0  ;;  %v3028_v4 = vsel %vm2727_vm2, %v2975_v57, 0.0  ;;  %v2228_v15 = vpop.f32.mrb[82].mxu1 }
 0x292   : > { %v6397_v59 = vadd.f32 %v2689_v12, %v2225_v51  ;;  %v4439_v60 = vpop.f32.mrb[81].mxu0  ;;  %v2742_v62 = vpop.xlane.xlu0 %2741  ;;  %2843 = vadd.xlane.f32.xlu0 %v2842_v8 }
 0x293   : > { %v2879_v45 = vmul.f32 0.020408163, %v2742_v62  ;;  %v2692_v31 = vpop.f32.mrb[82].mxu0  ;;  %3029 = vadd.xlane.f32.xlu1 %v3028_v4  ;;  %v2976_v13 = vmul.f32 %v6392_v0, %v6392_v0  ;;  %v2230_v51 = vpop.f32.mrb[83].mxu1 }
 0x294   : > { %v6401_v50 = vadd.f32 %v2692_v31, %v2228_v15  ;;  %v4440_v56 = vpop.f32.mrb[83].mxu0  ;;  %v2745_v32 = vpop.xlane.xlu1 %2744 }
 0x295   : > { %v6404_v5 = vsub.f32 %v6166_v23, %v2879_v45  ;;  %v2880_v57 = vmul.f32 0.020408163, %v2745_v32  ;;  %v3031_v12 = vsel %vm2727_vm2, %v2976_v13, 0.0  ;;  %v2848_v23 = vsel %vm2727_vm2, %v6397_v59, 0.0 }
 0x296   : > { %3032 = vadd.xlane.f32.xlu0 %v3031_v12  ;;  %v2851_v8 = vsel %vm2727_vm2, %v6401_v50, 0.0 }
 0x297   : > { %7111 = vst [vmem:[#allocation44_spill] sm:$0xff] %v6404_v5  ;;  %v6410_v4 = vsub.f32 %v6168_v28, %v2880_v57  ;;  %2852 = vadd.xlane.f32.xlu1 %v2851_v8  ;;  %v2977_v60 = vmul.f32 %v6404_v5, %v6404_v5  ;;  %v2233_v56 = vpop.f32.mrb[84].mxu1 }
 0x298   : > { %v2235_v32 = vpop.f32.mrb[85].mxu1 }
 0x299   : > { %7112 = vst [vmem:[#allocation45_spill] sm:$0xff] %v6410_v4  ;;  %v2697_v62 = vpop.f32.mrb[84].mxu0  ;;  %v3034_v45 = vsel %vm2727_vm2, %v2977_v60, 0.0  ;;  %v2978_v31 = vmul.f32 %v6410_v4, %v6410_v4  ;;  %v2236_v12 = vpop.f32.mrb[86].mxu1 }
 0x29a   : > { %v6419_v15 = vadd.f32 %v2697_v62, %v2233_v56  ;;  %v4443_v13 = vpop.f32.mrb[85].mxu0  ;;  %v2748_v28 = vpop.xlane.xlu0 %2747  ;;  %2849 = vadd.xlane.f32.xlu0 %v2848_v23 }
 0x29b   : > { %v2881_v57 = vmul.f32 0.020408163, %v2748_v28  ;;  %v2700_v51 = vpop.f32.mrb[86].mxu0  ;;  %3035 = vadd.xlane.f32.xlu1 %v3034_v45  ;;  %v2238_v49 = vpop.f32.mrb[87].mxu1  ;;  %v3037_v4 = vsel %vm2727_vm2, %v2978_v31, 0.0 }
 0x29c   : > { %v6421_v8 = vadd.f32 %v2700_v51, %v2236_v12  ;;  %v4444_v18 = vpop.f32.mrb[87].mxu0  ;;  %v2751_v2 = vpop.xlane.xlu1 %2750 }
 0x29d   : > { %v6424_v32 = vsub.f32 %v6178_v36, %v2881_v57  ;;  %v2882_v60 = vmul.f32 0.020408163, %v2751_v2  ;;  %v2854_v36 = vsel %vm2727_vm2, %v6419_v15, 0.0 }
 0x29e   : > { %3038 = vadd.xlane.f32.xlu0 %v3037_v4  ;;  %v2857_v56 = vsel %vm2727_vm2, %v6421_v8, 0.0 }
 0x29f   : > { %7113 = vst [vmem:[#allocation46_spill] sm:$0xff] %v6424_v32  ;;  %v6430_v62 = vsub.f32 %v6180_v41, %v2882_v60  ;;  %2858 = vadd.xlane.f32.xlu1 %v2857_v56  ;;  %v2979_v23 = vmul.f32 %v6424_v32, %v6424_v32  ;;  %v2241_v18 = vpop.f32.mrb[88].mxu1 }
 0x2a0   : > { %v2243_v2 = vpop.f32.mrb[89].mxu1 }
 0x2a1   : > { %7114 = vst [vmem:[#allocation47_spill] sm:$0xff] %v6430_v62  ;;  %v2705_v45 = vpop.f32.mrb[88].mxu0  ;;  %v3040_v49 = vsel %vm2727_vm2, %v2979_v23, 0.0  ;;  %v2980_v4 = vmul.f32 %v6430_v62, %v6430_v62  ;;  %v2244_v51 = vpop.f32.mrb[90].mxu1 }
 0x2a2   : > { %v6439_v31 = vadd.f32 %v2705_v45, %v2241_v18  ;;  %v4447_v13 = vpop.f32.mrb[89].mxu0  ;;  %v2754_v41 = vpop.xlane.xlu0 %2753  ;;  %2855 = vadd.xlane.f32.xlu0 %v2854_v36 }
 0x2a3   : > { %v2883_v28 = vmul.f32 0.020408163, %v2754_v41  ;;  %v2708_v57 = vpop.f32.mrb[90].mxu0  ;;  %3041 = vadd.xlane.f32.xlu1 %v3040_v49  ;;  %v2246_v32 = vpop.f32.mrb[91].mxu1  ;;  %v3043_v62 = vsel %vm2727_vm2, %v2980_v4, 0.0 }
 0x2a4   : > { %v6441_v12 = vadd.f32 %v2708_v57, %v2244_v51  ;;  %v4448_v60 = vpop.f32.mrb[91].mxu0  ;;  %v2757_v56 = vpop.xlane.xlu1 %2756 }
 0x2a5   : > { %v6444_v2 = vsub.f32 %v6190_v61, %v2883_v28  ;;  %v2884_v23 = vmul.f32 0.020408163, %v2757_v56  ;;  %v2860_v61 = vsel %vm2727_vm2, %v6439_v31, 0.0 }
 0x2a6   : > { %3044 = vadd.xlane.f32.xlu0 %v3043_v62  ;;  %v2863_v18 = vsel %vm2727_vm2, %v6441_v12, 0.0 }
 0x2a7   : > { %7115 = vst [vmem:[#allocation48_spill] sm:$0xff] %v6444_v2  ;;  %v6450_v45 = vsub.f32 %v6192_v6, %v2884_v23  ;;  %2864 = vadd.xlane.f32.xlu1 %v2863_v18  ;;  %v2981_v36 = vmul.f32 %v6444_v2, %v6444_v2  ;;  %v2249_v49 = vpop.f32.mrb[92].mxu1 }
 0x2a8   : > { %v2251_v41 = vpop.f32.mrb[93].mxu1 }
 0x2a9   : > { %v2713_v13 = vpop.f32.mrb[92].mxu0  ;;  %v3046_v32 = vsel %vm2727_vm2, %v2981_v36, 0.0  ;;  %v2982_v62 = vmul.f32 %v6450_v45, %v6450_v45  ;;  %v2252_v60 = vpop.f32.mrb[94].mxu1 }
 0x2aa   : > { %v6459_v4 = vadd.f32 %v2713_v13, %v2249_v49  ;;  %v4451_v28 = vpop.f32.mrb[93].mxu0  ;;  %v2760_v6 = vpop.xlane.xlu0 %2759  ;;  %2861 = vadd.xlane.f32.xlu0 %v2860_v61 }
 0x2ab   : > { %v2885_v57 = vmul.f32 0.020408163, %v2760_v6  ;;  %v2716_v51 = vpop.f32.mrb[94].mxu0  ;;  %3047 = vadd.xlane.f32.xlu1 %v3046_v32  ;;  %v2254_v2 = vpop.f32.mrb[95].mxu1  ;;  %v3049_v5 = vsel %vm2727_vm2, %v2982_v62, 0.0 }
 0x2ac   : > { %v6461_v56 = vadd.f32 %v2716_v51, %v2252_v60  ;;  %v4452_v23 = vpop.f32.mrb[95].mxu0  ;;  %v2763_v18 = vpop.xlane.xlu1 %2762 }
 0x2ad   : > { %v6464_v41 = vsub.f32 %v6202_v20, %v2885_v57  ;;  %v2886_v36 = vmul.f32 0.020408163, %v2763_v18  ;;  %v2866_v20 = vsel %vm2727_vm2, %v6459_v4, 0.0 }
 0x2ae   : > { %3050 = vadd.xlane.f32.xlu0 %v3049_v5  ;;  %v2869_v49 = vsel %vm2727_vm2, %v6461_v56, 0.0 }
 0x2af   : > { %7116 = vst [vmem:[#allocation49_spill] sm:$0xff] %v6464_v41  ;;  %v6470_v13 = vsub.f32 %v6204_v26, %v2886_v36  ;;  %2870 = vadd.xlane.f32.xlu1 %v2869_v49  ;;  %v2983_v61 = vmul.f32 %v6464_v41, %v6464_v41  ;;  %v2257_v32 = vpop.f32.mrb[96].mxu1 }
 0x2b0   : > { %v2259_v6 = vpop.f32.mrb[97].mxu1 }
 0x2b1   : > { %v2721_v28 = vpop.f32.mrb[96].mxu0  ;;  %v3052_v2 = vsel %vm2727_vm2, %v2983_v61, 0.0  ;;  %v2984_v5 = vmul.f32 %v6470_v13, %v6470_v13  ;;  %v2260_v23 = vpop.f32.mrb[98].mxu1 }
 0x2b2   : > { %v6479_v62 = vadd.f32 %v2721_v28, %v2257_v32  ;;  %v4455_v57 = vpop.f32.mrb[97].mxu0  ;;  %v2766_v26 = vpop.xlane.xlu0 %2765  ;;  %2867 = vadd.xlane.f32.xlu0 %v2866_v20 }
 0x2b3   : > { %v2887_v51 = vmul.f32 0.020408163, %v2766_v26  ;;  %v2724_v60 = vpop.f32.mrb[98].mxu0  ;;  %3053 = vadd.xlane.f32.xlu1 %v3052_v2  ;;  %v2261_v41 = vpop.f32.mrb[99].mxu1  ;;  %v3055_v61 = vsel %vm2727_vm2, %v2984_v5, 0.0 }
 0x2b4   : > { %v4456_v18 = vpop.f32.mrb[99].mxu0  ;;  %v2769_v36 = vpop.xlane.xlu1 %2768  ;;  %v2872_v2 = vsel %vm2727_vm2, %v6479_v62, 0.0 }
 0x2b5   : > { %v6482_v49 = vsub.f32 %v6214_v38, %v2887_v51  ;;  %v2888_v6 = vmul.f32 0.020408163, %v2769_v36 }
 0x2b6   : > { %3056 = vadd.xlane.f32.xlu0 %v3055_v61 }
 0x2b7   : > { %7117 = vst [vmem:[#allocation50_spill] sm:$0xff] %v6482_v49  ;;  %v6486_v32 = vsub.f32 %v6216_v54, %v2888_v6  ;;  %v2985_v28 = vmul.f32 %v6482_v49, %v6482_v49 }
 0x2b9   : > { %v3058_v20 = vsel %vm2727_vm2, %v2985_v28, 0.0  ;;  %v2986_v38 = vmul.f32 %v6486_v32, %v6486_v32 }
 0x2ba   : > { %v2772_v57 = vpop.xlane.xlu0 %2771  ;;  %3059 = vadd.xlane.f32.xlu1 %v3058_v20  ;;  %2873 = vadd.xlane.f32.xlu0 %v2872_v2 }
 0x2bb   : > { %v2889_v41 = vmul.f32 0.020408163, %v2772_v57  ;;  %v3061_v51 = vsel %vm2727_vm2, %v2986_v38, 0.0 }
 0x2bc   : > { %v2775_v5 = vpop.xlane.xlu1 %2774 }
 0x2bd   : > { %v6496_v26 = vsub.f32 %v6226_v9, %v2889_v41  ;;  %v2890_v54 = vmul.f32 0.020408163, %v2775_v5 }
 0x2be   : > { %3062 = vadd.xlane.f32.xlu0 %v3061_v51 }
 0x2bf   : > { %7118 = vst [vmem:[#allocation51_spill] sm:$0xff] %v6496_v26  ;;  %v6500_v60 = vsub.f32 %v6228_v21, %v2890_v54  ;;  %v2987_v23 = vmul.f32 %v6496_v26, %v6496_v26 }
 0x2c1   : > { %v3064_v18 = vsel %vm2727_vm2, %v2987_v23, 0.0  ;;  %v2988_v36 = vmul.f32 %v6500_v60, %v6500_v60 }
 0x2c2   : > { %v2778_v6 = vpop.xlane.xlu0 %2777  ;;  %3065 = vadd.xlane.f32.xlu1 %v3064_v18 }
 0x2c3   : > { %v2891_v61 = vmul.f32 0.020408163, %v2778_v6  ;;  %v3067_v9 = vsel %vm2727_vm2, %v2988_v36, 0.0 }
 0x2c4   : > { %v2781_v28 = vpop.xlane.xlu1 %2780  ;;  %3068 = vadd.xlane.f32.xlu0 %v3067_v9 }
 0x2c5   : > { %v6509_v20 = vsub.f32 %v6238_v37, %v2891_v61  ;;  %v2892_v21 = vmul.f32 0.020408163, %v2781_v28 }
 0x2c7   : > { %7119 = vst [vmem:[#allocation52_spill] sm:$0xff] %v6509_v20  ;;  %v6512_v2 = vsub.f32 %v6240_v58, %v2892_v21  ;;  %v2989_v38 = vmul.f32 %v6509_v20, %v6509_v20 }
 0x2c9   : > { %v3070_v57 = vsel %vm2727_vm2, %v2989_v38, 0.0  ;;  %v2990_v41 = vmul.f32 %v6512_v2, %v6512_v2 }
 0x2ca   : > { %v2784_v5 = vpop.xlane.xlu0 %2783  ;;  %3071 = vadd.xlane.f32.xlu1 %v3070_v57 }
 0x2cb   : > { %v2893_v54 = vmul.f32 0.020408163, %v2784_v5  ;;  %v3073_v51 = vsel %vm2727_vm2, %v2990_v41, 0.0 }
 0x2cc   : > { %v2787_v23 = vpop.xlane.xlu1 %2786  ;;  %3074 = vadd.xlane.f32.xlu0 %v3073_v51 }
 0x2cd   : > { %v6521_v37 = vsub.f32 %v6250_v19, %v2893_v54  ;;  %v2894_v58 = vmul.f32 0.020408163, %v2787_v23 }
 0x2cf   : > { %7120 = vst [vmem:[#allocation53_spill] sm:$0xff] %v6521_v37  ;;  %v6524_v18 = vsub.f32 %v6252_v34, %v2894_v58  ;;  %v2991_v36 = vmul.f32 %v6521_v37, %v6521_v37  ;;  %v5089_v37 = vld [vmem:[%s5866_s18 + $0x118] sm:$0xff] }
 0x2d1   : > { %v3076_v6 = vsel %vm2727_vm2, %v2991_v36, 0.0  ;;  %v2992_v61 = vmul.f32 %v6524_v18, %v6524_v18 }
 0x2d2   : > { %v2790_v9 = vpop.xlane.xlu0 %2789  ;;  %3077 = vadd.xlane.f32.xlu1 %v3076_v6 }
 0x2d3   : > { %v2895_v28 = vmul.f32 0.020408163, %v2790_v9  ;;  %v3079_v21 = vsel %vm2727_vm2, %v2992_v61, 0.0 }
 0x2d4   : > { %v2793_v38 = vpop.xlane.xlu1 %2792  ;;  %3080 = vadd.xlane.f32.xlu0 %v3079_v21 }
 0x2d5   : > { %v6533_v19 = vsub.f32 %v6262_v10, %v2895_v28  ;;  %v2896_v34 = vmul.f32 0.020408163, %v2793_v38 }
 0x2d7   : > { %7121 = vst [vmem:[#allocation54_spill] sm:$0xff] %v6533_v19  ;;  %v6536_v57 = vsub.f32 %v6264_v25, %v2896_v34  ;;  %v2993_v41 = vmul.f32 %v6533_v19, %v6533_v19 }
 0x2d9   : > { %v3082_v5 = vsel %vm2727_vm2, %v2993_v41, 0.0  ;;  %v2994_v54 = vmul.f32 %v6536_v57, %v6536_v57 }
 0x2da   : > { %v2796_v51 = vpop.xlane.xlu0 %2795  ;;  %3083 = vadd.xlane.f32.xlu1 %v3082_v5 }
 0x2db   : > { %v2897_v23 = vmul.f32 0.020408163, %v2796_v51  ;;  %v3085_v58 = vsel %vm2727_vm2, %v2994_v54, 0.0 }
 0x2dc   : > { %v2799_v36 = vpop.xlane.xlu1 %2798  ;;  %3086 = vadd.xlane.f32.xlu0 %v3085_v58 }
 0x2dd   : > { %v6545_v10 = vsub.f32 %v6274_v47, %v2897_v23  ;;  %v2898_v25 = vmul.f32 0.020408163, %v2799_v36 }
 0x2df   : > { %7122 = vst [vmem:[#allocation55_spill] sm:$0xff] %v6545_v10  ;;  %v6548_v6 = vsub.f32 %v6276_v44, %v2898_v25  ;;  %v2995_v61 = vmul.f32 %v6545_v10, %v6545_v10 }
 0x2e1   : > { %v3088_v9 = vsel %vm2727_vm2, %v2995_v61, 0.0  ;;  %v2996_v28 = vmul.f32 %v6548_v6, %v6548_v6 }
 0x2e2   : > { %v2802_v21 = vpop.xlane.xlu0 %2801  ;;  %3089 = vadd.xlane.f32.xlu1 %v3088_v9 }
 0x2e3   : > { %v2899_v38 = vmul.f32 0.020408163, %v2802_v21  ;;  %v3091_v34 = vsel %vm2727_vm2, %v2996_v28, 0.0 }
 0x2e4   : > { %v2805_v41 = vpop.xlane.xlu1 %2804  ;;  %3092 = vadd.xlane.f32.xlu0 %v3091_v34 }
 0x2e5   : > { %v6557_v47 = vsub.f32 %v6286_v27, %v2899_v38  ;;  %v2900_v44 = vmul.f32 0.020408163, %v2805_v41 }
 0x2e7   : > { %7123 = vst [vmem:[#allocation56_spill] sm:$0xff] %v6557_v47  ;;  %v6560_v5 = vsub.f32 %v6288_v63, %v2900_v44  ;;  %v2997_v54 = vmul.f32 %v6557_v47, %v6557_v47 }
 0x2e9   : > { %v3094_v51 = vsel %vm2727_vm2, %v2997_v54, 0.0  ;;  %v2998_v23 = vmul.f32 %v6560_v5, %v6560_v5 }
 0x2ea   : > { %v2808_v58 = vpop.xlane.xlu0 %2807  ;;  %3095 = vadd.xlane.f32.xlu1 %v3094_v51 }
 0x2eb   : > { %v2901_v36 = vmul.f32 0.020408163, %v2808_v58  ;;  %v3097_v25 = vsel %vm2727_vm2, %v2998_v23, 0.0 }
 0x2ec   : > { %v2811_v61 = vpop.xlane.xlu1 %2810  ;;  %3098 = vadd.xlane.f32.xlu0 %v3097_v25 }
 0x2ed   : > { %v6569_v27 = vsub.f32 %v6298_v11, %v2901_v36  ;;  %v2902_v63 = vmul.f32 0.020408163, %v2811_v61 }
 0x2ef   : > { %7124 = vst [vmem:[#allocation57_spill] sm:$0xff] %v6569_v27  ;;  %v6572_v9 = vsub.f32 %v6300_v55, %v2902_v63  ;;  %v2999_v28 = vmul.f32 %v6569_v27, %v6569_v27 }
 0x2f1   : > { %v3100_v21 = vsel %vm2727_vm2, %v2999_v28, 0.0  ;;  %v3000_v38 = vmul.f32 %v6572_v9, %v6572_v9 }
 0x2f2   : > { %v2814_v34 = vpop.xlane.xlu0 %2813  ;;  %3101 = vadd.xlane.f32.xlu1 %v3100_v21 }
 0x2f3   : > { %v2903_v41 = vmul.f32 0.020408163, %v2814_v34  ;;  %v3103_v44 = vsel %vm2727_vm2, %v3000_v38, 0.0 }
 0x2f4   : > { %v2817_v54 = vpop.xlane.xlu1 %2816  ;;  %3104 = vadd.xlane.f32.xlu0 %v3103_v44 }
 0x2f5   : > { %v6581_v11 = vsub.f32 %v6310_v17, %v2903_v41  ;;  %v2904_v55 = vmul.f32 0.020408163, %v2817_v54 }
 0x2f7   : > { %7125 = vst [vmem:[#allocation58_spill] sm:$0xff] %v6581_v11  ;;  %v6584_v51 = vsub.f32 %v6312_v1, %v2904_v55  ;;  %v3001_v23 = vmul.f32 %v6581_v11, %v6581_v11 }
 0x2f9   : > { %v3106_v58 = vsel %vm2727_vm2, %v3001_v23, 0.0  ;;  %v3002_v36 = vmul.f32 %v6584_v51, %v6584_v51 }
 0x2fa   : > { %v2820_v25 = vpop.xlane.xlu0 %2819  ;;  %3107 = vadd.xlane.f32.xlu1 %v3106_v58 }
 0x2fb   : > { %v2905_v61 = vmul.f32 0.020408163, %v2820_v25  ;;  %v3109_v63 = vsel %vm2727_vm2, %v3002_v36, 0.0 }
 0x2fc   : > { %v2823_v28 = vpop.xlane.xlu1 %2822  ;;  %3110 = vadd.xlane.f32.xlu0 %v3109_v63 }
 0x2fd   : > { %v6593_v17 = vsub.f32 %v6322_v52, %v2905_v61  ;;  %v2906_v1 = vmul.f32 0.020408163, %v2823_v28 }
 0x2ff   : > { %7126 = vst [vmem:[#allocation59_spill] sm:$0xff] %v6593_v17  ;;  %v6596_v21 = vsub.f32 %v6324_v22, %v2906_v1  ;;  %v3003_v38 = vmul.f32 %v6593_v17, %v6593_v17 }
 0x301   : > { %v3112_v34 = vsel %vm2727_vm2, %v3003_v38, 0.0  ;;  %v3004_v41 = vmul.f32 %v6596_v21, %v6596_v21 }
 0x302   : > { %v2826_v44 = vpop.xlane.xlu0 %2825  ;;  %3113 = vadd.xlane.f32.xlu1 %v3112_v34 }
 0x303   : > { %v2907_v54 = vmul.f32 0.020408163, %v2826_v44  ;;  %v3115_v55 = vsel %vm2727_vm2, %v3004_v41, 0.0 }
 0x304   : > { %v2829_v23 = vpop.xlane.xlu1 %2828  ;;  %3116 = vadd.xlane.f32.xlu0 %v3115_v55 }
 0x305   : > { %v6605_v52 = vsub.f32 %v6334_v24, %v2907_v54  ;;  %v2908_v22 = vmul.f32 0.020408163, %v2829_v23 }
 0x307   : > { %7127 = vst [vmem:[#allocation60_spill] sm:$0xff] %v6605_v52  ;;  %v6608_v58 = vsub.f32 %v6336_v16, %v2908_v22  ;;  %v3005_v36 = vmul.f32 %v6605_v52, %v6605_v52 }
 0x309   : > { %v3118_v25 = vsel %vm2727_vm2, %v3005_v36, 0.0  ;;  %v3006_v61 = vmul.f32 %v6608_v58, %v6608_v58 }
 0x30a   : > { %v2832_v63 = vpop.xlane.xlu0 %2831  ;;  %3119 = vadd.xlane.f32.xlu1 %v3118_v25 }
 0x30b   : > { %v2909_v28 = vmul.f32 0.020408163, %v2832_v63  ;;  %v3121_v1 = vsel %vm2727_vm2, %v3006_v61, 0.0 }
 0x30c   : > { %v2835_v38 = vpop.xlane.xlu1 %2834  ;;  %3122 = vadd.xlane.f32.xlu0 %v3121_v1 }
 0x30d   : > { %v6617_v24 = vsub.f32 %v6346_v3, %v2909_v28  ;;  %v2910_v16 = vmul.f32 0.020408163, %v2835_v38 }
 0x30f   : > { %7128 = vst [vmem:[#allocation61_spill] sm:$0xff] %v6617_v24  ;;  %v6620_v34 = vsub.f32 %v6348_v14, %v2910_v16  ;;  %v3007_v41 = vmul.f32 %v6617_v24, %v6617_v24 }
 0x311   : > { %v3124_v44 = vsel %vm2727_vm2, %v3007_v41, 0.0  ;;  %v3008_v54 = vmul.f32 %v6620_v34, %v6620_v34 }
 0x312   : > { %v2838_v55 = vpop.xlane.xlu0 %2837  ;;  %3125 = vadd.xlane.f32.xlu1 %v3124_v44 }
 0x313   : > { %v2911_v23 = vmul.f32 0.020408163, %v2838_v55  ;;  %v3127_v22 = vsel %vm2727_vm2, %v3008_v54, 0.0 }
 0x314   : > { %v2841_v36 = vpop.xlane.xlu1 %2840  ;;  %3128 = vadd.xlane.f32.xlu0 %v3127_v22 }
 0x315   : > { %v6629_v3 = vsub.f32 %v6358_v35, %v2911_v23  ;;  %v2912_v14 = vmul.f32 0.020408163, %v2841_v36 }
 0x317   : > { %7129 = vst [vmem:[#allocation62_spill] sm:$0xff] %v6629_v3  ;;  %v6632_v25 = vsub.f32 %v6360_v7, %v2912_v14  ;;  %v3009_v61 = vmul.f32 %v6629_v3, %v6629_v3 }
 0x318   : > { %v3024_v63 = vpop.xlane.xlu1 %3023 }
 0x319   : > { %v3130_v28 = vsel %vm2727_vm2, %v3009_v61, 0.0  ;;  %v3010_v1 = vmul.f32 %v6632_v25, %v6632_v25  ;;  %v3169_v22 = vmul.f32 0.020408163, %v3024_v63 }
 0x31a   : > { %3131 = vadd.xlane.f32.xlu1 %v3130_v28 }
 0x31b   : > { %v3027_v38 = vpop.xlane.xlu0 %3026  ;;  %v3133_v16 = vsel %vm2727_vm2, %v3010_v1, 0.0  ;;  %v3267_v28 = vadd.f32 1e-05, %v3169_v22 }
 0x31c   : > { %v2847_v41 = vpop.xlane.xlu1 %2846  ;;  %3134 = vadd.xlane.f32.xlu0 %v3133_v16 }
 0x31d   : > { %v2914_v35 = vmul.f32 0.020408163, %v2847_v41  ;;  %v3170_v41 = vmul.f32 0.020408163, %v3027_v38  ;;  %4972 = vrsqrt.f32 %v3267_v28 }
 0x31f   : > { %v6641_v44 = vsub.f32 %v6381_v33, %v2914_v35  ;;  %v2844_v7 = vpop.xlane.xlu0 %2843 }
 0x320   : > { %v2913_v54 = vmul.f32 0.020408163, %v2844_v7  ;;  %v3030_v35 = vpop.xlane.xlu1 %3029  ;;  %v3268_v7 = vadd.f32 1e-05, %v3170_v41  ;;  %v5071_v41 = vld [vmem:[%s5866_s18 + $0x8] sm:$0xff] }
 0x321   : > { %v3012_v55 = vmul.f32 %v6641_v44, %v6641_v44 }
 0x322   : > { %v6646_v23 = vsub.f32 %v6377_v29, %v2913_v54  ;;  %v3171_v54 = vmul.f32 0.020408163, %v3030_v35  ;;  %4974 = vrsqrt.f32 %v3268_v7 }
 0x323   : > { %v6648_v36 = vpop.xlane.xlu0 %3032  ;;  %v3139_v14 = vsel %vm2727_vm2, %v3012_v55, 0.0 }
 0x324   : > { %7130 = vst [vmem:[#allocation63_spill] sm:$0xff] %v6646_v23  ;;  %3140 = vadd.xlane.f32.xlu0 %v3139_v14  ;;  %v3011_v61 = vmul.f32 %v6646_v23, %v6646_v23  ;;  %v3269_v22 = vadd.f32 1e-05, %v3171_v54  ;;  %v2853_v14 = vpop.xlane.xlu1 %2852 }
 0x326   : > { %v3136_v33 = vsel %vm2727_vm2, %v3011_v61, 0.0  ;;  %4976 = vrsqrt.f32 %v3269_v22 }
 0x327   : > { %v2850_v1 = vpop.xlane.xlu0 %2849  ;;  %3137 = vadd.xlane.f32.xlu1 %v3136_v33  ;;  %v4973_v61 = vpop.eup %4972  ;;  %v5070_v33 = vld [vmem:[%s5866_s18] sm:$0xff] }
 0x328   : > { %v2915_v16 = vmul.f32 0.020408163, %v2850_v1  ;;  %v3036_v38 = vpop.xlane.xlu1 %3035 }
 0x32a   : > { %v6655_v29 = vsub.f32 %v6397_v59, %v2915_v16  ;;  %v3365_v59 = vmul.f32 %v5070_v33, %v4973_v61  ;;  %v2916_v61 = vmul.f32 0.020408163, %v2853_v14 }
 0x32b   : > { %v6661_v1 = vpop.xlane.xlu0 %3038 }
 0x32c   : > { %7131 = vst [vmem:[#allocation64_spill] sm:$0xff] %v6655_v29  ;;  %v3013_v63 = vmul.f32 %v6655_v29, %v6655_v29  ;;  %v4975_v28 = vpop.eup %4974  ;;  %v2859_v16 = vpop.xlane.xlu1 %2858 }
 0x32d   : > { %v3366_v29 = vmul.f32 %v5071_v41, %v4975_v28  ;;  %v2918_v28 = vmul.f32 0.020408163, %v2859_v16 }
 0x32e   : > { %v3142_v55 = vsel %vm2727_vm2, %v3013_v63, 0.0  ;;  %v5072_v63 = vld [vmem:[%s5866_s18 + $0x10] sm:$0xff] }
 0x32f   : > { %3143 = vadd.xlane.f32.xlu1 %v3142_v55  ;;  %v2856_v23 = vpop.xlane.xlu0 %2855 }
 0x330   : > { %v4977_v35 = vpop.eup %4976  ;;  %v6665_v54 = vpop.xlane.xlu1 %3041  ;;  %v2917_v16 = vmul.f32 0.020408163, %v2856_v23 }
 0x331   : > { %v3367_v7 = vmul.f32 %v5072_v63, %v4977_v35 }
 0x333   : > { %v6667_v55 = vpop.xlane.xlu0 %3044 }
 0x334   : > { %v2865_v22 = vpop.xlane.xlu1 %2864 }
 0x335   : > { %v2920_v35 = vmul.f32 0.020408163, %v2865_v22 }
 0x337   : > { %v6669_v3 = vpop.xlane.xlu0 %2861  ;;  %v6684_v52 = vsub.f32 %v6441_v12, %v2920_v35  ;;  %v6696_v12 = vsub.f32 %v6419_v15, %v2917_v16  ;;  %v3173_v15 = vmul.f32 0.020408163, %v3036_v38 }
 0x338   : > { %v6671_v33 = vpop.xlane.xlu1 %3047 }
 0x339   : > { %7132 = vst [vmem:[#allocation65_spill] sm:$0xff] %v6696_v12  ;;  %v3015_v23 = vmul.f32 %v6696_v12, %v6696_v12 }
 0x33a   : > { %3416 = vperm.xlu0 %4721, %v3365_v59   ;;  %v6674_v59 = vsub.f32 %v6401_v50, %v2916_v61  ;;  %v3018_v61 = vmul.f32 %v6684_v52, %v6684_v52 }
 0x33b   : > { %v3051_v41 = vpop.xlane.xlu0 %3050  ;;  %v3148_v16 = vsel %vm2727_vm2, %v3015_v23, 0.0 }
 0x33c   : > { %v3014_v63 = vmul.f32 %v6674_v59, %v6674_v59  ;;  %v3157_v35 = vsel %vm2727_vm2, %v3018_v61, 0.0 }
 0x33e   : > { %v3145_v17 = vsel %vm2727_vm2, %v3014_v63, 0.0 }
 0x33f   : > { %v6681_v24 = vpop.xlane.xlu0 %2867 }
 0x340   : > { %3421 = vperm.xlu1 %4722, %v3366_v29   ;;  %v6677_v29 = vsub.f32 %v6421_v8, %v2918_v28 }
 0x342   : > { %v3016_v50 = vmul.f32 %v6677_v29, %v6677_v29 }
 0x343   : > { %v3057_v28 = vpop.xlane.xlu0 %3056 }
 0x344   : > { %3426 = vperm.xlu1 %4722, %v3367_v7   ;;  %v2871_v7 = vpop.xlane.xlu1 %2870  ;;  %v3151_v22 = vsel %vm2727_vm2, %v3016_v50, 0.0  ;;  %v3180_v61 = vmul.f32 0.020408163, %v3057_v28 }
 0x345   : > { %v2922_v14 = vmul.f32 0.020408163, %v2871_v7  ;;  %v3178_v7 = vmul.f32 0.020408163, %v3051_v41 }
 0x347   : > { %v6690_v8 = vsub.f32 %v6461_v56, %v2922_v14  ;;  %v6702_v56 = vpop.xlane.xlu0 %2873 }
 0x349   : > { %v3020_v63 = vmul.f32 %v6690_v8, %v6690_v8 }
 0x34b   : > { %v3163_v14 = vsel %vm2727_vm2, %v3020_v63, 0.0  ;;  %v3063_v11 = vpop.xlane.xlu0 %3062 }
 0x34c   : > { %v3182_v27 = vmul.f32 0.020408163, %v3063_v11 }
 0x34e   : > { %v3280_v41 = vadd.f32 1e-05, %v3182_v27  ;;  %v5074_v27 = vld [vmem:[%s5866_s18 + $0x48] sm:$0xff] }
 0x351   : > { %v3069_v47 = vpop.xlane.xlu0 %3068 }
 0x352   : > { %v3184_v63 = vmul.f32 0.020408163, %v3069_v47 }
 0x354   : > { %v3282_v23 = vadd.f32 1e-05, %v3184_v63 }
 0x359   : > { %3146 = vadd.xlane.f32.xlu0 %v3145_v17  ;;  %v3172_v17 = vmul.f32 0.020408163, %v6648_v36  ;;  %v3278_v36 = vadd.f32 1e-05, %v3180_v61 }
 0x35b   : > { %v3270_v50 = vadd.f32 1e-05, %v3172_v17  ;;  %v3075_v17 = vpop.xlane.xlu0 %3074 }
 0x35c   : > { %v3186_v28 = vmul.f32 0.020408163, %v3075_v17 }
 0x35d   : > { %3152 = vadd.xlane.f32.xlu0 %v3151_v22  ;;  %v3276_v22 = vadd.f32 1e-05, %v3178_v7  ;;  %4978 = vrsqrt.f32 %v3270_v50  ;;  %v5073_v50 = vld [vmem:[%s5866_s18 + $0x18] sm:$0xff] }
 0x35e   : > { %v3284_v11 = vadd.f32 1e-05, %v3186_v28  ;;  %v6712_v28 = vpop.xlane.xlu1 %3053 }
 0x35f   : > { %4980 = vrsqrt.f32 %v3276_v22 }
 0x361   : > { %3158 = vadd.xlane.f32.xlu0 %v3157_v35  ;;  %v3271_v35 = vadd.f32 1e-05, %v3173_v15  ;;  %v3081_v7 = vpop.xlane.xlu0 %3080 }
 0x362   : > { %v3188_v22 = vmul.f32 0.020408163, %v3081_v7 }
 0x363   : > { %4982 = vrsqrt.f32 %v3271_v35 }
 0x364   : > { %4984 = vrsqrt.f32 %v3278_v36  ;;  %v5075_v36 = vld [vmem:[%s5866_s18 + $0x20] sm:$0xff]  ;;  %v3286_v63 = vadd.f32 1e-05, %v3188_v22 }
 0x365   : > { %3164 = vadd.xlane.f32.xlu0 %v3163_v14  ;;  %4986 = vrsqrt.f32 %v3280_v41 }
 0x366   : > { %4988 = vrsqrt.f32 %v3282_v23 }
 0x367   : > { %v4979_v38 = vpop.eup %4978  ;;  %4990 = vrsqrt.f32 %v3284_v11 }
 0x368   : > { %3149 = vadd.xlane.f32.xlu1 %v3148_v16  ;;  %v3368_v15 = vmul.f32 %v5073_v50, %v4979_v38  ;;  %v5076_v38 = vld [vmem:[%s5866_s18 + $0x58] sm:$0xff]  ;;  %4992 = vrsqrt.f32 %v3286_v63 }
 0x369   : > { %v4981_v14 = vpop.eup %4980  ;;  %v3087_v61 = vpop.xlane.xlu0 %3086 }
 0x36a   : > { %v3374_v47 = vmul.f32 %v5074_v27, %v4981_v14  ;;  %v3190_v17 = vmul.f32 0.020408163, %v3087_v61  ;;  %v5077_v27 = vld [vmem:[%s5866_s18 + $0x68] sm:$0xff] }
 0x36c   : > { %v3288_v7 = vadd.f32 1e-05, %v3190_v17 }
 0x36d   : > { %v4983_v16 = vpop.eup %4982 }
 0x36e   : > { %v4985_v35 = vpop.eup %4984  ;;  %v3369_v41 = vmul.f32 %v5075_v36, %v4983_v16  ;;  %v6715_v16 = vpop.xlane.xlu1 %3059  ;;  %4994 = vrsqrt.f32 %v3288_v7 }
 0x36f   : > { %v3376_v50 = vmul.f32 %v5076_v38, %v4985_v35  ;;  %v4987_v23 = vpop.eup %4986  ;;  %v5078_v35 = vld [vmem:[%s5866_s18 + $0x78] sm:$0xff] }
 0x370   : > { %v4989_v10 = vpop.eup %4988 }
 0x371   : > { %v3093_v12 = vpop.xlane.xlu0 %3092  ;;  %v3380_v36 = vmul.f32 %v5078_v35, %v4989_v10  ;;  %v5080_v10 = vld [vmem:[%s5866_s18 + $0x98] sm:$0xff] }
 0x372   : > { %v3192_v14 = vmul.f32 0.020408163, %v3093_v12  ;;  %v6718_v63 = vpop.xlane.xlu1 %3065 }
 0x374   : > { %v3290_v11 = vadd.f32 1e-05, %v3192_v14 }
 0x376   : > { %4996 = vrsqrt.f32 %v3290_v11  ;;  %v6721_v7 = vpop.xlane.xlu1 %3071 }
 0x379   : > { %3431 = vperm.xlu1 %4722, %v3368_v15   ;;  %v3099_v15 = vpop.xlane.xlu0 %3098 }
 0x37a   : > { %v3194_v22 = vmul.f32 0.020408163, %v3099_v15 }
 0x37b   : > { %3461 = vperm.xlu0 %4721, %v3374_v47   ;;  %v3378_v47 = vmul.f32 %v5077_v27, %v4987_v23 }
 0x37c   : > { %v3292_v12 = vadd.f32 1e-05, %v3194_v22 }
 0x37d   : > { %3436 = vperm.xlu1 %4722, %v3369_v41   ;;  %v4991_v41 = vpop.eup %4990 }
 0x37e   : > { %v4993_v27 = vpop.eup %4992  ;;  %4998 = vrsqrt.f32 %v3292_v12  ;;  %v2919_v12 = vmul.f32 0.020408163, %v6669_v3 }
 0x37f   : > { %3471 = vperm.xlu0 %4721, %v3376_v50   ;;  %v5079_v50 = vld [vmem:[%s5866_s18 + $0x88] sm:$0xff]  ;;  %v4995_v35 = vpop.eup %4994 }
 0x380   : > { %v3382_v23 = vmul.f32 %v5079_v50, %v4991_v41  ;;  %v4997_v41 = vpop.eup %4996 }
 0x381   : > { %v3105_v61 = vpop.xlane.xlu0 %3104 }
 0x382   : > { %v3196_v17 = vmul.f32 0.020408163, %v3105_v61  ;;  %v5081_v61 = vld [vmem:[%s5866_s18 + $0xa8] sm:$0xff] }
 0x383   : > { %3481 = vperm.xlu0 %4721, %v3378_v47   ;;  %v3384_v47 = vmul.f32 %v5080_v10, %v4993_v27  ;;  %v3386_v19 = vmul.f32 %v5081_v61, %v4995_v35  ;;  %v5083_v35 = vld [vmem:[%s5866_s18 + $0xc8] sm:$0xff]  ;;  %v3174_v61 = vmul.f32 0.020408163, %v6661_v1 }
 0x384   : > { %v3294_v14 = vadd.f32 1e-05, %v3196_v17 }
 0x386   : > { %5000 = vrsqrt.f32 %v3294_v14  ;;  %v6732_v14 = vsub.f32 %v6439_v31, %v2919_v12  ;;  %v5084_v31 = vld [vmem:[%s5866_s18 + $0xd8] sm:$0xff] }
 0x387   : > { %3491 = vperm.xlu0 %4721, %v3380_v36   ;;  %v6724_v36 = vpop.xlane.xlu1 %3077 }
 0x388   : > { %v4999_v10 = vpop.eup %4998  ;;  %7133 = vst [vmem:[#allocation66_spill] sm:$0xff] %v6732_v14 }
 0x389   : > { %v3111_v38 = vpop.xlane.xlu0 %3110 }
 0x38a   : > { %v3198_v15 = vmul.f32 0.020408163, %v3111_v38 }
 0x38b   : > { %3501 = vperm.xlu0 %4721, %v3382_v23   ;;  %v6728_v17 = vpop.xlane.xlu1 %3083  ;;  %v5082_v23 = vld [vmem:[%s5866_s18 + $0xb8] sm:$0xff] }
 0x38c   : > { %v3296_v11 = vadd.f32 1e-05, %v3198_v15  ;;  %v3388_v27 = vmul.f32 %v5082_v23, %v4997_v41 }
 0x38e   : > { %5002 = vrsqrt.f32 %v3296_v11 }
 0x38f   : > { %3511 = vperm.xlu0 %4721, %v3384_v47   ;;  %v6734_v15 = vpop.xlane.xlu1 %3089 }
 0x391   : > { %v3117_v22 = vpop.xlane.xlu0 %3116 }
 0x392   : > { %v3200_v50 = vmul.f32 0.020408163, %v3117_v22  ;;  %v5001_v22 = vpop.eup %5000 }
 0x393   : > { %3521 = vperm.xlu0 %4721, %v3386_v19   ;;  %v3390_v19 = vmul.f32 %v5083_v35, %v4999_v10  ;;  %v6738_v11 = vpop.xlane.xlu1 %3095  ;;  %v3392_v12 = vmul.f32 %v5084_v31, %v5001_v22  ;;  %v5085_v35 = vld [vmem:[%s5866_s18 + $0xe8] sm:$0xff]  ;;  %v5086_v31 = vld [vmem:[%s5866_s18 + $0xf8] sm:$0xff] }
 0x394   : > { %v3298_v38 = vadd.f32 1e-05, %v3200_v50  ;;  %v3017_v50 = vmul.f32 %v6732_v14, %v6732_v14 }
 0x396   : > { %5004 = vrsqrt.f32 %v3298_v38  ;;  %v3272_v38 = vadd.f32 1e-05, %v3174_v61  ;;  %v3154_v1 = vsel %vm2727_vm2, %v3017_v50, 0.0 }
 0x397   : > { %3531 = vperm.xlu0 %4721, %v3388_v27   ;;  %v3175_v27 = vmul.f32 0.020408163, %v6665_v54  ;;  %v6744_v10 = vpop.xlane.xlu1 %3101 }
 0x398   : > { %v5003_v23 = vpop.eup %5002 }
 0x399   : > { %v3123_v47 = vpop.xlane.xlu0 %3122  ;;  %v3273_v22 = vadd.f32 1e-05, %v3175_v27 }
 0x39a   : > { %v3202_v3 = vmul.f32 0.020408163, %v3123_v47 }
 0x39b   : > { %3541 = vperm.xlu0 %4721, %v3390_v19   ;;  %v3394_v19 = vmul.f32 %v5085_v35, %v5003_v23 }
 0x39c   : > { %v3300_v41 = vadd.f32 1e-05, %v3202_v3 }
 0x39e   : > { %5006 = vrsqrt.f32 %v3300_v41  ;;  %v6748_v41 = vpop.xlane.xlu1 %3107 }
 0x39f   : > { %3551 = vperm.xlu0 %4721, %v3392_v12   ;;  %5008 = vrsqrt.f32 %v3272_v38 }
 0x3a0   : > { %v5005_v3 = vpop.eup %5004 }
 0x3a1   : > { %3155 = vadd.xlane.f32.xlu1 %v3154_v1  ;;  %v3129_v47 = vpop.xlane.xlu0 %3128  ;;  %v3396_v54 = vmul.f32 %v5086_v31, %v5005_v3  ;;  %v5087_v1 = vld [vmem:[%s5866_s18 + $0x108] sm:$0xff] }
 0x3a2   : > { %v3204_v14 = vmul.f32 0.020408163, %v3129_v47  ;;  %v6751_v12 = vpop.xlane.xlu1 %3113 }
 0x3a3   : > { %3561 = vperm.xlu0 %4721, %v3394_v19  }
 0x3a4   : > { %v3302_v61 = vadd.f32 1e-05, %v3204_v14 }
 0x3a6   : > { %5010 = vrsqrt.f32 %v3302_v61  ;;  %v6754_v38 = vpop.xlane.xlu1 %3119 }
 0x3a7   : > { %5012 = vrsqrt.f32 %v3273_v22  ;;  %3571 = vperm.xlu0 %4721, %v3396_v54   ;;  %v5088_v22 = vld [vmem:[%s5866_s18 + $0x28] sm:$0xff] }
 0x3a8   : > { %v5007_v50 = vpop.eup %5006 }
 0x3a9   : > { %v3135_v23 = vpop.xlane.xlu0 %3134  ;;  %v3398_v35 = vmul.f32 %v5087_v1, %v5007_v50  ;;  %v5009_v14 = vpop.eup %5008 }
 0x3aa   : > { %v3206_v47 = vmul.f32 0.020408163, %v3135_v23  ;;  %v6756_v3 = vpop.xlane.xlu1 %3125  ;;  %v3370_v61 = vmul.f32 %v5088_v22, %v5009_v14  ;;  %v5091_v22 = vld [vmem:[%s5866_s18 + $0x128] sm:$0xff] }
 0x3ab   : > { %3581 = vperm.xlu0 %4721, %v3398_v35   ;;  %v5090_v35 = vld [vmem:[%s5866_s18 + $0x30] sm:$0xff] }
 0x3ac   : > { %v3304_v27 = vadd.f32 1e-05, %v3206_v47 }
 0x3ae   : > { %5014 = vrsqrt.f32 %v3304_v27  ;;  %v6760_v23 = vpop.xlane.xlu1 %3131 }
 0x3b0   : > { %v5011_v19 = vpop.eup %5010 }
 0x3b1   : > { %v5013_v31 = vpop.eup %5012  ;;  %v3141_v54 = vpop.xlane.xlu0 %3140  ;;  %v3400_v20 = vmul.f32 %v5089_v37, %v5011_v19 }
 0x3b2   : > { %v3208_v50 = vmul.f32 0.020408163, %v3141_v54  ;;  %3441 = vperm.xlu1 %4722, %v3370_v61   ;;  %v3371_v47 = vmul.f32 %v5090_v35, %v5013_v31  ;;  %v5092_v54 = vld [vmem:[%s5866_s18 + $0x138] sm:$0xff] }
 0x3b3   : > { %3591 = vperm.xlu0 %4721, %v3400_v20  }
 0x3b4   : > { %v3306_v1 = vadd.f32 1e-05, %v3208_v50  ;;  %v6763_v26 = vpop.xlane.xlu1 %3137 }
 0x3b6   : > { %5016 = vrsqrt.f32 %v3306_v1  ;;  %3446 = vperm.xlu1 %4722, %v3371_v47   ;;  %v2921_v47 = vmul.f32 0.020408163, %v6681_v24 }
 0x3b8   : > { %v5015_v27 = vpop.eup %5014 }
 0x3b9   : > { %v3417_v14 = vpop.permute.xlu0 %3416  ;;  %v3402_v49 = vmul.f32 %v5091_v22, %v5015_v27  ;;  %v6790_v27 = vsub.f32 %v6459_v4, %v2921_v47  ;;  %v3177_v22 = vmul.f32 0.020408163, %v6671_v33 }
 0x3ba   : > { %v3659_v37 = vmul.f32 %v3417_v14, %v6365_v39 }
 0x3bb   : > { %3601 = vperm.xlu0 %4721, %v3402_v49  }
 0x3bc   : > { %v3953_v20 = vadd.f32 %v6122_v43, %v3659_v37  ;;  %v6775_v19 = vpop.xlane.xlu1 %3143 }
 0x3be   : > { %4002 = vst.msk [vmem:[%s6772_s7] sm:$0xff] %vm2727_vm2, %v3953_v20 }
 0x3c0   : > { %v5017_v61 = vpop.eup %5016  ;;  %v3422_v31 = vpop.permute.xlu1 %3421 }
 0x3c1   : > { %v3660_v39 = vmul.f32 %v3422_v31, %v6374_v40  ;;  %v3404_v50 = vmul.f32 %v5092_v54, %v5017_v61  ;;  %v3176_v40 = vmul.f32 0.020408163, %v6667_v55  ;;  %v5093_v61 = vld [vmem:[%s5866_s18 + $0x38] sm:$0xff] }
 0x3c3   : > { %v3954_v1 = vadd.f32 %v6118_v42, %v3660_v39  ;;  %3611 = vperm.xlu0 %4721, %v3404_v50   ;;  %v3019_v42 = vmul.f32 %v6790_v27, %v6790_v27  ;;  %v3274_v14 = vadd.f32 1e-05, %v3176_v40  ;;  %v5094_v50 = vld [vmem:[%s5866_s18 + $0x40] sm:$0xff] }
 0x3c4   : > { %v3427_v35 = vpop.permute.xlu1 %3426 }
 0x3c5   : > { %4003 = vst.msk [vmem:[%s6772_s7 + $0x8] sm:$0xff] %vm2727_vm2, %v3954_v1  ;;  %v3661_v49 = vmul.f32 %v3427_v35, %v6384_v30  ;;  %v3160_v30 = vsel %vm2727_vm2, %v3019_v42, 0.0  ;;  %5018 = vrsqrt.f32 %v3274_v14 }
 0x3c7   : > { %v3955_v43 = vadd.f32 %v6125_v46, %v3661_v49  ;;  %v3275_v46 = vadd.f32 1e-05, %v3177_v22 }
 0x3c9   : > { %4004 = vst.msk [vmem:[%s6772_s7 + $0x10] sm:$0xff] %vm2727_vm2, %v3955_v43  ;;  %5020 = vrsqrt.f32 %v3275_v46 }
 0x3cf   : > { %v5019_v37 = vpop.eup %5018 }
 0x3d0   : > { %v3372_v31 = vmul.f32 %v5093_v61, %v5019_v37  ;;  %v5096_v61 = vld [vmem:[%s5866_s18 + $0x158] sm:$0xff] }
 0x3d3   : > { %v5021_v55 = vpop.eup %5020 }
 0x3d4   : > { %v3373_v1 = vmul.f32 %v5094_v50, %v5021_v55 }
 0x3da   : > { %3161 = vadd.xlane.f32.xlu1 %v3160_v30  ;;  %v5095_v30 = vld [vmem:[%s5866_s18 + $0x148] sm:$0xff] }
 0x3e6   : > { %v3147_v24 = vpop.xlane.xlu0 %3146 }
 0x3e7   : > { %v3210_v20 = vmul.f32 0.020408163, %v3147_v24 }
 0x3e9   : > { %v3308_v4 = vadd.f32 1e-05, %v3210_v20 }
 0x3ea   : > { %v3153_v39 = vpop.xlane.xlu0 %3152 }
 0x3eb   : > { %5022 = vrsqrt.f32 %v3308_v4  ;;  %v3212_v54 = vmul.f32 0.020408163, %v3153_v39  ;;  %3451 = vperm.xlu1 %4722, %v3372_v31  }
 0x3ed   : > { %v3310_v33 = vadd.f32 1e-05, %v3212_v54 }
 0x3ee   : > { %v3159_v35 = vpop.xlane.xlu0 %3158 }
 0x3ef   : > { %5024 = vrsqrt.f32 %v3310_v33  ;;  %v3214_v49 = vmul.f32 0.020408163, %v3159_v35  ;;  %3456 = vperm.xlu1 %4722, %v3373_v1   ;;  %v7134_v1 = vld [vmem:[#allocation44_spill] sm:$0xff] }
 0x3f1   : > { %v3312_v43 = vadd.f32 1e-05, %v3214_v49  ;;  %v5097_v49 = vld [vmem:[%s5866_s18 + $0x168] sm:$0xff] }
 0x3f2   : > { %v3165_v47 = vpop.xlane.xlu0 %3164 }
 0x3f3   : > { %5026 = vrsqrt.f32 %v3312_v43  ;;  %v3216_v40 = vmul.f32 0.020408163, %v3165_v47  ;;  %v7135_v47 = vld [vmem:[#allocation2_spill] sm:$0xff] }
 0x3f5   : > { %v5023_v42 = vpop.eup %5022  ;;  %v3314_v14 = vadd.f32 1e-05, %v3216_v40  ;;  %v6799_v22 = vpop.xlane.xlu1 %3149 }
 0x3f6   : > { %v3406_v46 = vmul.f32 %v5095_v30, %v5023_v42 }
 0x3f7   : > { %5028 = vrsqrt.f32 %v3314_v14 }
 0x3f8   : > { %3621 = vperm.xlu0 %4721, %v3406_v46  }
 0x3f9   : > { %v5025_v37 = vpop.eup %5024  ;;  %v3432_v24 = vpop.permute.xlu1 %3431 }
 0x3fa   : > { %v3662_v20 = vmul.f32 %v3432_v24, %v6392_v0  ;;  %v3462_v4 = vpop.permute.xlu0 %3461  ;;  %v3408_v31 = vmul.f32 %v5096_v61, %v5025_v37  ;;  %v7137_v24 = vld [vmem:[#allocation10_spill] sm:$0xff] }
 0x3fb   : > { %v3668_v55 = vmul.f32 %v3462_v4, %v6450_v45 }
 0x3fc   : > { %v3956_v39 = vadd.f32 %v6127_v48, %v3662_v20  ;;  %3631 = vperm.xlu0 %4721, %v3408_v31   ;;  %v3265_v48 = vld [vmem:[%s5866_s18 + $0x178] sm:$0xff]  ;;  %v7138_v31 = vmov 1  }
 0x3fd   : > { %v5027_v54 = vpop.eup %5026  ;;  %v3962_v33 = vadd.f32 %v6140_v53, %v3668_v55  ;;  %v3437_v50 = vpop.permute.xlu1 %3436  ;;  %v7136_v53 = vld [vmem:[#allocation8_spill] sm:$0xff] }
 0x3fe   : > { %4005 = vst.msk [vmem:[%s6772_s7 + $0x18] sm:$0xff] %vm2727_vm2, %v3956_v39  ;;  %v3663_v35 = vmul.f32 %v3437_v50, %v7134_v1  ;;  %v3472_v0 = vpop.permute.xlu0 %3471  ;;  %v3410_v43 = vmul.f32 %v5097_v49, %v5027_v54  ;;  %v7139_v55 = vld [vmem:[#allocation12_spill] sm:$0xff]  ;;  %v7140_v50 = vld [vmem:[#allocation14_spill] sm:$0xff]  ;;  %v3181_v49 = vmul.f32 0.020408163, %v6715_v16 }
 0x3ff   : > { %4011 = vst.msk [vmem:[%s6772_s7 + $0x48] sm:$0xff] %vm2727_vm2, %v3962_v33  ;;  %v3670_v45 = vmul.f32 %v3472_v0, %v6470_v13  ;;  %v2923_v13 = vmul.f32 0.020408163, %v6702_v56  ;;  %v3179_v56 = vmul.f32 0.020408163, %v6712_v28 }
 0x400   : > { %v3957_v40 = vadd.f32 %v7135_v47, %v3663_v35  ;;  %3641 = vperm.xlu0 %4721, %v3410_v43   ;;  %v7141_v43 = vld [vmem:[#allocation16_spill] sm:$0xff]  ;;  %v3279_v47 = vadd.f32 1e-05, %v3181_v49 }
 0x401   : > { %v5029_v42 = vpop.eup %5028  ;;  %v3964_v14 = vadd.f32 %v7136_v53, %v3670_v45  ;;  %v6830_v54 = vsub.f32 %v6479_v62, %v2923_v13  ;;  %v3277_v62 = vadd.f32 1e-05, %v3179_v56  ;;  %v7144_v13 = vld [vmem:[#allocation22_spill] sm:$0xff]  ;;  %v5098_v56 = vld [vmem:[%s5866_s18 + $0x50] sm:$0xff] }
 0x402   : > { %4006 = vst.msk [vmem:[%s6772_s7 + $0x20] sm:$0xff] %vm2727_vm2, %v3957_v40  ;;  %v3482_v30 = vpop.permute.xlu0 %3481  ;;  %v3412_v46 = vmul.f32 %v5029_v42, %v3265_v48  ;;  %v3183_v40 = vmul.f32 0.020408163, %v6718_v63  ;;  %v7142_v42 = vld [vmem:[#allocation18_spill] sm:$0xff] }
 0x403   : > { %4013 = vst.msk [vmem:[%s6772_s7 + $0x58] sm:$0xff] %vm2727_vm2, %v3964_v14  ;;  %v3672_v37 = vmul.f32 %v3482_v30, %v6486_v32  ;;  %5030 = vrsqrt.f32 %v3277_v62  ;;  %v3185_v30 = vmul.f32 0.020408163, %v6721_v7  ;;  %v5099_v62 = vld [vmem:[%s5866_s18 + $0x60] sm:$0xff] }
 0x404   : > { %3651 = vperm.xlu0 %4721, %v3412_v46   ;;  %5032 = vrsqrt.f32 %v3279_v47  ;;  %v3281_v14 = vadd.f32 1e-05, %v3183_v40  ;;  %v7143_v46 = vld [vmem:[#allocation20_spill] sm:$0xff] }
 0x405   : > { %v3966_v20 = vadd.f32 %v7137_v24, %v3672_v37  ;;  %v3283_v24 = vadd.f32 1e-05, %v3185_v30  ;;  %v5100_v47 = vld [vmem:[%s5866_s18 + $0x70] sm:$0xff]  ;;  %v5101_v30 = vld [vmem:[%s5866_s18 + $0x80] sm:$0xff] }
 0x406   : > { %v3492_v4 = vpop.permute.xlu0 %3491  ;;  %5034 = vrsqrt.f32 %v3281_v14 }
 0x407   : > { %4015 = vst.msk [vmem:[%s6772_s7 + $0x68] sm:$0xff] %vm2727_vm2, %v3966_v20  ;;  %v3674_v61 = vmul.f32 %v3492_v4, %v6500_v60  ;;  %v3021_v60 = vmul.f32 %v6830_v54, %v6830_v54  ;;  %v3187_v20 = vmul.f32 0.020408163, %v6724_v36  ;;  %5036 = vrsqrt.f32 %v3283_v24  ;;  %v5102_v24 = vld [vmem:[%s5866_s18 + $0x90] sm:$0xff] }
 0x408   : > { %4723 = vset.pattern.permute.xlu0 %v7138_v31 }
 0x409   : > { %v3968_v39 = vadd.f32 %v7139_v55, %v3674_v61  ;;  %3945 = vperm.xlu0 %4723, %v3265_v48   ;;  %v3285_v55 = vadd.f32 1e-05, %v3187_v20 }
 0x40a   : > { %v3502_v32 = vpop.permute.xlu0 %3501 }
 0x40b   : > { %4017 = vst.msk [vmem:[%s6772_s7 + $0x78] sm:$0xff] %vm2727_vm2, %v3968_v39  ;;  %v3676_v33 = vmul.f32 %v3502_v32, %v6512_v2  ;;  %v3166_v2 = vsel %vm2727_vm2, %v3021_v60, 0.0  ;;  %v3189_v39 = vmul.f32 0.020408163, %v6728_v17  ;;  %v7145_v32 = vld [vmem:[#allocation24_spill] sm:$0xff]  ;;  %5038 = vrsqrt.f32 %v3285_v55  ;;  %v7146_v60 = vld [vmem:[#allocation26_spill] sm:$0xff] }
 0x40c   : > { %v3199_v55 = vmul.f32 0.020408163, %v6751_v12 }
 0x40d   : > { %v3970_v1 = vadd.f32 %v7140_v50, %v3676_v33  ;;  %v5031_v61 = vpop.eup %5030 }
 0x40e   : > { %v3512_v35 = vpop.permute.xlu0 %3511  ;;  %v3375_v50 = vmul.f32 %v5098_v56, %v5031_v61  ;;  %v5033_v36 = vpop.eup %5032  ;;  %v5103_v56 = vld [vmem:[%s5866_s18 + $0xa0] sm:$0xff]  ;;  %v3297_v12 = vadd.f32 1e-05, %v3199_v55 }
 0x40f   : > { %4019 = vst.msk [vmem:[%s6772_s7 + $0x88] sm:$0xff] %vm2727_vm2, %v3970_v1  ;;  %v3678_v0 = vmul.f32 %v3512_v35, %v6524_v18  ;;  %v3191_v35 = vmul.f32 0.020408163, %v6734_v15  ;;  %v3377_v49 = vmul.f32 %v5099_v62, %v5033_v36 }
 0x411   : > { %v3972_v45 = vadd.f32 %v7141_v43, %v3678_v0  ;;  %v5035_v43 = vpop.eup %5034 }
 0x412   : > { %v3522_v48 = vpop.permute.xlu0 %3521  ;;  %v3379_v40 = vmul.f32 %v5100_v47, %v5035_v43 }
 0x413   : > { %4021 = vst.msk [vmem:[%s6772_s7 + $0x98] sm:$0xff] %vm2727_vm2, %v3972_v45  ;;  %v3680_v28 = vmul.f32 %v3522_v48, %v6536_v57  ;;  %3167 = vadd.xlane.f32.xlu1 %v3166_v2  ;;  %v3193_v48 = vmul.f32 0.020408163, %v6738_v11  ;;  %v7147_v2 = vld [vmem:[#allocation28_spill] sm:$0xff] }
 0x415   : > { %v3974_v18 = vadd.f32 %v7142_v42, %v3680_v28  ;;  %v5037_v42 = vpop.eup %5036 }
 0x416   : > { %v3532_v53 = vpop.permute.xlu0 %3531 }
 0x417   : > { %4023 = vst.msk [vmem:[%s6772_s7 + $0xa8] sm:$0xff] %vm2727_vm2, %v3974_v18  ;;  %v3682_v16 = vmul.f32 %v3532_v53, %v6548_v6  ;;  %v3195_v53 = vmul.f32 0.020408163, %v6744_v10 }
 0x419   : > { %v3976_v37 = vadd.f32 %v7143_v46, %v3682_v16  ;;  %v7148_v16 = vld [vmem:[#allocation30_spill] sm:$0xff]  ;;  %v3381_v46 = vmul.f32 %v5101_v30, %v5037_v42  ;;  %v5106_v42 = vld [vmem:[%s5866_s18 + $0xd0] sm:$0xff] }
 0x41a   : > { %v3542_v57 = vpop.permute.xlu0 %3541 }
 0x41b   : > { %4025 = vst.msk [vmem:[%s6772_s7 + $0xb8] sm:$0xff] %vm2727_vm2, %v3976_v37  ;;  %v3684_v63 = vmul.f32 %v3542_v57, %v6560_v5  ;;  %v5039_v37 = vpop.eup %5038  ;;  %v3293_v57 = vadd.f32 1e-05, %v3195_v53 }
 0x41c   : > { %v3383_v20 = vmul.f32 %v5102_v24, %v5039_v37  ;;  %v3211_v24 = vmul.f32 0.020408163, %v6799_v22 }
 0x41d   : > { %v3978_v4 = vadd.f32 %v7144_v13, %v3684_v63 }
 0x41e   : > { %v3552_v6 = vpop.permute.xlu0 %3551 }
 0x41f   : > { %4027 = vst.msk [vmem:[%s6772_s7 + $0xc8] sm:$0xff] %vm2727_vm2, %v3978_v4  ;;  %v3686_v7 = vmul.f32 %v3552_v6, %v6572_v9  ;;  %v3287_v9 = vadd.f32 1e-05, %v3189_v39  ;;  %v7149_v4 = vld [vmem:[#allocation45_spill] sm:$0xff]  ;;  %v7150_v39 = vld [vmem:[#allocation3_spill] sm:$0xff] }
 0x421   : > { %v3980_v5 = vadd.f32 %v7145_v32, %v3686_v7  ;;  %5040 = vrsqrt.f32 %v3287_v9  ;;  %v3201_v9 = vmul.f32 0.020408163, %v6754_v38 }
 0x422   : > { %v3562_v33 = vpop.permute.xlu0 %3561 }
 0x423   : > { %4029 = vst.msk [vmem:[%s6772_s7 + $0xd8] sm:$0xff] %vm2727_vm2, %v3980_v5  ;;  %v3688_v1 = vmul.f32 %v3562_v33, %v6584_v51  ;;  %v3289_v51 = vadd.f32 1e-05, %v3191_v35  ;;  %v7153_v35 = vld [vmem:[#allocation4_spill] sm:$0xff] }
 0x424   : > { %3466 = vperm.xlu1 %4722, %v3375_v50  }
 0x425   : > { %v3982_v0 = vadd.f32 %v7146_v60, %v3688_v1  ;;  %5042 = vrsqrt.f32 %v3289_v51  ;;  %v3203_v51 = vmul.f32 0.020408163, %v6756_v3 }
 0x426   : > { %v3572_v17 = vpop.permute.xlu0 %3571 }
 0x427   : > { %4031 = vst.msk [vmem:[%s6772_s7 + $0xe8] sm:$0xff] %vm2727_vm2, %v3982_v0  ;;  %v3690_v45 = vmul.f32 %v3572_v17, %v6596_v21  ;;  %v3291_v21 = vadd.f32 1e-05, %v3193_v48  ;;  %v5104_v17 = vld [vmem:[%s5866_s18 + $0xb0] sm:$0xff]  ;;  %v7154_v48 = vld [vmem:[#allocation34_spill] sm:$0xff] }
 0x428   : > { %3476 = vperm.xlu1 %4722, %v3377_v49   ;;  %v3301_v47 = vadd.f32 1e-05, %v3203_v51 }
 0x429   : > { %v3984_v28 = vadd.f32 %v7147_v2, %v3690_v45  ;;  %5044 = vrsqrt.f32 %v3291_v21  ;;  %v3299_v45 = vadd.f32 1e-05, %v3201_v9  ;;  %v5115_v9 = vld [vmem:[%s5866_s18 + $0x160] sm:$0xff] }
 0x42a   : > { %v3582_v15 = vpop.permute.xlu0 %3581  ;;  %5046 = vrsqrt.f32 %v3293_v57 }
 0x42b   : > { %4033 = vst.msk [vmem:[%s6772_s7 + $0xf8] sm:$0xff] %vm2727_vm2, %v3984_v28  ;;  %v3692_v18 = vmul.f32 %v3582_v15, %v6608_v58  ;;  %v3197_v58 = vmul.f32 0.020408163, %v6748_v41  ;;  %v5041_v13 = vpop.eup %5040  ;;  %v7151_v41 = vld [vmem:[#allocation32_spill] sm:$0xff]  ;;  %v5105_v28 = vld [vmem:[%s5866_s18 + $0xc0] sm:$0xff] }
 0x42c   : > { %3486 = vperm.xlu1 %4722, %v3379_v40   ;;  %v3385_v50 = vmul.f32 %v5103_v56, %v5041_v13  ;;  %v3205_v40 = vmul.f32 0.020408163, %v6760_v23 }
 0x42d   : > { %v3986_v14 = vadd.f32 %v7148_v16, %v3692_v18  ;;  %v3295_v7 = vadd.f32 1e-05, %v3197_v58  ;;  %v3207_v16 = vmul.f32 0.020408163, %v6763_v26  ;;  %v3209_v58 = vmul.f32 0.020408163, %v6775_v19 }
 0x42e   : > { %v6883_v11 = vpop.xlane.xlu1 %3155  ;;  %v3303_v21 = vadd.f32 1e-05, %v3205_v40  ;;  %v5110_v19 = vld [vmem:[%s5866_s18 + $0x110] sm:$0xff] }
 0x42f   : > { %4035 = vst.msk [vmem:[%s6772_s7 + $0x108] sm:$0xff] %vm2727_vm2, %v3986_v14  ;;  %v5043_v36 = vpop.eup %5042  ;;  %5048 = vrsqrt.f32 %v3295_v7  ;;  %v7155_v14 = vld [vmem:[#allocation36_spill] sm:$0xff]  ;;  %v3305_v23 = vadd.f32 1e-05, %v3207_v16  ;;  %v3307_v26 = vadd.f32 1e-05, %v3209_v58 }
 0x430   : > { %3496 = vperm.xlu1 %4722, %v3381_v46   ;;  %v3387_v62 = vmul.f32 %v5104_v17, %v5043_v36  ;;  %5050 = vrsqrt.f32 %v3297_v12  ;;  %v5107_v46 = vld [vmem:[%s5866_s18 + $0xe0] sm:$0xff] }
 0x431   : > { %5052 = vrsqrt.f32 %v3299_v45  ;;  %v7157_v45 = vld [vmem:[#allocation5_spill] sm:$0xff] }
 0x432   : > { %v3442_v10 = vpop.permute.xlu1 %3441  ;;  %v3592_v63 = vpop.permute.xlu0 %3591  ;;  %5054 = vrsqrt.f32 %v3301_v47 }
 0x433   : > { %v3664_v6 = vmul.f32 %v3442_v10, %v7149_v4  ;;  %v3694_v61 = vmul.f32 %v3592_v63, %v6620_v34  ;;  %v7152_v34 = vld [vmem:[#allocation46_spill] sm:$0xff]  ;;  %v5045_v49 = vpop.eup %5044  ;;  %5056 = vrsqrt.f32 %v3303_v21 }
 0x434   : > { %3506 = vperm.xlu1 %4722, %v3383_v20   ;;  %v5047_v38 = vpop.eup %5046  ;;  %v3389_v15 = vmul.f32 %v5105_v28, %v5045_v49  ;;  %5058 = vrsqrt.f32 %v3305_v23  ;;  %v5109_v20 = vld [vmem:[%s5866_s18 + $0x100] sm:$0xff]  ;;  %v7156_v49 = vld [vmem:[#allocation47_spill] sm:$0xff] }
 0x435   : > { %v3958_v32 = vadd.f32 %v7150_v39, %v3664_v6  ;;  %v3988_v5 = vadd.f32 %v7151_v41, %v3694_v61  ;;  %v3391_v18 = vmul.f32 %v5106_v42, %v5047_v38  ;;  %5060 = vrsqrt.f32 %v3307_v26  ;;  %v7159_v28 = vld [vmem:[#allocation6_spill] sm:$0xff] }
 0x436   : > { %v3447_v33 = vpop.permute.xlu1 %3446  ;;  %v3309_v6 = vadd.f32 1e-05, %v3211_v24  ;;  %v3213_v61 = vmul.f32 0.020408163, %v6883_v11 }
 0x437   : > { %4007 = vst.msk [vmem:[%s6772_s7 + $0x28] sm:$0xff] %vm2727_vm2, %v3958_v32  ;;  %4037 = vst.msk [vmem:[%s6772_s7 + $0x118] sm:$0xff] %vm2727_vm2, %v3988_v5  ;;  %v3665_v1 = vmul.f32 %v3447_v33, %v7152_v34  ;;  %v5111_v32 = vld [vmem:[%s5866_s18 + $0x120] sm:$0xff]  ;;  %v5112_v5 = vld [vmem:[%s5866_s18 + $0x130] sm:$0xff] }
 0x438   : > { %3516 = vperm.xlu1 %4722, %v3385_v50   ;;  %5062 = vrsqrt.f32 %v3309_v6  ;;  %v3311_v39 = vadd.f32 1e-05, %v3213_v61  ;;  %v5113_v50 = vld [vmem:[%s5866_s18 + $0x140] sm:$0xff]  ;;  %v5114_v34 = vld [vmem:[%s5866_s18 + $0x150] sm:$0xff] }
 0x439   : > { %v3959_v60 = vadd.f32 %v7153_v35, %v3665_v1  ;;  %v5049_v53 = vpop.eup %5048 }
 0x43a   : > { %v3602_v0 = vpop.permute.xlu0 %3601  ;;  %v3393_v37 = vmul.f32 %v5107_v46, %v5049_v53  ;;  %v5051_v57 = vpop.eup %5050  ;;  %5064 = vrsqrt.f32 %v3311_v39  ;;  %v7160_v53 = vld [vmem:[#allocation38_spill] sm:$0xff]  ;;  %v7167_v39 = vld [vmem:[#allocation51_spill] sm:$0xff] }
 0x43b   : > { %4008 = vst.msk [vmem:[%s6772_s7 + $0x30] sm:$0xff] %vm2727_vm2, %v3959_v60  ;;  %v3696_v43 = vmul.f32 %v3602_v0, %v6632_v25  ;;  %v5053_v63 = vpop.eup %5052 }
 0x43c   : > { %3526 = vperm.xlu1 %4722, %v3387_v62   ;;  %v3397_v13 = vmul.f32 %v5109_v20, %v5053_v63  ;;  %v5055_v4 = vpop.eup %5054 }
 0x43d   : > { %v3990_v2 = vadd.f32 %v7154_v48, %v3696_v43  ;;  %v3399_v7 = vmul.f32 %v5110_v19, %v5055_v4  ;;  %v5057_v55 = vpop.eup %5056  ;;  %v7166_v19 = vld [vmem:[#allocation9_spill] sm:$0xff] }
 0x43e   : > { %v3401_v41 = vmul.f32 %v5111_v32, %v5057_v55  ;;  %v5059_v22 = vpop.eup %5058 }
 0x43f   : > { %4039 = vst.msk [vmem:[%s6772_s7 + $0x128] sm:$0xff] %vm2727_vm2, %v3990_v2  ;;  %v3403_v33 = vmul.f32 %v5112_v5, %v5059_v22  ;;  %v5061_v56 = vpop.eup %5060  ;;  %v7158_v2 = vld [vmem:[#allocation48_spill] sm:$0xff]  ;;  %v7168_v5 = vld [vmem:[#allocation11_spill] sm:$0xff] }
 0x440   : > { %3536 = vperm.xlu1 %4722, %v3389_v15   ;;  %v3405_v11 = vmul.f32 %v5113_v50, %v5061_v56 }
 0x442   : > { %v3612_v25 = vpop.permute.xlu0 %3611  ;;  %v5063_v36 = vpop.eup %5062 }
 0x443   : > { %v3698_v3 = vmul.f32 %v3612_v25, %v6641_v44  ;;  %v5108_v44 = vld [vmem:[%s5866_s18 + $0xf0] sm:$0xff]  ;;  %v3407_v1 = vmul.f32 %v5114_v34, %v5063_v36  ;;  %v7170_v34 = vld [vmem:[#allocation13_spill] sm:$0xff] }
 0x444   : > { %3546 = vperm.xlu1 %4722, %v3391_v18   ;;  %v3395_v10 = vmul.f32 %v5108_v44, %v5051_v57  ;;  %v5065_v12 = vpop.eup %5064  ;;  %v5116_v25 = vld [vmem:[%s5866_s18 + $0x170] sm:$0xff]  ;;  %v7162_v57 = vld [vmem:[#allocation41_spill] sm:$0xff] }
 0x445   : > { %v3992_v30 = vadd.f32 %v7155_v14, %v3698_v3  ;;  %v3409_v35 = vmul.f32 %v5115_v9, %v5065_v12  ;;  %v7161_v14 = vld [vmem:[#allocation40_spill] sm:$0xff]  ;;  %v7171_v9 = vld [vmem:[#allocation53_spill] sm:$0xff] }
 0x447   : > { %4041 = vst.msk [vmem:[%s6772_s7 + $0x138] sm:$0xff] %vm2727_vm2, %v3992_v30 }
 0x448   : > { %3556 = vperm.xlu1 %4722, %v3393_v37  }
 0x44c   : > { %3566 = vperm.xlu1 %4722, %v3395_v10  }
 0x450   : > { %3576 = vperm.xlu1 %4722, %v3397_v13   ;;  %v7164_v13 = vld [vmem:[#allocation7_spill] sm:$0xff] }
 0x454   : > { %3586 = vperm.xlu1 %4722, %v3399_v7  }
 0x458   : > { %3596 = vperm.xlu1 %4722, %v3401_v41   ;;  %v3266_v41 = vld [vmem:[%s5866_s18 + $0x180] sm:$0xff] }
 0x45c   : > { %3606 = vperm.xlu1 %4722, %v3403_v33  }
 0x460   : > { %3616 = vperm.xlu1 %4722, %v3405_v11   ;;  %v7169_v11 = vld [vmem:[#allocation52_spill] sm:$0xff] }
 0x464   : > { %3626 = vperm.xlu1 %4722, %v3407_v1  }
 0x467   : > { %v3162_v60 = vpop.xlane.xlu1 %3161 }
 0x468   : > { %v3215_v0 = vmul.f32 0.020408163, %v3162_v60  ;;  %3636 = vperm.xlu1 %4722, %v3409_v35   ;;  %v7172_v60 = vld [vmem:[#allocation15_spill] sm:$0xff] }
 0x46a   : > { %v3313_v17 = vadd.f32 1e-05, %v3215_v0 }
 0x46b   : > { %v3452_v62 = vpop.permute.xlu1 %3451 }
 0x46c   : > { %5066 = vrsqrt.f32 %v3313_v17  ;;  %v3666_v43 = vmul.f32 %v3452_v62, %v7156_v49  ;;  %v7173_v62 = vld [vmem:[#allocation54_spill] sm:$0xff] }
 0x46e   : > { %v3960_v51 = vadd.f32 %v7157_v45, %v3666_v43  ;;  %v7174_v43 = vld [vmem:[#allocation17_spill] sm:$0xff] }
 0x46f   : > { %v3457_v48 = vpop.permute.xlu1 %3456 }
 0x470   : > { %4009 = vst.msk [vmem:[%s6772_s7 + $0x38] sm:$0xff] %vm2727_vm2, %v3960_v51  ;;  %v3667_v38 = vmul.f32 %v3457_v48, %v7158_v2  ;;  %v7175_v48 = vld [vmem:[#allocation55_spill] sm:$0xff] }
 0x472   : > { %v3961_v15 = vadd.f32 %v7159_v28, %v3667_v38  ;;  %v7176_v38 = vld [vmem:[#allocation19_spill] sm:$0xff] }
 0x474   : > { %4010 = vst.msk [vmem:[%s6772_s7 + $0x40] sm:$0xff] %vm2727_vm2, %v3961_v15  ;;  %v7177_v15 = vld [vmem:[#allocation56_spill] sm:$0xff] }
 0x476   : > { %v5067_v47 = vpop.eup %5066 }
 0x477   : > { %v3622_v40 = vpop.permute.xlu0 %3621  ;;  %v3411_v42 = vmul.f32 %v5116_v25, %v5067_v47 }
 0x478   : > { %v3700_v18 = vmul.f32 %v3622_v40, %v6674_v59  ;;  %v7178_v40 = vld [vmem:[#allocation21_spill] sm:$0xff] }
 0x479   : > { %3646 = vperm.xlu1 %4722, %v3411_v42  }
 0x47a   : > { %v3994_v3 = vadd.f32 %v7160_v53, %v3700_v18  ;;  %v7179_v18 = vld [vmem:[#allocation57_spill] sm:$0xff] }
 0x47b   : > { %v3632_v21 = vpop.permute.xlu0 %3631 }
 0x47c   : > { %4043 = vst.msk [vmem:[%s6772_s7 + $0x148] sm:$0xff] %vm2727_vm2, %v3994_v3  ;;  %v3702_v16 = vmul.f32 %v3632_v21, %v6677_v29  ;;  %v7180_v3 = vld [vmem:[#allocation23_spill] sm:$0xff] }
 0x47e   : > { %v3996_v30 = vadd.f32 %v7161_v14, %v3702_v16  ;;  %v7181_v14 = vld [vmem:[#allocation58_spill] sm:$0xff] }
 0x47f   : > { %v3642_v46 = vpop.permute.xlu0 %3641 }
 0x480   : > { %4045 = vst.msk [vmem:[%s6772_s7 + $0x158] sm:$0xff] %vm2727_vm2, %v3996_v30  ;;  %v3704_v37 = vmul.f32 %v3642_v46, %v6684_v52  ;;  %v7163_v52 = vld [vmem:[#allocation49_spill] sm:$0xff] }
 0x481   : > { %v7182_v46 = vld [vmem:[#allocation25_spill] sm:$0xff] }
 0x482   : > { %v3998_v23 = vadd.f32 %v7162_v57, %v3704_v37 }
 0x483   : > { %v3652_v59 = vpop.permute.xlu0 %3651 }
 0x484   : > { %4047 = vst.msk [vmem:[%s6772_s7 + $0x168] sm:$0xff] %vm2727_vm2, %v3998_v23  ;;  %v3706_v58 = vmul.f32 %v3652_v59, %v6690_v8  ;;  %v7165_v8 = vld [vmem:[#allocation50_spill] sm:$0xff]  ;;  %v7183_v23 = vld [vmem:[#allocation59_spill] sm:$0xff] }
 0x488   : > { %v3946_v44 = vpop.permute.xlu0 %3945 }
 0x489   : > { %v4000_v10 = vadd.f32 %v3946_v44, %v3706_v58  ;;  %v7184_v58 = vld [vmem:[#allocation27_spill] sm:$0xff] }
 0x48b   : > { %4049 = vst.msk [vmem:[%s6772_s7 + $0x178] sm:$0xff] %vm2727_vm2, %v4000_v10 }
 0x4a0   : > { %v3168_v29 = vpop.xlane.xlu1 %3167 }
 0x4a1   : > { %v3217_v63 = vmul.f32 0.020408163, %v3168_v29  ;;  %v7185_v29 = vld [vmem:[#allocation60_spill] sm:$0xff] }
 0x4a3   : > { %v3315_v26 = vadd.f32 1e-05, %v3217_v63 }
 0x4a4   : > { %v3467_v24 = vpop.permute.xlu1 %3466 }
 0x4a5   : > { %5068 = vrsqrt.f32 %v3315_v26  ;;  %v3669_v20 = vmul.f32 %v3467_v24, %v7163_v52  ;;  %v7186_v26 = vld [vmem:[#allocation29_spill] sm:$0xff] }
 0x4a7   : > { %v3963_v4 = vadd.f32 %v7164_v13, %v3669_v20  ;;  %v7187_v20 = vld [vmem:[#allocation61_spill] sm:$0xff] }
 0x4a8   : > { %v3477_v6 = vpop.permute.xlu1 %3476 }
 0x4a9   : > { %4012 = vst.msk [vmem:[%s6772_s7 + $0x50] sm:$0xff] %vm2727_vm2, %v3963_v4  ;;  %v3671_v61 = vmul.f32 %v3477_v6, %v7165_v8  ;;  %v7188_v4 = vld [vmem:[#allocation31_spill] sm:$0xff] }
 0x4ab   : > { %v3965_v7 = vadd.f32 %v7166_v19, %v3671_v61  ;;  %v7189_v61 = vld [vmem:[#allocation62_spill] sm:$0xff] }
 0x4ac   : > { %v3487_v55 = vpop.permute.xlu1 %3486 }
 0x4ad   : > { %4014 = vst.msk [vmem:[%s6772_s7 + $0x60] sm:$0xff] %vm2727_vm2, %v3965_v7  ;;  %v3673_v32 = vmul.f32 %v3487_v55, %v7167_v39  ;;  %v7190_v7 = vld [vmem:[#allocation33_spill] sm:$0xff] }
 0x4af   : > { %v5069_v22 = vpop.eup %5068  ;;  %v3967_v33 = vadd.f32 %v7168_v5, %v3673_v32  ;;  %v7191_v32 = vld [vmem:[#allocation63_spill] sm:$0xff] }
 0x4b0   : > { %v3497_v56 = vpop.permute.xlu1 %3496  ;;  %v3413_v50 = vmul.f32 %v5069_v22, %v3266_v41  ;;  %v7192_v22 = vld [vmem:[#allocation35_spill] sm:$0xff] }
 0x4b1   : > { %4016 = vst.msk [vmem:[%s6772_s7 + $0x70] sm:$0xff] %vm2727_vm2, %v3967_v33  ;;  %v3675_v36 = vmul.f32 %v3497_v56, %v7169_v11  ;;  %v7193_v56 = vld [vmem:[#allocation64_spill] sm:$0xff]  ;;  %v7194_v11 = vld [vmem:[#allocation37_spill] sm:$0xff] }
 0x4b2   : > { %3656 = vperm.xlu1 %4722, %v3413_v50  }
 0x4b3   : > { %v3969_v1 = vadd.f32 %v7170_v34, %v3675_v36 }
 0x4b4   : > { %v3507_v12 = vpop.permute.xlu1 %3506 }
 0x4b5   : > { %4018 = vst.msk [vmem:[%s6772_s7 + $0x80] sm:$0xff] %vm2727_vm2, %v3969_v1  ;;  %v3677_v35 = vmul.f32 %v3507_v12, %v7171_v9  ;;  %v7195_v1 = vld [vmem:[#allocation65_spill] sm:$0xff]  ;;  %v7196_v9 = vld [vmem:[#allocation39_spill] sm:$0xff] }
 0x4b6   : > { %4724 = vset.pattern.permute.xlu1 %v7138_v31 }
 0x4b7   : > { %v3971_v0 = vadd.f32 %v7172_v60, %v3677_v35  ;;  %3950 = vperm.xlu1 %4724, %v3266_v41  }
 0x4b8   : > { %v3517_v17 = vpop.permute.xlu1 %3516 }
 0x4b9   : > { %4020 = vst.msk [vmem:[%s6772_s7 + $0x90] sm:$0xff] %vm2727_vm2, %v3971_v0  ;;  %v3679_v49 = vmul.f32 %v3517_v17, %v7173_v62  ;;  %v7197_v0 = vld [vmem:[#allocation66_spill] sm:$0xff] }
 0x4ba   : > { %v7198_v62 = vld [vmem:[#allocation42_spill] sm:$0xff] }
 0x4bb   : > { %v3973_v45 = vadd.f32 %v7174_v43, %v3679_v49 }
 0x4bc   : > { %v3527_v51 = vpop.permute.xlu1 %3526 }
 0x4bd   : > { %4022 = vst.msk [vmem:[%s6772_s7 + $0xa0] sm:$0xff] %vm2727_vm2, %v3973_v45  ;;  %v3681_v2 = vmul.f32 %v3527_v51, %v7175_v48  ;;  %v7199_v51 = vld [vmem:[#allocation43_spill] sm:$0xff] }
 0x4bf   : > { %v3975_v31 = vadd.f32 %v7176_v38, %v3681_v2 }
 0x4c0   : > { %v3537_v28 = vpop.permute.xlu1 %3536 }
 0x4c1   : > { %4024 = vst.msk [vmem:[%s6772_s7 + $0xb0] sm:$0xff] %vm2727_vm2, %v3975_v31  ;;  %v3683_v47 = vmul.f32 %v3537_v28, %v7177_v15 }
 0x4c3   : > { %v3977_v25 = vadd.f32 %v7178_v40, %v3683_v47 }
 0x4c4   : > { %v3547_v42 = vpop.permute.xlu1 %3546 }
 0x4c5   : > { %4026 = vst.msk [vmem:[%s6772_s7 + $0xc0] sm:$0xff] %vm2727_vm2, %v3977_v25  ;;  %v3685_v53 = vmul.f32 %v3547_v42, %v7179_v18 }
 0x4c7   : > { %v3979_v21 = vadd.f32 %v7180_v3, %v3685_v53 }
 0x4c8   : > { %v3557_v16 = vpop.permute.xlu1 %3556 }
 0x4c9   : > { %4028 = vst.msk [vmem:[%s6772_s7 + $0xd0] sm:$0xff] %vm2727_vm2, %v3979_v21  ;;  %v3687_v30 = vmul.f32 %v3557_v16, %v7181_v14 }
 0x4cb   : > { %v3981_v37 = vadd.f32 %v7182_v46, %v3687_v30 }
 0x4cc   : > { %v3567_v57 = vpop.permute.xlu1 %3566 }
 0x4cd   : > { %4030 = vst.msk [vmem:[%s6772_s7 + $0xe0] sm:$0xff] %vm2727_vm2, %v3981_v37  ;;  %v3689_v59 = vmul.f32 %v3567_v57, %v7183_v23 }
 0x4cf   : > { %v3983_v44 = vadd.f32 %v7184_v58, %v3689_v59 }
 0x4d0   : > { %v3577_v10 = vpop.permute.xlu1 %3576 }
 0x4d1   : > { %4032 = vst.msk [vmem:[%s6772_s7 + $0xf0] sm:$0xff] %vm2727_vm2, %v3983_v44  ;;  %v3691_v63 = vmul.f32 %v3577_v10, %v7185_v29 }
 0x4d3   : > { %v3985_v24 = vadd.f32 %v7186_v26, %v3691_v63 }
 0x4d4   : > { %v3587_v52 = vpop.permute.xlu1 %3586 }
 0x4d5   : > { %4034 = vst.msk [vmem:[%s6772_s7 + $0x100] sm:$0xff] %vm2727_vm2, %v3985_v24  ;;  %v3693_v13 = vmul.f32 %v3587_v52, %v7187_v20 }
 0x4d7   : > { %v3987_v6 = vadd.f32 %v7188_v4, %v3693_v13 }
 0x4d8   : > { %v3597_v8 = vpop.permute.xlu1 %3596 }
 0x4d9   : > { %4036 = vst.msk [vmem:[%s6772_s7 + $0x110] sm:$0xff] %vm2727_vm2, %v3987_v6  ;;  %v3695_v19 = vmul.f32 %v3597_v8, %v7189_v61 }
 0x4db   : > { %v3989_v55 = vadd.f32 %v7190_v7, %v3695_v19 }
 0x4dc   : > { %v3607_v39 = vpop.permute.xlu1 %3606 }
 0x4dd   : > { %4038 = vst.msk [vmem:[%s6772_s7 + $0x120] sm:$0xff] %vm2727_vm2, %v3989_v55  ;;  %v3697_v41 = vmul.f32 %v3607_v39, %v7191_v32 }
 0x4df   : > { %v3991_v5 = vadd.f32 %v7192_v22, %v3697_v41 }
 0x4e0   : > { %v3617_v33 = vpop.permute.xlu1 %3616 }
 0x4e1   : > { %4040 = vst.msk [vmem:[%s6772_s7 + $0x130] sm:$0xff] %vm2727_vm2, %v3991_v5  ;;  %v3699_v50 = vmul.f32 %v3617_v33, %v7193_v56 }
 0x4e3   : > { %v3993_v36 = vadd.f32 %v7194_v11, %v3699_v50 }
 0x4e4   : > { %v3627_v34 = vpop.permute.xlu1 %3626 }
 0x4e5   : > { %4042 = vst.msk [vmem:[%s6772_s7 + $0x140] sm:$0xff] %vm2727_vm2, %v3993_v36  ;;  %v3701_v12 = vmul.f32 %v3627_v34, %v7195_v1 }
 0x4e7   : > { %v3995_v35 = vadd.f32 %v7196_v9, %v3701_v12 }
 0x4e8   : > { %v3637_v60 = vpop.permute.xlu1 %3636 }
 0x4e9   : > { %4044 = vst.msk [vmem:[%s6772_s7 + $0x150] sm:$0xff] %vm2727_vm2, %v3995_v35  ;;  %v3703_v17 = vmul.f32 %v3637_v60, %v7197_v0 }
 0x4eb   : > { %v3997_v49 = vadd.f32 %v7198_v62, %v3703_v17 }
 0x4ed   : > { %4046 = vst.msk [vmem:[%s6772_s7 + $0x160] sm:$0xff] %vm2727_vm2, %v3997_v49 }
 0x4f8   : > { %v3647_v43 = vpop.permute.xlu1 %3646 }
 0x4f9   : > { %v3705_v45 = vmul.f32 %v3647_v43, %v6790_v27 }
 0x4fb   : > { %v3999_v48 = vadd.f32 %v7199_v51, %v3705_v45 }
 0x4fd   : > { %4048 = vst.msk [vmem:[%s6772_s7 + $0x170] sm:$0xff] %vm2727_vm2, %v3999_v48 }
 0x531   : > { %v3657_v2 = vpop.permute.xlu1 %3656 }
 0x532   : > { %v3707_v38 = vmul.f32 %v3657_v2, %v6830_v54 }
 0x536   : > { %v3951_v31 = vpop.permute.xlu1 %3950 }
 0x537   : > { %v4001_v28 = vadd.f32 %v3951_v31, %v3707_v38 }
 0x539   : > { %4050 = vst.msk [vmem:[%s6772_s7 + $0x180] sm:$0xff] %vm2727_vm2, %v4001_v28 }
 0x53a PF: > { %s14_s15 = sadd.s32 1, %s5123_s15  }
 0x53b   : > { %p11_p5 = scmp.ge.s32.totalorder %s14_s15, 4  }
 0x53d   :  { %13 = sbr.rel (!%p11_p5) target bundleno = 1 (0x1), region = 69 }

</bundles_post_ra>
